<compile_context>
chip_gen: v7x
topology: tpu7x:2x2x1
jax: 0.10.0
libtpu: 0.0.40
codegen_flags: <defaults>
</compile_context>

<pallas_src>
import functools

import jax
import jax.numpy as jnp
from jax import lax
from jax.experimental import pallas as pl
from jax.experimental.pallas import tpu as pltpu


# ----------------------------- config ---------------------------------------
HIDDEN = 256         # config.hidden_size
N_HEADS = 4          # config.num_attention_heads
N_KV_HEADS = 2       # config.num_key_value_heads (GQA)
HEAD_DIM = 128       # config.head_dim (lane-aligned, like real Gemma)
INTER = 512          # config.intermediate_size
RMS_EPS = 1e-6       # config.rms_norm_eps
ROPE_BASE = 10000.0
T_TOKENS = 256       # total packed tokens
MAX_POS = 256
BLOCK_T = 128        # pass-1 token tile
BLOCK_Q = 128        # pass-2 query tile
BLOCK_KV = 128       # pass-2 kv tile (raise to 256 on v6e/v7x at production T)


def _rmsnorm(x, w_plus_one, eps):
  var = jnp.mean(x * x, axis=-1, keepdims=True)
  return w_plus_one * (x * lax.rsqrt(var + eps))


# ----------------------- pass 1: RMSNorm + QKV + RoPE ------------------------
def _qkv_rope_kernel(x_ref, cos_ref, sin_ref, ln1_ref, wqkv_ref,
                     q_ref, k_ref, v_ref,
                     *, n_heads, n_kv_heads, head_dim, eps):
  f32, bf16 = jnp.float32, jnp.bfloat16
  Dh = head_dim
  H, KVH = n_heads, n_kv_heads
  scale = Dh ** -0.5

  h = _rmsnorm(x_ref[...].astype(f32), ln1_ref[...], eps)
  # One lane-dense GEMM for q|k|v: [bt, D] x [D, (H+2*KVH)*Dh].
  qkv = jnp.dot(h.astype(bf16), wqkv_ref[...], preferred_element_type=f32)

  cos = cos_ref[...].astype(f32)          # [bt, Dh]
  sin = sin_ref[...].astype(f32)          # sign-folded: rotate_half == roll * sin_signed

  def rope(t):                            # t: [bt, Dh]
    return t * cos + pltpu.roll(t, shift=Dh // 2, axis=1) * sin

  # Per-head slices are lane-aligned (Dh = 128); loops unroll at trace time.
  for hh in range(H):
    q_ref[hh] = (rope(qkv[:, hh * Dh:(hh + 1) * Dh]) * scale).astype(bf16)
  k_off = H * Dh
  for kk in range(KVH):
    k_ref[kk] = rope(qkv[:, k_off + kk * Dh:k_off + (kk + 1) * Dh]).astype(bf16)
  v_off = (H + KVH) * Dh
  for vv in range(KVH):
    v_ref[vv] = qkv[:, v_off + vv * Dh:v_off + (vv + 1) * Dh].astype(bf16)


# --------------- pass 2: flash attention + o_proj + MLP ----------------------
def _flash_decoder_kernel(x_ref, q_ref, k_ref, v_ref, segq_ref, segk_ref,
                          ln2_ref, wo_ref, wgu_ref, wd_ref,
                          o_ref,
                          m_scr, l_scr, acc_scr,
                          *, n_heads, n_kv_heads, head_dim, eps):
  f32, bf16 = jnp.float32, jnp.bfloat16
  H, KVH, Dh = n_heads, n_kv_heads, head_dim
  G = H // KVH
  qi = pl.program_id(0)
  kj = pl.program_id(1)
  n_kv = pl.num_programs(1)
  bq = q_ref.shape[1]
  bkv = k_ref.shape[1]
  NEG = -1e30

  # ---- new q tile: reset online-softmax state --------------------------------
  @pl.when(kj == 0)
  def _():
    m_scr[...] = jnp.full(m_scr.shape, NEG, dtype=f32)
    l_scr[...] = jnp.zeros_like(l_scr)
    acc_scr[...] = jnp.zeros_like(acc_scr)

  # ---- flash update (skip kv tiles that are entirely in the causal future) ---
  @pl.when(kj * bkv < (qi + 1) * bq)
  def _():
    # varlen-causal mask for this (q, kv) tile: [bq, bkv], O(1) in n_seqs.
    row = qi * bq + lax.broadcasted_iota(jnp.int32, (bq, bkv), 0)
    col = kj * bkv + lax.broadcasted_iota(jnp.int32, (bq, bkv), 1)
    allowed = jnp.logical_and(segq_ref[...] == segk_ref[...], col <= row)

    q = q_ref[...].reshape(KVH, G * bq, Dh)           # leading-dim merge (free)
    s = jnp.einsum("kqd,ktd->kqt", q, k_ref[...],
                   preferred_element_type=f32)        # [KVH, G*bq, bkv]
    s = jnp.where(allowed[None, None], s.reshape(KVH, G, bq, bkv),
                  NEG).reshape(KVH, G * bq, bkv)

    m_prev = m_scr[...]
    m_new = jnp.maximum(m_prev, jnp.max(s, axis=-1, keepdims=True))
    alpha = jnp.exp(m_prev - m_new)                   # f32
    p = jnp.exp((s - m_new).astype(bf16))             # bf16 EUP on v6e/v7x
    # Explicitly zero masked probabilities (robust for fully-masked tiles).
    p4 = p.reshape(KVH, G, bq, bkv)
    p = jnp.where(allowed[None, None], p4, jnp.zeros_like(p4)
                  ).reshape(KVH, G * bq, bkv)
    l_scr[...] = alpha * l_scr[...] + jnp.sum(p.astype(f32), axis=-1,
                                              keepdims=True)
    acc_scr[...] = alpha * acc_scr[...] + jnp.einsum(
        "kqt,ktd->kqd", p, v_ref[...], preferred_element_type=f32)
    m_scr[...] = m_new

  # ---- last kv tile: o_proj + residual + post-LN + gated-GELU MLP ------------
  @pl.when(kj == n_kv - 1)
  def _():
    inter = wd_ref.shape[0]
    inv_l = pl.reciprocal(l_scr[...], approx=True)          # EUP
    attn = (acc_scr[...] * inv_l).reshape(H, bq, Dh)        # f32, free reshape
    # Lane-dense [bq, H*Dh] slab -> single o_proj GEMM (K = H*Dh).
    attn2d = jnp.concatenate([attn[h] for h in range(H)], axis=-1).astype(bf16)
    proj = jnp.dot(attn2d, wo_ref[...], preferred_element_type=f32)  # [bq, D]
    x1 = x_ref[...].astype(jnp.float32) + proj                       # residual 1

    h2 = _rmsnorm(x1, ln2_ref[...], eps).astype(bf16)
    gu = jnp.dot(h2, wgu_ref[...], preferred_element_type=f32)       # [bq, 2*I]
    act = jax.nn.gelu(gu[:, :inter], approximate=True) * gu[:, inter:]
    mlp = jnp.dot(act.astype(bf16), wd_ref[...], preferred_element_type=f32)
    o_ref[...] = (x1 + mlp).astype(o_ref.dtype)                      # residual 2


# ----------------------------- wrapper ---------------------------------------
def decoder_layer(params, cos_table, sin_table, nz_hidden_states,
                  nz_position_ids, cu_seqlens, *,
                  block_t=BLOCK_T, block_q=BLOCK_Q, block_kv=BLOCK_KV):
  T, D = nz_hidden_states.shape
  H, KVH, Dh, I = N_HEADS, N_KV_HEADS, HEAD_DIM, INTER
  G = H // KVH
  assert T % block_t == 0 and T % block_q == 0 and T % block_kv == 0
  f32, bf16 = jnp.float32, jnp.bfloat16

  # --- glue: rotary gather (bf16 DMA), sign-folded sin, segment ids -----------
  cos_g = cos_table[nz_position_ids].astype(bf16)                    # [T, Dh]
  sign = jnp.concatenate([-jnp.ones((Dh // 2,), f32),
                          jnp.ones((Dh // 2,), f32)])
  sin_s = (sin_table[nz_position_ids] * sign[None, :]).astype(bf16)

  tok = jnp.arange(T, dtype=jnp.int32)
  seg = jnp.sum(tok[:, None] >= cu_seqlens[None, 1:-1].astype(jnp.int32),
                axis=-1).astype(jnp.int32)
  seg_q = seg[:, None]                                               # [T, 1]
  seg_k = seg[None, :]                                               # [1, T]

  # --- weights: fused, bf16 for the MXU; (1 + w) layernorm gains in f32 -------
  w_qkv = jnp.concatenate([params["wq"], params["wk"], params["wv"]],
                          axis=-1).astype(bf16)                      # [D, (H+2KVH)*Dh]
  wo2d = params["wo"].astype(bf16)                                   # [H*Dh, D]
  wgu = jnp.concatenate([params["wg"], params["wu"]], axis=-1).astype(bf16)
  wd = params["wd"].astype(bf16)                                     # [I, D]
  ln1p = (1.0 + params["ln1_w"]).astype(f32)                         # [1, D]
  ln2p = (1.0 + params["ln2_w"]).astype(f32)

  # ======================= pass 1: Q/K/V precompute ===========================
  qkv_cols = (H + 2 * KVH) * Dh
  cost1 = pl.CostEstimate(
      flops=2 * T * D * qkv_cols,
      transcendentals=0,
      bytes_accessed=T * D * 4 + D * qkv_cols * 2 + qkv_cols * T * 2
                     + 2 * T * Dh * 2)

  qkv_kernel = functools.partial(
      _qkv_rope_kernel, n_heads=H, n_kv_heads=KVH, head_dim=Dh, eps=RMS_EPS)

  q_all, k_all, v_all = pl.pallas_call(
      qkv_kernel,
      out_shape=(jax.ShapeDtypeStruct((H, T, Dh), bf16),
                 jax.ShapeDtypeStruct((KVH, T, Dh), bf16),
                 jax.ShapeDtypeStruct((KVH, T, Dh), bf16)),
      grid_spec=pltpu.PrefetchScalarGridSpec(
          num_scalar_prefetch=0,
          grid=(T // block_t,),
          in_specs=[
              pl.BlockSpec((block_t, D), lambda i: (i, 0)),          # x
              pl.BlockSpec((block_t, Dh), lambda i: (i, 0)),         # cos (bf16)
              pl.BlockSpec((block_t, Dh), lambda i: (i, 0)),         # sin (signed, bf16)
              pl.BlockSpec((1, D), lambda i: (0, 0)),                # 1 + ln1_w
              pl.BlockSpec((D, qkv_cols), lambda i: (0, 0)),         # wq|wk|wv
          ],
          out_specs=[
              pl.BlockSpec((H, block_t, Dh), lambda i: (0, i, 0)),   # Q (scaled)
              pl.BlockSpec((KVH, block_t, Dh), lambda i: (0, i, 0)), # K (roped)
              pl.BlockSpec((KVH, block_t, Dh), lambda i: (0, i, 0)), # V
          ]),
      compiler_params=pltpu.CompilerParams(
          dimension_semantics=("parallel",),
          vmem_limit_bytes=32 * 1024 * 1024),
      cost_estimate=cost1,
  )(nz_hidden_states, cos_g, sin_s, ln1p, w_qkv)

  # ================== pass 2: flash attention + o_proj + MLP ==================
  n_q = T // block_q
  n_kv = T // block_kv

  def _kv_block(i, j):
    # Clamp to the last causally-needed kv block so skipped (future) kv tiles
    # revisit the same block index => no new DMA for them.
    return jnp.minimum(j, ((i + 1) * block_q - 1) // block_kv)

  cost2 = pl.CostEstimate(
      flops=4 * H * Dh * T * T
            + 2 * T * (H * Dh) * D + 2 * T * D * (2 * I) + 2 * T * I * D,
      transcendentals=H * T * T + T * I,
      bytes_accessed=2 * T * D * 4 + (H + 2 * KVH) * T * Dh * 2
                     + (H * Dh * D + D * 2 * I + I * D) * 2 + 2 * T * 4)

  flash_kernel = functools.partial(
      _flash_decoder_kernel, n_heads=H, n_kv_heads=KVH, head_dim=Dh,
      eps=RMS_EPS)

  grid_spec = pltpu.PrefetchScalarGridSpec(
      num_scalar_prefetch=0,
      grid=(n_q, n_kv),
      in_specs=[
          pl.BlockSpec((block_q, D), lambda i, j: (i, 0)),                     # x (residual)
          pl.BlockSpec((H, block_q, Dh), lambda i, j: (0, i, 0)),              # Q
          pl.BlockSpec((KVH, block_kv, Dh), lambda i, j: (0, _kv_block(i, j), 0)),  # K
          pl.BlockSpec((KVH, block_kv, Dh), lambda i, j: (0, _kv_block(i, j), 0)),  # V
          pl.BlockSpec((block_q, 1), lambda i, j: (i, 0)),                     # seg ids (q)
          pl.BlockSpec((1, block_kv), lambda i, j: (0, _kv_block(i, j))),      # seg ids (kv)
          pl.BlockSpec((1, D), lambda i, j: (0, 0)),                           # 1 + ln2_w
          pl.BlockSpec((H * Dh, D), lambda i, j: (0, 0)),                      # wo (2D)
          pl.BlockSpec((D, 2 * I), lambda i, j: (0, 0)),                       # w_gate|w_up
          pl.BlockSpec((I, D), lambda i, j: (0, 0)),                           # w_down
      ],
      out_specs=pl.BlockSpec((block_q, D), lambda i, j: (i, 0)),
      scratch_shapes=[
          # NOTE: m/l pad their lane dim to 128; kept small by block_q choice.
          pltpu.VMEM((KVH, G * block_q, 1), jnp.float32),    # running max
          pltpu.VMEM((KVH, G * block_q, 1), jnp.float32),    # running denom
          pltpu.VMEM((KVH, G * block_q, Dh), jnp.float32),   # output accumulator
      ])

  return pl.pallas_call(
      flash_kernel,
      out_shape=jax.ShapeDtypeStruct((T, D), nz_hidden_states.dtype),
      grid_spec=grid_spec,
      compiler_params=pltpu.CompilerParams(
          dimension_semantics=("parallel", "arbitrary"),
          vmem_limit_bytes=32 * 1024 * 1024),
      cost_estimate=cost2,
  )(nz_hidden_states, q_all, k_all, v_all, seg_q, seg_k,
    ln2p, wo2d, wgu, wd)


# ----------------------------- pure-JAX reference -----------------------------
def decoder_layer_ref(params, cos_table, sin_table, x, pos_ids, cu_seqlens):
  T, D = x.shape
  Dh, H, KVH = HEAD_DIM, N_HEADS, N_KV_HEADS

  def rmsnorm(h, w):
    var = jnp.mean(h * h, axis=-1, keepdims=True)
    return (1.0 + w) * (h * lax.rsqrt(var + RMS_EPS))

  cos = cos_table[pos_ids][:, None, :]
  sin = sin_table[pos_ids][:, None, :]

  def rot_half(t):
    return jnp.concatenate([-t[..., Dh // 2:], t[..., : Dh // 2]], axis=-1)

  h = rmsnorm(x, params["ln1_w"])
  q = (h @ params["wq"]).reshape(T, H, Dh)
  k = (h @ params["wk"]).reshape(T, KVH, Dh)
  v = (h @ params["wv"]).reshape(T, KVH, Dh)
  q = q * cos + rot_half(q) * sin
  k = k * cos + rot_half(k) * sin
  k = jnp.repeat(k, H // KVH, axis=1)
  v = jnp.repeat(v, H // KVH, axis=1)

  tok = jnp.arange(T)
  seg = jnp.sum(tok[:, None] >= cu_seqlens[None, 1:-1], axis=-1)
  allowed = (seg[:, None] == seg[None, :]) & (tok[None, :] <= tok[:, None])
  bias = jnp.where(allowed, 0.0, -1e30)

  s = jnp.einsum("qhd,khd->hqk", q, k) * (Dh ** -0.5) + bias[None]
  p = jax.nn.softmax(s, axis=-1)
  attn = jnp.einsum("hqk,khd->qhd", p, v).reshape(T, H * Dh)
  x = x + attn @ params["wo"]

  h2 = rmsnorm(x, params["ln2_w"])
  mlp = (jax.nn.gelu(h2 @ params["wg"], approximate=True)
         * (h2 @ params["wu"])) @ params["wd"]
  return x + mlp


# ----------------------------- main -------------------------------------------
if __name__ == "__main__":
  key = jax.random.PRNGKey(0)
  ks = jax.random.split(key, 12)

  def init(k, shape, scale=0.05):
    return scale * jax.random.normal(k, shape, dtype=jnp.float32)

  params = {
      "ln1_w": init(ks[0], (1, HIDDEN), 0.1),
      "wq": init(ks[1], (HIDDEN, N_HEADS * HEAD_DIM)),
      "wk": init(ks[2], (HIDDEN, N_KV_HEADS * HEAD_DIM)),
      "wv": init(ks[3], (HIDDEN, N_KV_HEADS * HEAD_DIM)),
      "wo": init(ks[4], (N_HEADS * HEAD_DIM, HIDDEN)),
      "ln2_w": init(ks[5], (1, HIDDEN), 0.1),
      "wg": init(ks[6], (HIDDEN, INTER)),
      "wu": init(ks[7], (HIDDEN, INTER)),
      "wd": init(ks[8], (INTER, HIDDEN)),
  }

  # Rotary tables [MAX_POS, HEAD_DIM]
  inv_freq = 1.0 / (ROPE_BASE ** (jnp.arange(0, HEAD_DIM, 2, dtype=jnp.float32)
                                  / HEAD_DIM))
  freqs = jnp.arange(MAX_POS, dtype=jnp.float32)[:, None] * inv_freq[None, :]
  emb = jnp.concatenate([freqs, freqs], axis=-1)
  cos_table = jnp.cos(emb)
  sin_table = jnp.sin(emb)

  # Two packed sequences of lengths 100 and 156 (T = 256 tokens total).
  seq_lens = [100, 156]
  cu_seqlens = jnp.array([0, 100, 256], dtype=jnp.int32)
  nz_position_ids = jnp.concatenate(
      [jnp.arange(l, dtype=jnp.int32) for l in seq_lens])
  nz_hidden_states = jax.random.normal(ks[9], (T_TOKENS, HIDDEN),
                                       dtype=jnp.float32)

  out = decoder_layer(params, cos_table, sin_table, nz_hidden_states,
                      nz_position_ids, cu_seqlens)
  out = jax.block_until_ready(out)

  ref = decoder_layer_ref(params, cos_table, sin_table, nz_hidden_states,
                          nz_position_ids, cu_seqlens)
  ref = jax.block_until_ready(ref)

  assert out.shape == (T_TOKENS, HIDDEN)
  err = float(jnp.max(jnp.abs(out - ref)))
  # Kernel uses bf16 MXU operands / bf16 exp / bf16 rotary (f32 accumulation);
  # reference is full f32.
  assert jnp.allclose(out, ref, atol=1e-1, rtol=5e-2), f"max abs diff = {err}"

  print("KERNEL_OK")
</pallas_src>

<mosaic_0001>
module attributes {stable_mosaic.version = 11 : i64} {
  func.func @_qkv_rope_kernel(%arg0: i32, %arg1: memref<128x256xf32, #tpu.memory_space<vmem>>, %arg2: memref<128x128xbf16, #tpu.memory_space<vmem>>, %arg3: memref<128x128xbf16, #tpu.memory_space<vmem>>, %arg4: memref<1x256xf32, #tpu.memory_space<vmem>>, %arg5: memref<256x1024xbf16, #tpu.memory_space<vmem>>, %arg6: memref<4x128x128xbf16, #tpu.memory_space<vmem>>, %arg7: memref<2x128x128xbf16, #tpu.memory_space<vmem>>, %arg8: memref<2x128x128xbf16, #tpu.memory_space<vmem>>) attributes {dimension_semantics = [#tpu.dimension_semantics<parallel>], iteration_bounds = array<i64: 2>, scalar_prefetch = 0 : i64, scratch_operands = 0 : i64, tpu.core_type = #tpu.core_type<tc>, window_params = [{transform_indices = @transform_0, window_bounds = array<i64: 128, 256>}, {transform_indices = @transform_1, window_bounds = array<i64: 128, 128>}, {transform_indices = @transform_2, window_bounds = array<i64: 128, 128>}, {pipeline_mode = #tpu.pipeline_mode<synchronous>, transform_indices = @transform_3, window_bounds = array<i64: 1, 256>}, {pipeline_mode = #tpu.pipeline_mode<synchronous>, transform_indices = @transform_4, window_bounds = array<i64: 256, 1024>}, {transform_indices = @transform_5, window_bounds = array<i64: 4, 128, 128>}, {transform_indices = @transform_6, window_bounds = array<i64: 2, 128, 128>}, {transform_indices = @transform_7, window_bounds = array<i64: 2, 128, 128>}]} {
    %c0 = arith.constant 0 : index
    %c0_0 = arith.constant 0 : index
    %0 = vector.load %arg1[%c0, %c0_0] : memref<128x256xf32, #tpu.memory_space<vmem>>, vector<128x256xf32>
    %c0_1 = arith.constant 0 : index
    %c0_2 = arith.constant 0 : index
    %1 = vector.load %arg4[%c0_1, %c0_2] : memref<1x256xf32, #tpu.memory_space<vmem>>, vector<1x256xf32>
    %2 = arith.mulf %0, %0 : vector<128x256xf32>
    %cst = arith.constant dense<0.000000e+00> : vector<128xf32>
    %3 = vector.multi_reduction <add>, %2, %cst [1] : vector<128x256xf32> to vector<128xf32>
    %4 = vector.shape_cast %3 : vector<128xf32> to vector<128x1xf32>
    %cst_3 = arith.constant 2.560000e+02 : f32
    %5 = vector.broadcast %cst_3 : f32 to vector<128x1xf32>
    %6 = arith.divf %4, %5 : vector<128x1xf32>
    %cst_4 = arith.constant 9.99999997E-7 : f32
    %7 = vector.broadcast %cst_4 : f32 to vector<128x1xf32>
    %8 = arith.addf %6, %7 : vector<128x1xf32>
    %9 = math.rsqrt %8 : vector<128x1xf32>
    %10 = vector.broadcast %9 : vector<128x1xf32> to vector<128x256xf32>
    %11 = arith.mulf %0, %10 : vector<128x256xf32>
    %12 = vector.broadcast %1 : vector<1x256xf32> to vector<128x256xf32>
    %13 = arith.mulf %12, %11 : vector<128x256xf32>
    %14 = arith.truncf %13 : vector<128x256xf32> to vector<128x256xbf16>
    %c0_5 = arith.constant 0 : index
    %c0_6 = arith.constant 0 : index
    %15 = vector.load %arg5[%c0_5, %c0_6] : memref<256x1024xbf16, #tpu.memory_space<vmem>>, vector<256x1024xbf16>
    %cst_7 = arith.constant dense<0.000000e+00> : vector<128x1024xf32>
    %16 = tpu.matmul %14, %15, %cst_7 {dimension_numbers = #tpu.dot_dimension_numbers<[1], [0], [0], [1], [0, 0, 1, 1], [], []>} : vector<128x256xbf16>, vector<256x1024xbf16>, vector<128x1024xf32> -> vector<128x1024xf32>
    %c0_8 = arith.constant 0 : index
    %c0_9 = arith.constant 0 : index
    %17 = vector.load %arg2[%c0_8, %c0_9] : memref<128x128xbf16, #tpu.memory_space<vmem>>, vector<128x128xbf16>
    %18 = arith.extf %17 : vector<128x128xbf16> to vector<128x128xf32>
    %c0_10 = arith.constant 0 : index
    %c0_11 = arith.constant 0 : index
    %19 = vector.load %arg3[%c0_10, %c0_11] : memref<128x128xbf16, #tpu.memory_space<vmem>>, vector<128x128xbf16>
    %20 = arith.extf %19 : vector<128x128xbf16> to vector<128x128xf32>
    %21 = vector.extract_strided_slice %16 {offsets = [0, 0], sizes = [128, 128], strides = [1, 1]} : vector<128x1024xf32> to vector<128x128xf32>
    %22 = arith.mulf %21, %18 : vector<128x128xf32>
    %c64_i32 = arith.constant 64 : i32
    %23 = tpu.dynamic_rotate %21 by %c64_i32 dim 1 : vector<128x128xf32>, i32 -> vector<128x128xf32>
    %24 = arith.mulf %23, %20 : vector<128x128xf32>
    %25 = arith.addf %22, %24 : vector<128x128xf32>
    %cst_12 = arith.constant 0.0883883461 : f32
    %26 = vector.broadcast %cst_12 : f32 to vector<128x128xf32>
    %27 = arith.mulf %25, %26 : vector<128x128xf32>
    %28 = arith.truncf %27 : vector<128x128xf32> to vector<128x128xbf16>
    %c0_13 = arith.constant 0 : index
    %c0_14 = arith.constant 0 : index
    %c0_15 = arith.constant 0 : index
    %29 = vector.load %arg6[%c0_13, %c0_14, %c0_15] : memref<4x128x128xbf16, #tpu.memory_space<vmem>>, vector<1x128x128xbf16>
    %30 = vector.shape_cast %29 : vector<1x128x128xbf16> to vector<128x128xbf16>
    %31 = vector.shape_cast %28 : vector<128x128xbf16> to vector<1x128x128xbf16>
    tpu.vector_store %arg6[%c0_13, %c0_14, %c0_15], %31 {strides = array<i32>} : memref<4x128x128xbf16, #tpu.memory_space<vmem>>, vector<1x128x128xbf16>,
    %32 = vector.extract_strided_slice %16 {offsets = [0, 128], sizes = [128, 128], strides = [1, 1]} : vector<128x1024xf32> to vector<128x128xf32>
    %33 = arith.mulf %32, %18 : vector<128x128xf32>
    %c64_i32_16 = arith.constant 64 : i32
    %34 = tpu.dynamic_rotate %32 by %c64_i32_16 dim 1 : vector<128x128xf32>, i32 -> vector<128x128xf32>
    %35 = arith.mulf %34, %20 : vector<128x128xf32>
    %36 = arith.addf %33, %35 : vector<128x128xf32>
    %cst_17 = arith.constant 0.0883883461 : f32
    %37 = vector.broadcast %cst_17 : f32 to vector<128x128xf32>
    %38 = arith.mulf %36, %37 : vector<128x128xf32>
    %39 = arith.truncf %38 : vector<128x128xf32> to vector<128x128xbf16>
    %c1 = arith.constant 1 : index
    %c0_18 = arith.constant 0 : index
    %c0_19 = arith.constant 0 : index
    %40 = vector.load %arg6[%c1, %c0_18, %c0_19] : memref<4x128x128xbf16, #tpu.memory_space<vmem>>, vector<1x128x128xbf16>
    %41 = vector.shape_cast %40 : vector<1x128x128xbf16> to vector<128x128xbf16>
    %42 = vector.shape_cast %39 : vector<128x128xbf16> to vector<1x128x128xbf16>
    tpu.vector_store %arg6[%c1, %c0_18, %c0_19], %42 {strides = array<i32>} : memref<4x128x128xbf16, #tpu.memory_space<vmem>>, vector<1x128x128xbf16>,
    %43 = vector.extract_strided_slice %16 {offsets = [0, 256], sizes = [128, 128], strides = [1, 1]} : vector<128x1024xf32> to vector<128x128xf32>
    %44 = arith.mulf %43, %18 : vector<128x128xf32>
    %c64_i32_20 = arith.constant 64 : i32
    %45 = tpu.dynamic_rotate %43 by %c64_i32_20 dim 1 : vector<128x128xf32>, i32 -> vector<128x128xf32>
    %46 = arith.mulf %45, %20 : vector<128x128xf32>
    %47 = arith.addf %44, %46 : vector<128x128xf32>
    %cst_21 = arith.constant 0.0883883461 : f32
    %48 = vector.broadcast %cst_21 : f32 to vector<128x128xf32>
    %49 = arith.mulf %47, %48 : vector<128x128xf32>
    %50 = arith.truncf %49 : vector<128x128xf32> to vector<128x128xbf16>
    %c2 = arith.constant 2 : index
    %c0_22 = arith.constant 0 : index
    %c0_23 = arith.constant 0 : index
    %51 = vector.load %arg6[%c2, %c0_22, %c0_23] : memref<4x128x128xbf16, #tpu.memory_space<vmem>>, vector<1x128x128xbf16>
    %52 = vector.shape_cast %51 : vector<1x128x128xbf16> to vector<128x128xbf16>
    %53 = vector.shape_cast %50 : vector<128x128xbf16> to vector<1x128x128xbf16>
    tpu.vector_store %arg6[%c2, %c0_22, %c0_23], %53 {strides = array<i32>} : memref<4x128x128xbf16, #tpu.memory_space<vmem>>, vector<1x128x128xbf16>,
    %54 = vector.extract_strided_slice %16 {offsets = [0, 384], sizes = [128, 128], strides = [1, 1]} : vector<128x1024xf32> to vector<128x128xf32>
    %55 = arith.mulf %54, %18 : vector<128x128xf32>
    %c64_i32_24 = arith.constant 64 : i32
    %56 = tpu.dynamic_rotate %54 by %c64_i32_24 dim 1 : vector<128x128xf32>, i32 -> vector<128x128xf32>
    %57 = arith.mulf %56, %20 : vector<128x128xf32>
    %58 = arith.addf %55, %57 : vector<128x128xf32>
    %cst_25 = arith.constant 0.0883883461 : f32
    %59 = vector.broadcast %cst_25 : f32 to vector<128x128xf32>
    %60 = arith.mulf %58, %59 : vector<128x128xf32>
    %61 = arith.truncf %60 : vector<128x128xf32> to vector<128x128xbf16>
    %c3 = arith.constant 3 : index
    %c0_26 = arith.constant 0 : index
    %c0_27 = arith.constant 0 : index
    %62 = vector.load %arg6[%c3, %c0_26, %c0_27] : memref<4x128x128xbf16, #tpu.memory_space<vmem>>, vector<1x128x128xbf16>
    %63 = vector.shape_cast %62 : vector<1x128x128xbf16> to vector<128x128xbf16>
    %64 = vector.shape_cast %61 : vector<128x128xbf16> to vector<1x128x128xbf16>
    tpu.vector_store %arg6[%c3, %c0_26, %c0_27], %64 {strides = array<i32>} : memref<4x128x128xbf16, #tpu.memory_space<vmem>>, vector<1x128x128xbf16>,
    %65 = vector.extract_strided_slice %16 {offsets = [0, 512], sizes = [128, 128], strides = [1, 1]} : vector<128x1024xf32> to vector<128x128xf32>
    %66 = arith.mulf %65, %18 : vector<128x128xf32>
    %c64_i32_28 = arith.constant 64 : i32
    %67 = tpu.dynamic_rotate %65 by %c64_i32_28 dim 1 : vector<128x128xf32>, i32 -> vector<128x128xf32>
    %68 = arith.mulf %67, %20 : vector<128x128xf32>
    %69 = arith.addf %66, %68 : vector<128x128xf32>
    %70 = arith.truncf %69 : vector<128x128xf32> to vector<128x128xbf16>
    %c0_29 = arith.constant 0 : index
    %c0_30 = arith.constant 0 : index
    %c0_31 = arith.constant 0 : index
    %71 = vector.load %arg7[%c0_29, %c0_30, %c0_31] : memref<2x128x128xbf16, #tpu.memory_space<vmem>>, vector<1x128x128xbf16>
    %72 = vector.shape_cast %71 : vector<1x128x128xbf16> to vector<128x128xbf16>
    %73 = vector.shape_cast %70 : vector<128x128xbf16> to vector<1x128x128xbf16>
    tpu.vector_store %arg7[%c0_29, %c0_30, %c0_31], %73 {strides = array<i32>} : memref<2x128x128xbf16, #tpu.memory_space<vmem>>, vector<1x128x128xbf16>,
    %74 = vector.extract_strided_slice %16 {offsets = [0, 640], sizes = [128, 128], strides = [1, 1]} : vector<128x1024xf32> to vector<128x128xf32>
    %75 = arith.mulf %74, %18 : vector<128x128xf32>
    %c64_i32_32 = arith.constant 64 : i32
    %76 = tpu.dynamic_rotate %74 by %c64_i32_32 dim 1 : vector<128x128xf32>, i32 -> vector<128x128xf32>
    %77 = arith.mulf %76, %20 : vector<128x128xf32>
    %78 = arith.addf %75, %77 : vector<128x128xf32>
    %79 = arith.truncf %78 : vector<128x128xf32> to vector<128x128xbf16>
    %c1_33 = arith.constant 1 : index
    %c0_34 = arith.constant 0 : index
    %c0_35 = arith.constant 0 : index
    %80 = vector.load %arg7[%c1_33, %c0_34, %c0_35] : memref<2x128x128xbf16, #tpu.memory_space<vmem>>, vector<1x128x128xbf16>
    %81 = vector.shape_cast %80 : vector<1x128x128xbf16> to vector<128x128xbf16>
    %82 = vector.shape_cast %79 : vector<128x128xbf16> to vector<1x128x128xbf16>
    tpu.vector_store %arg7[%c1_33, %c0_34, %c0_35], %82 {strides = array<i32>} : memref<2x128x128xbf16, #tpu.memory_space<vmem>>, vector<1x128x128xbf16>,
    %83 = vector.extract_strided_slice %16 {offsets = [0, 768], sizes = [128, 128], strides = [1, 1]} : vector<128x1024xf32> to vector<128x128xf32>
    %84 = arith.truncf %83 : vector<128x128xf32> to vector<128x128xbf16>
    %c0_36 = arith.constant 0 : index
    %c0_37 = arith.constant 0 : index
    %c0_38 = arith.constant 0 : index
    %85 = vector.load %arg8[%c0_36, %c0_37, %c0_38] : memref<2x128x128xbf16, #tpu.memory_space<vmem>>, vector<1x128x128xbf16>
    %86 = vector.shape_cast %85 : vector<1x128x128xbf16> to vector<128x128xbf16>
    %87 = vector.shape_cast %84 : vector<128x128xbf16> to vector<1x128x128xbf16>
    tpu.vector_store %arg8[%c0_36, %c0_37, %c0_38], %87 {strides = array<i32>} : memref<2x128x128xbf16, #tpu.memory_space<vmem>>, vector<1x128x128xbf16>,
    %88 = vector.extract_strided_slice %16 {offsets = [0, 896], sizes = [128, 128], strides = [1, 1]} : vector<128x1024xf32> to vector<128x128xf32>
    %89 = arith.truncf %88 : vector<128x128xf32> to vector<128x128xbf16>
    %c1_39 = arith.constant 1 : index
    %c0_40 = arith.constant 0 : index
    %c0_41 = arith.constant 0 : index
    %90 = vector.load %arg8[%c1_39, %c0_40, %c0_41] : memref<2x128x128xbf16, #tpu.memory_space<vmem>>, vector<1x128x128xbf16>
    %91 = vector.shape_cast %90 : vector<1x128x128xbf16> to vector<128x128xbf16>
    %92 = vector.shape_cast %89 : vector<128x128xbf16> to vector<1x128x128xbf16>
    tpu.vector_store %arg8[%c1_39, %c0_40, %c0_41], %92 {strides = array<i32>} : memref<2x128x128xbf16, #tpu.memory_space<vmem>>, vector<1x128x128xbf16>,
    return
  }
  func.func @transform_0(%arg0: i32) -> (i32, i32) {
    %c0_i32 = arith.constant 0 : i32
    %c0_i32_0 = arith.constant 0 : i32
    return %arg0, %c0_i32 : i32, i32
  }
  func.func @transform_1(%arg0: i32) -> (i32, i32) {
    %c0_i32 = arith.constant 0 : i32
    %c0_i32_0 = arith.constant 0 : i32
    return %arg0, %c0_i32 : i32, i32
  }
  func.func @transform_2(%arg0: i32) -> (i32, i32) {
    %c0_i32 = arith.constant 0 : i32
    %c0_i32_0 = arith.constant 0 : i32
    return %arg0, %c0_i32 : i32, i32
  }
  func.func @transform_3(%arg0: i32) -> (i32, i32) {
    %c0_i32 = arith.constant 0 : i32
    %c0_i32_0 = arith.constant 0 : i32
    %c0_i32_1 = arith.constant 0 : i32
    return %c0_i32, %c0_i32_0 : i32, i32
  }
  func.func @transform_4(%arg0: i32) -> (i32, i32) {
    %c0_i32 = arith.constant 0 : i32
    %c0_i32_0 = arith.constant 0 : i32
    %c0_i32_1 = arith.constant 0 : i32
    return %c0_i32, %c0_i32_0 : i32, i32
  }
  func.func @transform_5(%arg0: i32) -> (i32, i32, i32) {
    %c0_i32 = arith.constant 0 : i32
    %c0_i32_0 = arith.constant 0 : i32
    %c0_i32_1 = arith.constant 0 : i32
    return %c0_i32, %arg0, %c0_i32_0 : i32, i32, i32
  }
  func.func @transform_6(%arg0: i32) -> (i32, i32, i32) {
    %c0_i32 = arith.constant 0 : i32
    %c0_i32_0 = arith.constant 0 : i32
    %c0_i32_1 = arith.constant 0 : i32
    return %c0_i32, %arg0, %c0_i32_0 : i32, i32, i32
  }
  func.func @transform_7(%arg0: i32) -> (i32, i32, i32) {
    %c0_i32 = arith.constant 0 : i32
    %c0_i32_0 = arith.constant 0 : i32
    %c0_i32_1 = arith.constant 0 : i32
    return %c0_i32, %arg0, %c0_i32_0 : i32, i32, i32
  }
}

</mosaic_0001>

<bundles_post_ra>
// kernel: tpu_custom_call.1
= control target key start
LH: loop header
LB: loop body
LE: loop exit
PB: predicated region body
PF: predicated region fallthrough
CT: control target
= control target key end

     0   :  { %s6345_s0 = inlined_call_operand.hbm [shape: f32[256,256], index: 0, kind: input, shape index: {}]   ;;  %s6346_s1 = inlined_call_operand.hbm [shape: bf16[256,128], index: 1, kind: input, shape index: {}]   ;;  %s6347_s2 = inlined_call_operand.hbm [shape: bf16[256,128], index: 2, kind: input, shape index: {}]   ;;  %s6348_s3 = inlined_call_operand.vmem [shape: f32[1,256], index: 3, kind: input, shape index: {}]   ;;  %s6349_s4 = inlined_call_operand.hbm [shape: bf16[256,1024], index: 4, kind: input, shape index: {}]   ;;  %s6350_s5 = inlined_call_operand.hbm [shape: bf16[4,256,128], index: 5, kind: output, shape index: {0}]   ;;  %s6351_s6 = inlined_call_operand.hbm [shape: bf16[2,256,128], index: 6, kind: output, shape index: {1}]   ;;  %s6352_s7 = inlined_call_operand.hbm [shape: bf16[2,256,128], index: 7, kind: output, shape index: {2}]  }
   0x1   :  { %6446 = sst [smem:[#allocation87_spill]] %s6346_s1 }
   0x2   :  { %6447 = sst [smem:[#allocation88_spill]] %s6351_s6 }
   0x3   :  { %6448 = sst [smem:[#allocation89_spill]] %s6352_s7 }
   0x4   :  { %13 = vsyncpa [#allocation3], 0 }
   0x5   :  { %15 = vsyncpa [#allocation3 + $0x1], 0 }
   0x6   :  { %16 = vsyncpa [#allocation6], 0 }
   0x7   :  { %18 = vsyncpa [#allocation6 + $0x1], 0 }
   0x8   :  { %19 = vsyncpa [#allocation9], 0 }
   0x9   :  { %20 = vsyncpa [#allocation4], 0 }
   0xa   :  { %22 = vsyncpa [#allocation4 + $0x1], 0 }
   0xb   :  { %23 = vsyncpa [#allocation12], 0 }
   0xc   :  { %25 = vsyncpa [#allocation12 + $0x1], 0  ;;  %s4831_s24 = smov 0   ;;  %s4833_s25 = smov 0  }
   0xd   :  { %s4835_s26 = smov 0   ;;  %s4837_s27 = smov 0  }
   0xe LB: > { %6449 = sst [smem:[#allocation25_spill]] %s4745_s24  ;;  %s4852_s28 = sadd.s32 1, %s4757_s27   ;;  %s4757_s27 = sphi %s4837_s27, %s6620_s27   ;;  %s4753_s26 = sphi %s4835_s26, %s6622_s26   ;;  %s4749_s25 = sphi %s4833_s25, %s6624_s25   ;;  %s4745_s24 = sphi %s4831_s24, %s6623_s24  }
   0xf   : > { %6450 = sst [smem:[#allocation26_spill]] %s4753_s26  ;;  %s38_s29 = sadd.s32 1, %s4753_s26 }
  0x10   : > { %6451 = sst [smem:[#allocation27_spill]] %s4757_s27  ;;  %s35_s30 = ssub.s32 %s4757_s27, %s4852_s28 }
  0x11   : > { %6452 = sst [smem:[#allocation28_spill]] %s4852_s28  ;;  %p6353_p0 = scmp.ne.s32.totalorder %s4753_s26, %s4749_s25 }
  0x12   : > { %p36_p1 = scmp.eq.s32.totalorder %s35_s30, 0  ;;  %p46_p2 = scmp.eq.s32.totalorder %s4757_s27, 0 }
  0x13   : > { %p4492_p4 = scmp.lt.s32.totalorder %s4757_s27, 2  ;;  %s4869_s9 = sand.u32 1, %s4753_s26  }
  0x14   : > { %s4863_s8 = scalar_select %p36_p1, %s4753_s26, %s38_s29  }
  0x15   : > { %p47_p5 = por %p46_p2, %p6353_p0  ;;  %s285_s10 = sand.u32 1, %s4757_s27  }
  0x16   : > { %6453 = sst [smem:[#allocation29_spill]] %s4863_s8  ;;  %s3478_s11 = sshll.u32 %s4869_s9, 6 }
  0x17   : > { %p4873_p6 = pnand %p4492_p4, %p47_p5  ;;  %s3841_s13 = sshll.u32 %s4757_s27, 10 }
  0x18   : > { %s6455_s1 = sld [smem:[#allocation87_spill]]  ;;  %s289_s17 = scalar_lea.vmem [#allocation5], %s3478_s11 }
  0x19   : > { %s6454_s12 = scalar_select %p4873_p6, 1, 0 }
  0x1a   : > { %s296_s18 = sshll.u32 %s289_s17, 4  ;;  %s4889_s19 = scalar_lea.sflag [#allocation6], %s285_s10  ;;  %s4887_s18 = int_to_ptr.vmem [resolvable:$true] %s296_s18 }
  0x1b   : > { %p4895_p8 = pneg %p4873_p6 }
  0x1d   : > { %s6456_s21 = scalar_select %p4895_p8, 1, 0 }
  0x1e   : > { %s4883_s16 = scalar_lea.hbm %s6455_s1, %s3841_s13  ;;  %s4594_s29 = scalar_lea.hbm %s6455_s1, 2048 }
  0x1f   : > { %s4589_s20 = scalar_lea.hbm %s4883_s16, 1024  ;;  %p4595_p11 = scmp.lt.u32.totalorder %s4883_s16, %s6455_s1 }
  0x20   : > { %p4590_p7 = scmp.ne.s32.totalorder %s4883_s16, %s4589_s20  ;;  %p4596_p12 = scmp.lt.u32.totalorder %s4594_s29, %s4589_s20 }
  0x21   : > { %p4598_p1 = scmp.lt.u32.totalorder %s4589_s20, %s4883_s16 }
  0x22   : > { %p4592_p9 = pnand %p4895_p8, %p4590_p7  ;;  %p4597_p13 = por %p4596_p12, %p4595_p11 }
  0x24   : > { %p4593_p10 = pneg %p4592_p9  ;;  %p4599_p2 = por %p4598_p1, %p4597_p13 }
  0x26   : > { %p4600_p4 = pnand %p4599_p2, %p4593_p10 }
  0x28   : > { %4603 = shalt.err (!%p4600_p4)
}
  0x29   : > { %s4604_s10 = scalar_lea.vmem %s4887_s18, 1024  ;;  %s4759_s15 = smov [#allocation5]  }
  0x2a   : > { %p4605_p5 = scmp.ne.s32.totalorder %s4887_s18, %s4604_s10  ;;  %s4609_s17 = sshll.u32 %s4759_s15, 4  ;;  %s4610_s17 = int_to_ptr.vmem [resolvable:$false] %s4609_s17 }
  0x2b   : > { %s4611_s22 = scalar_lea.vmem %s4610_s17, 2048  ;;  %p4612_p3 = scmp.lt.s32.totalorder %s4887_s18, %s4610_s17 }
  0x2c   : > { %p4607_p7 = pnand %p4605_p5, %p4895_p8  ;;  %p4613_p0 = scmp.lt.s32.totalorder %s4611_s22, %s4604_s10 }
  0x2e   : > { %p4608_p9 = pneg %p4607_p7  ;;  %p4614_p11 = por %p4613_p0, %p4612_p3 }
  0x30   : > { %p4615_p12 = pnand %p4614_p11, %p4608_p9 }
  0x32   : > { %4618 = shalt.err (!%p4615_p12)
}
  0x33   : > { %s6355_s20 = smov 64   ;;  %s6356_s23 = smov 4  }
  0x34   : > { %4477 = dma.hbm_to_vmem [thread:$0]  (!%p4873_p6), %s4883_s16, 1024, %s4887_s18, %s4889_s19, %s6355_s20, %s6355_s20, %s6356_s23  }
  0x35   : > { %s4927_s14 = scalar_lea.hbm %s6347_s2, %s3841_s13  ;;  %s310_s10 = scalar_lea.vmem [#allocation7], %s3478_s11 }
  0x36   : > { %s317_s15 = sshll.u32 %s310_s10, 4  ;;  %s4934_s17 = sadd.s32 4294967295, %s4757_s27   ;;  %s4931_s15 = int_to_ptr.vmem [resolvable:$true] %s317_s15 }
  0x37   : > { %s6354_s22 = sadd.s32 4294967294, %s4757_s27   ;;  %p51_p0 = scmp.ne.s32.totalorder %s4749_s25, %s4745_s24 }
  0x38   : > { %p6364_p3 = scmp.eq.s32.totalorder %s4934_s17, 0  ;;  %p169_p10 = scmp.eq.s32.totalorder %s4934_s17, 1 }
  0x39   : > { %p175_p13 = scmp.eq.s32.totalorder %s6354_s22, 1  ;;  %p3471_p2 = scmp.ge.s32.totalorder %s4757_s27, 1 }
  0x3a   : > { %p4945_p1 = por %p6364_p3, %p51_p0  ;;  %p6458_p4 = scmp.ne.s32.totalorder %s4753_s26, %s4749_s25 }
  0x3b   : > { %p4957_p7 = por %p175_p13, %p51_p0  ;;  %p234_p9 = scmp.lt.s32.totalorder %s4757_s27, 3 }
  0x3c   : > { %s6457_s11 = scalar_select %p4945_p1, 1, 0 }
  0x3d   : > { %p4953_p5 = por %p169_p10, %p6458_p4  ;;  %p4962_p11 = pnand %p3471_p2, %p234_p9 }
  0x3e   : > { %s6460_s16 = scalar_select %p4957_p7, 1, 0 }
  0x3f   : > { %s6459_s13 = scalar_select %p4953_p5, 1, 0 }
  0x40   : > { %6461 = sst [smem:[#allocation30_spill]] %s6460_s16  ;;  %s4762_s29 = smov [#allocation8]  }
  0x41   : > { %s6462_s18 = scalar_select %p4962_p11, 1, 0 }
  0x42   : > { %s249_s30 = sshll.u32 %s4762_s29, 4  ;;  %p4467_p12 = pneg %p4962_p11  ;;  %s4966_s30 = int_to_ptr.vmem [resolvable:$true] %s249_s30 }
  0x43   : > { %s3474_s10 = sshll.u32 %s4869_s9, 8  ;;  %s3840_s22 = sshll.u32 %s4757_s27, 12 }
  0x44   : > { %p4974_p10 = pnand %p4467_p12, %p6364_p3  ;;  %s4981_s8 = scalar_lea.hbm %s6345_s0, %s3840_s22 }
  0x45   : > { %s267_s26 = scalar_lea.vmem [#allocation2], %s3474_s10  ;;  %s4619_s24 = scalar_lea.hbm %s6349_s4, 16384 }
  0x46   : > { %s275_s28 = sshll.u32 %s267_s26, 4  ;;  %p4620_p0 = scmp.ne.s32.totalorder %s6349_s4, %s4619_s24  ;;  %s4983_s28 = int_to_ptr.vmem [resolvable:$true] %s275_s28 }
  0x47   : > { %p4621_p13 = pneg %p4974_p10  ;;  %p4626_p9 = scmp.lt.u32.totalorder %s4619_s24, %s6349_s4 }
  0x49   : > { %p4622_p2 = pnand %p4621_p13, %p4620_p0 }
  0x4b   : > { %p4623_p4 = pneg %p4622_p2 }
  0x4d   : > { %p4628_p12 = pnand %p4626_p9, %p4623_p4 }
  0x4f   : > { %4631 = shalt.err (!%p4628_p12)
}
  0x50   : > { %s4632_s26 = scalar_lea.vmem %s4966_s30, 16384  ;;  %p4640_p1 = scmp.lt.s32.totalorder %s4966_s30, %s4966_s30 }
  0x51   : > { %p4633_p3 = scmp.ne.s32.totalorder %s4966_s30, %s4632_s26  ;;  %p4641_p11 = scmp.lt.s32.totalorder %s4632_s26, %s4632_s26 }
  0x53   : > { %p4635_p7 = pnand %p4633_p3, %p4621_p13  ;;  %p4642_p6 = por %p4641_p11, %p4640_p1 }
  0x55   : > { %p4636_p5 = pneg %p4635_p7 }
  0x57   : > { %p4643_p8 = pnand %p4642_p6, %p4636_p5 }
  0x59   : > { %4646 = shalt.err (!%p4643_p8)
}
  0x5a   : > { %s4763_s7 = smov 512   ;;  %s4764_s24 = smov 32  }
  0x5b   : > { %4470 = dma.hbm_to_vmem [thread:$0]  (!%p4974_p10), %s6349_s4, 16384, %s4966_s30, [#allocation9], %s4763_s7, %s4763_s7, %s4764_s24  }
  0x5c   : > { %s264_s16 = scalar_lea.sflag [#allocation3], %s4869_s9  ;;  %s4647_s10 = scalar_lea.hbm %s4981_s8, 4096 }
  0x5d   : > { %p4648_p3 = scmp.ne.s32.totalorder %s4981_s8, %s4647_s10  ;;  %p6464_p6 = scmp.ne.s32.totalorder %s6456_s21, 0 }
  0x5e   : > { %s4652_s23 = scalar_lea.hbm %s6345_s0, 8192  ;;  %p4653_p5 = scmp.lt.u32.totalorder %s4981_s8, %s6345_s0 }
  0x5f   : > { %p4650_p8 = pnand %p4648_p3, %p6464_p6  ;;  %p4654_p7 = scmp.lt.u32.totalorder %s4652_s23, %s4647_s10 }
  0x60   : > { %p4656_p0 = scmp.lt.u32.totalorder %s4647_s10, %s4981_s8 }
  0x61   : > { %p4651_p1 = pneg %p4650_p8  ;;  %p4655_p11 = por %p4654_p7, %p4653_p5 }
  0x63   : > { %p4657_p13 = por %p4656_p0, %p4655_p11 }
  0x65   : > { %p4658_p2 = pnand %p4657_p13, %p4651_p1 }
  0x67   : > { %4661 = shalt.err (!%p4658_p2)
}
  0x68   : > { %s4662_s20 = scalar_lea.vmem %s4983_s28, 4096  ;;  %s4765_s30 = smov [#allocation2]  }
  0x69   : > { %p4663_p10 = scmp.ne.s32.totalorder %s4983_s28, %s4662_s20  ;;  %s4667_s7 = sshll.u32 %s4765_s30, 4  ;;  %s4668_s7 = int_to_ptr.vmem [resolvable:$false] %s4667_s7 }
  0x6a   : > { %s4669_s6 = scalar_lea.vmem %s4668_s7, 8192  ;;  %p4670_p12 = scmp.lt.s32.totalorder %s4983_s28, %s4668_s7 }
  0x6b   : > { %p4665_p4 = pnand %p4663_p10, %p6464_p6  ;;  %p4671_p3 = scmp.lt.s32.totalorder %s4669_s6, %s4662_s20 }
  0x6d   : > { %p4666_p9 = pneg %p4665_p4  ;;  %p4672_p8 = por %p4671_p3, %p4670_p12 }
  0x6f   : > { %p4673_p5 = pnand %p4672_p8, %p4666_p9 }
  0x71   : > { %4676 = shalt.err (!%p4673_p5)
}
  0x72   : > { %s4766_s24 = smov 256   ;;  %s4767_s27 = smov 16  }
  0x73   : > { %p6465_p1 = scmp.ne.s32.totalorder %s6454_s12, 0  ;;  %s4677_s22 = scalar_lea.hbm %s4927_s14, 1024 }
  0x74   : > { %p4678_p7 = scmp.ne.s32.totalorder %s4927_s14, %s4677_s22  ;;  %s4682_s1 = scalar_lea.hbm %s6347_s2, 2048 }
  0x75   : > { %4474 = dma.hbm_to_vmem [thread:$0]  (!%p6465_p1), %s4981_s8, 4096, %s4983_s28, %s264_s16, %s4766_s24, %s4766_s24, %s4767_s27  }
  0x76   : > { %p4680_p11 = pnand %p4678_p7, %p6464_p6  ;;  %p4683_p13 = scmp.lt.u32.totalorder %s4927_s14, %s6347_s2 }
  0x77   : > { %p4684_p2 = scmp.lt.u32.totalorder %s4682_s1, %s4677_s22  ;;  %p4686_p4 = scmp.lt.u32.totalorder %s4677_s22, %s4927_s14 }
  0x78   : > { %p4681_p0 = pneg %p4680_p11 }
  0x79   : > { %p4685_p10 = por %p4684_p2, %p4683_p13 }
  0x7b   : > { %p4687_p9 = por %p4686_p4, %p4685_p10 }
  0x7d   : > { %p4688_p12 = pnand %p4687_p9, %p4681_p0 }
  0x7f   : > { %4691 = shalt.err (!%p4688_p12)
}
  0x80   : > { %s4692_s28 = scalar_lea.vmem %s4931_s15, 1024  ;;  %s4768_s8 = smov [#allocation7]  }
  0x81   : > { %p4693_p3 = scmp.ne.s32.totalorder %s4931_s15, %s4692_s28  ;;  %s4697_s9 = sshll.u32 %s4768_s8, 4  ;;  %s4698_s9 = int_to_ptr.vmem [resolvable:$false] %s4697_s9 }
  0x82   : > { %s4699_s16 = scalar_lea.vmem %s4698_s9, 2048  ;;  %p4700_p7 = scmp.lt.s32.totalorder %s4931_s15, %s4698_s9 }
  0x83   : > { %p4695_p8 = pnand %p4693_p3, %p6464_p6  ;;  %p4701_p11 = scmp.lt.s32.totalorder %s4699_s16, %s4692_s28 }
  0x85   : > { %p4696_p5 = pneg %p4695_p8  ;;  %p4702_p13 = por %p4701_p11, %p4700_p7 }
  0x87   : > { %p4703_p2 = pnand %p4702_p13, %p4696_p5 }
  0x89   : > { %4706 = shalt.err (!%p4703_p2)
}
  0x8a   : > { %s6466_s20 = smov 4   ;;  %s6467_s30 = smov 64  }
  0x8b   : > { %4480 = dma.hbm_to_vmem [thread:$0]  (!%p6465_p1), %s4927_s14, 1024, %s4931_s15, %s4889_s19, %s6467_s30, %s6467_s30, %s6466_s20  }
  0x8c   : > { %p6468_p6 = scmp.ne.s32.totalorder %s6462_s18, 0 }
  0x8e   : > { %329 = sbr.rel (%p6468_p6) target bundleno = 889 (0x379), region = 40 }
  0x95   : > { %s5058_s21 = sand.u32 1, %s4749_s25   ;;  %p6469_p0 = scmp.ne.s32.totalorder %s6457_s11, 0 }
  0x96   : > { %s3485_s7 = sshll.u32 %s5058_s21, 8  ;;  %s332_s6 = scalar_lea.sflag [#allocation3], %s5058_s21 }
  0x97   : > { %s5064_s12 = scalar_lea.vmem [#allocation2], %s3485_s7 }
  0x98   : > { %4724 = dma.done.wait (%p6469_p0), %s332_s6, 4096  }
  0x99   : > { %4726 = vsyncadd (%p6469_p0), %s332_s6, 4294963200  ;;  %s340_s19 = sand.u32 1, %s4934_s17   ;;  %s3486_s14 = sshll.u32 %s5058_s21, 6 }
  0x9a   : > { %s341_s15 = scalar_lea.sflag [#allocation6], %s340_s19  ;;  %s5074_s18 = scalar_lea.vmem [#allocation5], %s3486_s14 }
  0x9b   : > { %4728 = dma.done.wait (%p6469_p0), %s341_s15, 2048  }
  0x9c   : > { %4730 = vsyncadd (%p6469_p0), %s341_s15, 4294965248  ;;  %s5080_s24 = scalar_lea.vmem [#allocation7], %s3486_s14  ;;  %p6470_p1 = scmp.eq.s32.totalorder %s4934_s17, 0 }
  0x9e   : > { %4732 = dma.done.wait (%p6470_p1), [#allocation9], 16384   ;;  %p6471_p10 = pmov %p6470_p1 }
  0x9f   : > { %v5087_v0 = vld [vmem:[%s5064_s12] sm:$0xff]  ;;  %v5090_v1 = vld [vmem:[%s5064_s12 + $0x8] sm:$0xff]  ;;  %v5093_v2 = vld [vmem:[%s5064_s12 + $0x10] sm:$0xff]  ;;  %s4769_s22 = smov 64   ;;  %s3490_s10 = sshll.u32 %s5058_s21, 7 }
  0xa0   : > { %4734 = vsyncadd (%p6471_p10), [#allocation9], 4294950912  ;;  %v447_v3 = vmul.f32 %v5087_v0, %v5087_v0  ;;  %v448_v4 = vmul.f32 %v5090_v1, %v5090_v1  ;;  %v5100_v5 = vld [vmem:[%s5064_s12 + $0x18] sm:$0xff]  ;;  %v449_v6 = vmul.f32 %v5093_v2, %v5093_v2  ;;  %v5105_v7 = vld [vmem:[%s5064_s12 + $0x20] sm:$0xff]  ;;  %s5638_s29 = scalar_lea.vmem [#allocation13], %s3490_s10  ;;  %s5794_s1 = scalar_lea.vmem [#allocation10], %s3485_s7 }
  0xa1   : > { %v5108_v8 = vld [vmem:[%s5064_s12 + $0x28] sm:$0xff]  ;;  %v450_v9 = vmul.f32 %v5100_v5, %v5100_v5  ;;  %v451_v10 = vmul.f32 %v5105_v7, %v5105_v7  ;;  %v5117_v12 = vld [vmem:[%s5064_s12 + $0x30] sm:$0xff]  ;;  %v5120_v13 = vld [vmem:[%s5064_s12 + $0x38] sm:$0xff]  ;;  %s6157_s23 = scalar_lea.vmem [#allocation11], %s3490_s10  ;;  %s3141_s26 = scalar_lea.sflag [#allocation4], %s5058_s21 }
  0xa2   : > { %v452_v11 = vmul.f32 %v5108_v8, %v5108_v8  ;;  %v5123_v14 = vld [vmem:[%s5064_s12 + $0x50] sm:$0xff]  ;;  %v479_v15 = vadd.f32 %v448_v4, %v447_v3  ;;  %v453_v16 = vmul.f32 %v5117_v12, %v5117_v12  ;;  %v454_v17 = vmul.f32 %v5120_v13, %v5120_v13  ;;  %v5130_v18 = vld [vmem:[%s5064_s12 + $0x58] sm:$0xff]  ;;  %v5133_v19 = vld [vmem:[%s5064_s12 + $0x40] sm:$0xff]  ;;  %s6261_s28 = scalar_lea.sflag [#allocation12], %s340_s19 }
  0xa3   : > { %v5136_v20 = vld [vmem:[%s5064_s12 + $0x48] sm:$0xff]  ;;  %v482_v22 = vadd.f32 %v450_v9, %v449_v6  ;;  %v455_v23 = vmul.f32 %v5133_v19, %v5133_v19  ;;  %v5143_v25 = vld [vmem:[%s5064_s12 + $0x70] sm:$0xff]  ;;  %v5146_v26 = vld [vmem:[%s5064_s12 + $0x78] sm:$0xff]  ;;  %v457_v28 = vmul.f32 %v5123_v14, %v5123_v14  ;;  %v458_v29 = vmul.f32 %v5130_v18, %v5130_v18 }
  0xa4   : > { %v485_v21 = vadd.f32 %v452_v11, %v451_v10  ;;  %480 = vadd.xlane.f32.xlu0 %v479_v15  ;;  %v456_v24 = vmul.f32 %v5136_v20, %v5136_v20  ;;  %v488_v27 = vadd.f32 %v454_v17, %v453_v16  ;;  %v5153_v30 = vld [vmem:[%s5064_s12 + $0x60] sm:$0xff]  ;;  %v5156_v31 = vld [vmem:[%s5064_s12 + $0x68] sm:$0xff]  ;;  %v461_v32 = vmul.f32 %v5143_v25, %v5143_v25  ;;  %v5167_v37 = vld [vmem:[%s5064_s12 + $0x90] sm:$0xff] }
  0xa5   : > { %v462_v33 = vmul.f32 %v5146_v26, %v5146_v26  ;;  %v459_v35 = vmul.f32 %v5153_v30, %v5153_v30  ;;  %v460_v36 = vmul.f32 %v5156_v31, %v5156_v31  ;;  %v5170_v38 = vld [vmem:[%s5064_s12 + $0x80] sm:$0xff]  ;;  %v494_v39 = vadd.f32 %v458_v29, %v457_v28  ;;  %v5173_v40 = vld [vmem:[%s5064_s12 + $0x98] sm:$0xff]  ;;  %v5176_v41 = vld [vmem:[%s5064_s12 + $0x88] sm:$0xff] }
  0xa6   : > { %486 = vadd.xlane.f32.xlu1 %v485_v21  ;;  %v491_v34 = vadd.f32 %v456_v24, %v455_v23  ;;  %v667_v42 = vld [vmem:[#allocation8] sm:$0xff]  ;;  %v668_v45 = vld [vmem:[#allocation8 + $0x8] sm:$0xff]  ;;  %v465_v48 = vmul.f32 %v5167_v37, %v5167_v37  ;;  %v463_v49 = vmul.f32 %v5170_v38, %v5170_v38  ;;  %v464_v55 = vmul.f32 %v5176_v41, %v5176_v41  ;;  %v5193_v9 = vld [vmem:[%s5064_s12 + $0xb0] sm:$0xff] }
  0xa7   : > { %v5179_v43 = vld [vmem:[%s5064_s12 + $0xa0] sm:$0xff]  ;;  %v672_v46 = vld [vmem:[#allocation8 + $0x28] sm:$0xff]  ;;  %v500_v47 = vadd.f32 %v462_v33, %v461_v32  ;;  %v497_v54 = vadd.f32 %v460_v36, %v459_v35  ;;  %v466_v61 = vmul.f32 %v5173_v40, %v5173_v40  ;;  %v5196_v10 = vld [vmem:[%s5064_s12 + $0xb8] sm:$0xff]  ;;  %v469_v33 = vmul.f32 %v5193_v9, %v5193_v9 }
  0xa8   : > { %483 = vadd.xlane.f32.xlu0 %v482_v22  ;;  %v671_v44 = vld [vmem:[#allocation8 + $0x20] sm:$0xff]  ;;  %v676_v53 = vld [vmem:[#allocation8 + $0x48] sm:$0xff]  ;;  %v3495_v56 = vcombine.high %v668_v45, %v672_v46  ;;  %v3494_v63 = vcombine.low %v668_v45, %v672_v46  ;;  %v467_v16 = vmul.f32 %v5179_v43, %v5179_v43  ;;  %v503_v22 = vadd.f32 %v464_v55, %v463_v49 }
  0xa9   : > { %v3493_v50 = vcombine.high %v667_v42, %v671_v44  ;;  %v675_v51 = vld [vmem:[#allocation8 + $0x40] sm:$0xff]  ;;  %v3492_v57 = vcombine.low %v667_v42, %v671_v44  ;;  %v680_v58 = vld [vmem:[#allocation8 + $0x68] sm:$0xff]  ;;  %v506_v32 = vadd.f32 %v466_v61, %v465_v48  ;;  %v5213_v42 = vld [vmem:[%s5064_s12 + $0xd0] sm:$0xff] }
  0xaa   : > { %489 = vadd.xlane.f32.xlu1 %v488_v27  ;;  %v679_v52 = vld [vmem:[#allocation8 + $0x60] sm:$0xff]  ;;  %v5190_v62 = vld [vmem:[%s5064_s12 + $0xa8] sm:$0xff]  ;;  %1548 = vmatprep.subr.bf16.mxu1 %v3495_v56  ;;  %v3503_v11 = vcombine.high %v676_v53, %v680_v58  ;;  %v3502_v17 = vcombine.low %v676_v53, %v680_v58  ;;  %v5216_v44 = vld [vmem:[%s5064_s12 + $0xd8] sm:$0xff]  ;;  %v473_v56 = vmul.f32 %v5213_v42, %v5213_v42 }
  0xab   : > { %v683_v59 = vld [vmem:[#allocation8 + $0x80] sm:$0xff]  ;;  %1435 = vmatprep.subr.bf16.mxu0 %v3493_v50  ;;  %v3501_v3 = vcombine.high %v675_v51, %v679_v52  ;;  %v684_v4 = vld [vmem:[#allocation8 + $0x88] sm:$0xff]  ;;  %v3500_v15 = vcombine.low %v675_v51, %v679_v52  ;;  %1549 = vmatpush1.bf16.msra.mxu1 %v3494_v63  ;;  %v468_v23 = vmul.f32 %v5190_v62, %v5190_v62  ;;  %v5231_v61 = vld [vmem:[%s5064_s12 + $0xf0] sm:$0xff] }
  0xac   : > { %492 = vadd.xlane.f32.xlu0 %v491_v34  ;;  %v687_v60 = vld [vmem:[#allocation8 + $0xa0] sm:$0xff]  ;;  %v688_v6 = vld [vmem:[#allocation8 + $0xa8] sm:$0xff]  ;;  %1436 = vmatpush1.bf16.msra.mxu0 %v3492_v57  ;;  %v470_v34 = vmul.f32 %v5196_v10, %v5196_v10  ;;  %v474_v57 = vmul.f32 %v5216_v44, %v5216_v44  ;;  %v5234_v63 = vld [vmem:[%s5064_s12 + $0xf8] sm:$0xff] }
  0xad   : > { %1437 = vmatprep.subr.bf16.mxu0 %v3501_v3  ;;  %v3509_v21 = vcombine.high %v683_v59, %v687_v60  ;;  %v5203_v24 = vld [vmem:[%s5064_s12 + $0xc0] sm:$0xff]  ;;  %1550 = vmatprep.subr.bf16.mxu1 %v3503_v11  ;;  %v3511_v27 = vcombine.high %v684_v4, %v688_v6  ;;  %v5210_v35 = vld [vmem:[%s5064_s12 + $0xc8] sm:$0xff]  ;;  %v3508_v45 = vcombine.low %v683_v59, %v687_v60 }
  0xae   : > { %495 = vadd.xlane.f32.xlu1 %v494_v39  ;;  %v691_v28 = vld [vmem:[#allocation8 + $0xc0] sm:$0xff]  ;;  %v692_v36 = vld [vmem:[#allocation8 + $0xc8] sm:$0xff]  ;;  %v471_v46 = vmul.f32 %v5203_v24, %v5203_v24  ;;  %v509_v49 = vadd.f32 %v468_v23, %v467_v16  ;;  %v472_v50 = vmul.f32 %v5210_v35, %v5210_v35  ;;  %v512_v55 = vadd.f32 %v470_v34, %v469_v33 }
  0xaf   : > { %v695_v29 = vld [vmem:[#allocation8 + $0xe0] sm:$0xff]  ;;  %v696_v39 = vld [vmem:[#allocation8 + $0xe8] sm:$0xff]  ;;  %1551 = vmatpush1.bf16.msra.mxu1 %v3502_v17  ;;  %v518_v23 = vadd.f32 %v474_v57, %v473_v56 }
  0xb0   : > { %498 = vadd.xlane.f32.xlu0 %v497_v54  ;;  %1438 = vmatpush1.bf16.msra.mxu0 %v3500_v15  ;;  %v3517_v48 = vcombine.high %v691_v28, %v695_v29  ;;  %v442_v51 = vld [vmem:[%s5064_s12 + $0xe0] sm:$0xff]  ;;  %v3519_v52 = vcombine.high %v692_v36, %v696_v39  ;;  %v5228_v58 = vld [vmem:[%s5064_s12 + $0xe8] sm:$0xff]  ;;  %v3516_v3 = vcombine.low %v691_v28, %v695_v29 }
  0xb1   : > { %1439 = vmatprep.subr.bf16.mxu0 %v3509_v21  ;;  %1552 = vmatprep.subr.bf16.mxu1 %v3511_v27  ;;  %v699_v53 = vld [vmem:[#allocation8 + $0x100] sm:$0xff]  ;;  %v700_v59 = vld [vmem:[#allocation8 + $0x108] sm:$0xff]  ;;  %v515_v15 = vadd.f32 %v472_v50, %v471_v46  ;;  %v476_v16 = vmul.f32 %v5228_v58, %v5228_v58  ;;  %v477_v27 = vmul.f32 %v5231_v61, %v5231_v61 }
  0xb2   : > { %501 = vadd.xlane.f32.xlu1 %v500_v47  ;;  %v3510_v47 = vcombine.low %v684_v4, %v688_v6  ;;  %v703_v54 = vld [vmem:[#allocation8 + $0x120] sm:$0xff]  ;;  %v704_v60 = vld [vmem:[#allocation8 + $0x128] sm:$0xff]  ;;  %v475_v4 = vmul.f32 %v442_v51, %v442_v51  ;;  %v3518_v6 = vcombine.low %v692_v36, %v696_v39  ;;  %v478_v28 = vmul.f32 %v5234_v63, %v5234_v63 }
  0xb3   : > { %v3525_v11 = vcombine.high %v699_v53, %v703_v54  ;;  %v3527_v17 = vcombine.high %v700_v59, %v704_v60  ;;  %v707_v21 = vld [vmem:[#allocation8 + $0x140] sm:$0xff]  ;;  %v708_v29 = vld [vmem:[#allocation8 + $0x148] sm:$0xff]  ;;  %v3524_v33 = vcombine.low %v699_v53, %v703_v54  ;;  %v3526_v34 = vcombine.low %v700_v59, %v704_v60 }
  0xb4   : > { %504 = vadd.xlane.f32.xlu0 %v503_v22  ;;  %1440 = vmatpush1.bf16.msra.mxu0 %v3508_v45  ;;  %v711_v22 = vld [vmem:[#allocation8 + $0x160] sm:$0xff]  ;;  %v521_v39 = vadd.f32 %v476_v16, %v475_v4  ;;  %v720_v50 = vld [vmem:[#allocation8 + $0x1a8] sm:$0xff] }
  0xb5   : > { %1553 = vmatpush1.bf16.msra.mxu1 %v3510_v47  ;;  %1441 = vmatprep.subr.bf16.mxu0 %v3517_v48  ;;  %v3533_v36 = vcombine.high %v707_v21, %v711_v22  ;;  %v715_v46 = vld [vmem:[#allocation8 + $0x180] sm:$0xff]  ;;  %v524_v48 = vadd.f32 %v478_v28, %v477_v27  ;;  %v3532_v51 = vcombine.low %v707_v21, %v711_v22  ;;  %v724_v57 = vld [vmem:[#allocation8 + $0x1c8] sm:$0xff] }
  0xb6   : > { %507 = vadd.xlane.f32.xlu1 %v506_v32  ;;  %1554 = vmatprep.subr.bf16.mxu1 %v3519_v52  ;;  %v712_v32 = vld [vmem:[#allocation8 + $0x168] sm:$0xff]  ;;  %v719_v47 = vld [vmem:[#allocation8 + $0x1a0] sm:$0xff] }
  0xb7   : > { %v3535_v45 = vcombine.high %v708_v29, %v712_v32  ;;  %v3534_v52 = vcombine.low %v708_v29, %v712_v32  ;;  %v3541_v53 = vcombine.high %v715_v46, %v719_v47  ;;  %v727_v56 = vld [vmem:[#allocation8 + $0x1e0] sm:$0xff]  ;;  %v728_v59 = vld [vmem:[#allocation8 + $0x1e8] sm:$0xff]  ;;  %v3540_v60 = vcombine.low %v715_v46, %v719_v47  ;;  %v5248_v47 = vld [vmem:[#allocation8 + $0x38] sm:$0xff] }
  0xb8   : > { %510 = vadd.xlane.f32.xlu0 %v509_v49  ;;  %1442 = vmatpush1.bf16.msra.mxu0 %v3516_v3  ;;  %v716_v49 = vld [vmem:[#allocation8 + $0x188] sm:$0xff]  ;;  %v3550_v22 = vcombine.low %v724_v57, %v728_v59  ;;  %v739_v27 = vld [vmem:[#allocation8 + $0x240] sm:$0xff] }
  0xb9   : > { %1555 = vmatpush1.bf16.msra.mxu1 %v3518_v6  ;;  %1443 = vmatprep.subr.bf16.mxu0 %v3525_v11  ;;  %v3543_v54 = vcombine.high %v716_v49, %v720_v50  ;;  %v3542_v3 = vcombine.low %v716_v49, %v720_v50  ;;  %v3551_v6 = vcombine.high %v724_v57, %v728_v59  ;;  %v731_v11 = vld [vmem:[#allocation8 + $0x200] sm:$0xff]  ;;  %v732_v16 = vld [vmem:[#allocation8 + $0x208] sm:$0xff] }
  0xba   : > { %513 = vadd.xlane.f32.xlu1 %v512_v55  ;;  %1556 = vmatprep.subr.bf16.mxu1 %v3527_v17  ;;  %v723_v55 = vld [vmem:[#allocation8 + $0x1c0] sm:$0xff]  ;;  %v736_v17 = vld [vmem:[#allocation8 + $0x228] sm:$0xff] }
  0xbb   : > { %v3549_v4 = vcombine.high %v723_v55, %v727_v56  ;;  %v3548_v21 = vcombine.low %v723_v55, %v727_v56  ;;  %v3559_v28 = vcombine.high %v732_v16, %v736_v17  ;;  %v743_v29 = vld [vmem:[#allocation8 + $0x260] sm:$0xff]  ;;  %v740_v32 = vld [vmem:[#allocation8 + $0x248] sm:$0xff]  ;;  %v3558_v46 = vcombine.low %v732_v16, %v736_v17 }
  0xbc   : > { %516 = vadd.xlane.f32.xlu0 %v515_v15  ;;  %1444 = vmatpush1.bf16.msra.mxu0 %v3524_v33  ;;  %v735_v15 = vld [vmem:[#allocation8 + $0x220] sm:$0xff]  ;;  %v744_v33 = vld [vmem:[#allocation8 + $0x268] sm:$0xff]  ;;  %v3564_v56 = vcombine.low %v739_v27, %v743_v29 }
  0xbd   : > { %1557 = vmatpush1.bf16.msra.mxu1 %v3526_v34  ;;  %1445 = vmatprep.subr.bf16.mxu0 %v3533_v36  ;;  %v5242_v34 = vld [vmem:[#allocation8 + $0x10] sm:$0xff]  ;;  %v752_v55 = vld [vmem:[#allocation8 + $0x2a8] sm:$0xff]  ;;  %v3566_v57 = vcombine.low %v740_v32, %v744_v33 }
  0xbe   : > { %519 = vadd.xlane.f32.xlu1 %v518_v23  ;;  %1558 = vmatprep.subr.bf16.mxu1 %v3535_v45  ;;  %v3557_v23 = vcombine.high %v731_v11, %v735_v15  ;;  %v5244_v36 = vld [vmem:[#allocation8 + $0x30] sm:$0xff]  ;;  %v3556_v45 = vcombine.low %v731_v11, %v735_v15  ;;  %v760_v11 = vld [vmem:[#allocation8 + $0x2e8] sm:$0xff] }
  0xbf   : > { %v3496_v49 = vcombine.low %v5242_v34, %v5244_v36 }
  0xc0   : > { %522 = vadd.xlane.f32.xlu0 %v521_v39  ;;  %1446 = vmatpush1.bf16.msra.mxu0 %v3532_v51  ;;  %v5246_v39 = vld [vmem:[#allocation8 + $0x18] sm:$0xff]  ;;  %v3567_v51 = vcombine.high %v740_v32, %v744_v33 }
  0xc1   : > { %1559 = vmatpush1.bf16.msra.mxu1 %v3534_v52  ;;  %1447 = vmatprep.subr.bf16.mxu0 %v3541_v53  ;;  %v3498_v50 = vcombine.low %v5246_v39, %v5248_v47  ;;  %v747_v52 = vld [vmem:[#allocation8 + $0x280] sm:$0xff] }
  0xc2   : > { %525 = vadd.xlane.f32.xlu1 %v524_v48  ;;  %1560 = vmatprep.subr.bf16.mxu1 %v3543_v54  ;;  %v3565_v48 = vcombine.high %v739_v27, %v743_v29  ;;  %v751_v53 = vld [vmem:[#allocation8 + $0x2a0] sm:$0xff]  ;;  %v748_v54 = vld [vmem:[#allocation8 + $0x288] sm:$0xff] }
  0xc3   : > { %v3573_v59 = vcombine.high %v747_v52, %v751_v53  ;;  %v3572_v15 = vcombine.low %v747_v52, %v751_v53  ;;  %v3574_v16 = vcombine.low %v748_v54, %v752_v55  ;;  %v764_v27 = vld [vmem:[#allocation8 + $0x308] sm:$0xff] }
  0xc4   : > { %1448 = vmatpush1.bf16.msra.mxu0 %v3540_v60  ;;  %v3575_v60 = vcombine.high %v748_v54, %v752_v55  ;;  %v776_v52 = vld [vmem:[#allocation8 + $0x368] sm:$0xff] }
  0xc5   : > { %1561 = vmatpush1.bf16.msra.mxu1 %v3542_v3  ;;  %1449 = vmatprep.subr.bf16.mxu0 %v3549_v4  ;;  %v755_v3 = vld [vmem:[#allocation8 + $0x2c0] sm:$0xff] }
  0xc6   : > { %1562 = vmatprep.subr.bf16.mxu1 %v3551_v6  ;;  %v759_v4 = vld [vmem:[#allocation8 + $0x2e0] sm:$0xff]  ;;  %v756_v6 = vld [vmem:[#allocation8 + $0x2c8] sm:$0xff] }
  0xc7   : > { %v3581_v17 = vcombine.high %v755_v3, %v759_v4  ;;  %v3580_v29 = vcombine.low %v755_v3, %v759_v4  ;;  %v3582_v32 = vcombine.low %v756_v6, %v760_v11  ;;  %v784_v3 = vld [vmem:[#allocation8 + $0x3a8] sm:$0xff] }
  0xc8   : > { %1450 = vmatpush1.bf16.msra.mxu0 %v3548_v21  ;;  %v3583_v21 = vcombine.high %v756_v6, %v760_v11 }
  0xc9   : > { %1563 = vmatpush1.bf16.msra.mxu1 %v3550_v22  ;;  %1451 = vmatprep.subr.bf16.mxu0 %v3557_v23  ;;  %v763_v22 = vld [vmem:[#allocation8 + $0x300] sm:$0xff] }
  0xca   : > { %1564 = vmatprep.subr.bf16.mxu1 %v3559_v28  ;;  %v767_v23 = vld [vmem:[#allocation8 + $0x320] sm:$0xff]  ;;  %v768_v28 = vld [vmem:[#allocation8 + $0x328] sm:$0xff] }
  0xcb   : > { %v3589_v33 = vcombine.high %v763_v22, %v767_v23  ;;  %v3588_v53 = vcombine.low %v763_v22, %v767_v23  ;;  %v3590_v54 = vcombine.low %v764_v27, %v768_v28  ;;  %v792_v22 = vld [vmem:[#allocation8 + $0x3e8] sm:$0xff] }
  0xcc   : > { %1452 = vmatpush1.bf16.msra.mxu0 %v3556_v45  ;;  %v3591_v45 = vcombine.high %v764_v27, %v768_v28 }
  0xcd   : > { %1565 = vmatpush1.bf16.msra.mxu1 %v3558_v46  ;;  %1453 = vmatprep.subr.bf16.mxu0 %v3565_v48  ;;  %v771_v46 = vld [vmem:[#allocation8 + $0x340] sm:$0xff] }
  0xce   : > { %1566 = vmatprep.subr.bf16.mxu1 %v3567_v51  ;;  %v775_v48 = vld [vmem:[#allocation8 + $0x360] sm:$0xff]  ;;  %v772_v51 = vld [vmem:[#allocation8 + $0x348] sm:$0xff] }
  0xcf   : > { %v3597_v55 = vcombine.high %v771_v46, %v775_v48  ;;  %v3596_v4 = vcombine.low %v771_v46, %v775_v48  ;;  %v3598_v6 = vcombine.low %v772_v51, %v776_v52  ;;  %v3499_v46 = vcombine.high %v5246_v39, %v5248_v47  ;;  %v698_v39 = vld [vmem:[#allocation8 + $0xf8] sm:$0xff] }
  0xd0   : > { %1454 = vmatpush1.bf16.msra.mxu0 %v3564_v56  ;;  %v3599_v56 = vcombine.high %v772_v51, %v776_v52 }
  0xd1   : > { %1567 = vmatpush1.bf16.msra.mxu1 %v3566_v57  ;;  %1455 = vmatprep.subr.bf16.mxu0 %v3573_v59  ;;  %v779_v57 = vld [vmem:[#allocation8 + $0x380] sm:$0xff] }
  0xd2   : > { %1568 = vmatprep.subr.bf16.mxu1 %v3575_v60  ;;  %v783_v59 = vld [vmem:[#allocation8 + $0x3a0] sm:$0xff]  ;;  %v780_v60 = vld [vmem:[#allocation8 + $0x388] sm:$0xff] }
  0xd3   : > { %v3605_v11 = vcombine.high %v779_v57, %v783_v59  ;;  %v3604_v23 = vcombine.low %v779_v57, %v783_v59  ;;  %v3606_v27 = vcombine.low %v780_v60, %v784_v3 }
  0xd4   : > { %1456 = vmatpush1.bf16.msra.mxu0 %v3572_v15  ;;  %v3607_v15 = vcombine.high %v780_v60, %v784_v3  ;;  %v609_v60 = vlaneseq }
  0xd5   : > { %1569 = vmatpush1.bf16.msra.mxu1 %v3574_v16  ;;  %1457 = vmatprep.subr.bf16.mxu0 %v3581_v17  ;;  %v787_v16 = vld [vmem:[#allocation8 + $0x3c0] sm:$0xff] }
  0xd6   : > { %1570 = vmatprep.subr.bf16.mxu1 %v3583_v21  ;;  %v791_v17 = vld [vmem:[#allocation8 + $0x3e0] sm:$0xff]  ;;  %v788_v21 = vld [vmem:[#allocation8 + $0x3c8] sm:$0xff] }
  0xd7   : > { %v3613_v28 = vcombine.high %v787_v16, %v791_v17 }
  0xd8   : > { %1458 = vmatpush1.bf16.msra.mxu0 %v3580_v29  ;;  %v3615_v29 = vcombine.high %v788_v21, %v792_v22 }
  0xd9   : > { %1571 = vmatpush1.bf16.msra.mxu1 %v3582_v32  ;;  %1459 = vmatprep.subr.bf16.mxu0 %v3589_v33  ;;  %v3612_v32 = vcombine.low %v787_v16, %v791_v17  ;;  %v3614_v33 = vcombine.low %v788_v21, %v792_v22  ;;  %v610_v17 = vshrl.u32 %v609_v60, 7 }
  0xda   : > { %1572 = vmatprep.subr.bf16.mxu1 %v3591_v45  ;;  %v3497_v45 = vcombine.high %v5242_v34, %v5244_v36  ;;  %v697_v34 = vld [vmem:[#allocation8 + $0xf0] sm:$0xff]  ;;  %v694_v36 = vld [vmem:[#allocation8 + $0xd8] sm:$0xff] }
  0xdc   : > { %1460 = vmatpush1.bf16.msra.mxu0 %v3588_v53 }
  0xdd   : > { %1573 = vmatpush1.bf16.msra.mxu1 %v3590_v54  ;;  %1461 = vmatprep.subr.bf16.mxu0 %v3597_v55 }
  0xde   : > { %1574 = vmatprep.subr.bf16.mxu1 %v3599_v56 }
  0xe0   : > { %1462 = vmatpush1.bf16.msra.mxu0 %v3596_v4 }
  0xe1   : > { %1575 = vmatpush1.bf16.msra.mxu1 %v3598_v6  ;;  %1463 = vmatprep.subr.bf16.mxu0 %v3605_v11 }
  0xe2   : > { %1576 = vmatprep.subr.bf16.mxu1 %v3607_v15 }
  0xe4   : > { %1464 = vmatpush1.bf16.msra.mxu0 %v3604_v23 }
  0xe5   : > { %1577 = vmatpush1.bf16.msra.mxu1 %v3606_v27  ;;  %1465 = vmatprep.subr.bf16.mxu0 %v3613_v28  ;;  %v615_v28 = vsub.s32 1, %v610_v17 }
  0xe6   : > { %1578 = vmatprep.subr.bf16.mxu1 %v3615_v29 }
  0xe8   : > { %1466 = vmatpush1.bf16.msra.mxu0 %v3612_v32 }
  0xe9   : > { %1579 = vmatpush1.bf16.msra.mxu1 %v3614_v33  ;;  %1661 = vmatprep.subr.bf16.mxu0 %v3497_v45  ;;  %v446_v33 = vld [vmem:[%s6348_s3] sm:$0x3]  ;;  %v611_v45 = vsub.s32 0, %v610_v17  ;;  %v677_v17 = vld [vmem:[#allocation8 + $0x50] sm:$0xff] }
  0xea   : > { %1774 = vmatprep.subr.bf16.mxu1 %v3499_v46 }
 0x131   : > { %v481_v48 = vpop.xlane.xlu0 %480 }
 0x132   : > { %v528_v51 = vmul.f32 0.00390625, %v481_v48 }
 0x133   : > { %v487_v52 = vpop.xlane.xlu1 %486 }
 0x134   : > { %v530_v53 = vmul.f32 0.00390625, %v487_v52  ;;  %v544_v54 = vadd.f32 1e-06, %v528_v51 }
 0x135   : > { %v484_v55 = vpop.xlane.xlu0 %483 }
 0x136   : > { %v546_v56 = vadd.f32 1e-06, %v530_v53  ;;  %4556 = vrsqrt.f32 %v544_v54  ;;  %v529_v57 = vmul.f32 0.00390625, %v484_v55  ;;  %v5262_v54 = vrot.slane %v446_v33, %v615_v28  ;;  %v678_v28 = vld [vmem:[#allocation8 + $0x58] sm:$0xff] }
 0x137   : > { %v490_v59 = vpop.xlane.xlu1 %489 }
 0x138   : > { %4558 = vrsqrt.f32 %v546_v56  ;;  %v531_v3 = vmul.f32 0.00390625, %v490_v59  ;;  %v545_v4 = vadd.f32 1e-06, %v529_v57  ;;  %v5265_v59 = vrot.slane %v446_v33, %v611_v45 }
 0x139   : > { %v493_v11 = vpop.xlane.xlu0 %492 }
 0x13a   : > { %v547_v6 = vadd.f32 1e-06, %v531_v3  ;;  %4560 = vrsqrt.f32 %v545_v4  ;;  %v532_v16 = vmul.f32 0.00390625, %v493_v11 }
 0x13b   : > { %v496_v15 = vpop.xlane.xlu1 %495 }
 0x13c   : > { %4562 = vrsqrt.f32 %v547_v6  ;;  %v533_v21 = vmul.f32 0.00390625, %v496_v15  ;;  %v548_v22 = vadd.f32 1e-06, %v532_v16 }
 0x13d   : > { %v499_v27 = vpop.xlane.xlu0 %498 }
 0x13e   : > { %v549_v23 = vadd.f32 1e-06, %v533_v21  ;;  %4564 = vrsqrt.f32 %v548_v22  ;;  %v534_v32 = vmul.f32 0.00390625, %v499_v27  ;;  %v681_v27 = vld [vmem:[#allocation8 + $0x70] sm:$0xff] }
 0x13f   : > { %v502_v29 = vpop.xlane.xlu1 %501 }
 0x140   : > { %4566 = vrsqrt.f32 %v549_v23  ;;  %v535_v46 = vmul.f32 0.00390625, %v502_v29  ;;  %v4557_v48 = vpop.eup %4556  ;;  %v550_v52 = vadd.f32 1e-06, %v534_v32 }
 0x141   : > { %v577_v53 = vmul.f32 %v4557_v48, %v5090_v1  ;;  %v505_v56 = vpop.xlane.xlu0 %504  ;;  %v576_v57 = vmul.f32 %v4557_v48, %v5087_v0 }
 0x142   : > { %v4559_v51 = vpop.eup %4558  ;;  %v551_v55 = vadd.f32 1e-06, %v535_v46  ;;  %4568 = vrsqrt.f32 %v550_v52  ;;  %v536_v16 = vmul.f32 0.00390625, %v505_v56  ;;  %v5283_v56 = vld [vmem:[#allocation8 + $0x90] sm:$0xff] }
 0x143   : > { %v581_v60 = vmul.f32 %v4559_v51, %v5108_v8  ;;  %v508_v3 = vpop.xlane.xlu1 %507  ;;  %v620_v1 = vmul.f32 %v5262_v54, %v577_v53  ;;  %v619_v8 = vmul.f32 %v5265_v59, %v576_v57  ;;  %v580_v33 = vmul.f32 %v4559_v51, %v5105_v7  ;;  %v689_v7 = vld [vmem:[#allocation8 + $0xb0] sm:$0xff]  ;;  %v690_v51 = vld [vmem:[#allocation8 + $0xb8] sm:$0xff] }
 0x144   : > { %v4561_v4 = vpop.eup %4560  ;;  %4570 = vrsqrt.f32 %v551_v55  ;;  %v537_v0 = vmul.f32 0.00390625, %v508_v3  ;;  %v552_v52 = vadd.f32 1e-06, %v536_v16  ;;  %v3505_v53 = vcombine.high %v677_v17, %v681_v27 }
 0x145   : > { %v579_v11 = vmul.f32 %v4561_v4, %v5100_v5  ;;  %v578_v15 = vmul.f32 %v4561_v4, %v5093_v2  ;;  %v682_v5 = vld [vmem:[#allocation8 + $0x78] sm:$0xff]  ;;  %v624_v2 = vmul.f32 %v5262_v54, %v581_v60  ;;  %v511_v3 = vpop.xlane.xlu0 %510 }
 0x146   : > { %v4563_v6 = vpop.eup %4562  ;;  %v3507_v55 = vcombine.high %v678_v28, %v682_v5  ;;  %v553_v57 = vadd.f32 1e-06, %v537_v0  ;;  %4572 = vrsqrt.f32 %v552_v52  ;;  %v701_v52 = vld [vmem:[#allocation8 + $0x110] sm:$0xff] }
 0x147   : > { %v583_v21 = vmul.f32 %v4563_v6, %v5120_v13  ;;  %v622_v22 = vmul.f32 %v5262_v54, %v579_v11  ;;  %v621_v23 = vmul.f32 %v5265_v59, %v578_v15  ;;  %v582_v45 = vmul.f32 %v4563_v6, %v5117_v12  ;;  %v686_v12 = vld [vmem:[#allocation8 + $0x98] sm:$0xff]  ;;  %v514_v11 = vpop.xlane.xlu1 %513 }
 0x148   : > { %v4565_v29 = vpop.eup %4564  ;;  %v623_v15 = vmul.f32 %v5265_v59, %v580_v33  ;;  %v3515_v0 = vcombine.high %v686_v12, %v690_v51  ;;  %4574 = vrsqrt.f32 %v553_v57 }
 0x149   : > { %v626_v32 = vmul.f32 %v5262_v54, %v583_v21  ;;  %v5279_v46 = vpack.c.bf16 %v622_v22, %v620_v1  ;;  %v5281_v48 = vpack.c.bf16 %v621_v23, %v619_v8  ;;  %v585_v4 = vmul.f32 %v4565_v29, %v5136_v20  ;;  %v693_v22 = vld [vmem:[#allocation8 + $0xd0] sm:$0xff] }
 0x14a   : > { %v4567_v13 = vpop.eup %4566  ;;  %v625_v16 = vmul.f32 %v5265_v59, %v582_v45  ;;  %v3504_v20 = vcombine.low %v677_v17, %v681_v27  ;;  %v3506_v1 = vcombine.low %v678_v28, %v682_v5  ;;  %v3513_v21 = vcombine.high %v5283_v56, %v689_v7 }
 0x14b   : > { %1467 = vmatprep.mubr.bf16.mxu0 %v5279_v46  ;;  %1580 = vmatprep.mubr.bf16.mxu1 %v5279_v46  ;;  %v5287_v60 = vpack.c.bf16 %v626_v32, %v624_v2  ;;  %v587_v6 = vmul.f32 %v4567_v13, %v5130_v18  ;;  %v538_v18 = vmul.f32 0.00390625, %v511_v3  ;;  %v539_v8 = vmul.f32 0.00390625, %v514_v11  ;;  %v705_v3 = vld [vmem:[#allocation8 + $0x130] sm:$0xff] }
 0x14c   : > { %1468 = vmatmul.mubr.bf16.vlgmr.msra.gmra.mrb[0].mxu0 %v5281_v48  ;;  %1581 = vmatmul.mubr.bf16.vlgmr.msra.gmra.mrb[0].mxu1 %v5281_v48  ;;  %v4569_v23 = vpop.eup %4568  ;;  %v628_v47 = vmul.f32 %v5262_v54, %v585_v4  ;;  %v5306_v17 = vpack.c.bf16 %v625_v16, %v623_v15  ;;  %v584_v27 = vmul.f32 %v4565_v29, %v5133_v19  ;;  %v702_v4 = vld [vmem:[#allocation8 + $0x118] sm:$0xff] }
 0x14d   : > { %1662 = vmatpush1.bf16.msra.mxu0 %v3496_v49  ;;  %1775 = vmatpush1.bf16.msra.mxu1 %v3498_v50  ;;  %v630_v49 = vmul.f32 %v5262_v54, %v587_v6  ;;  %v586_v28 = vmul.f32 %v4567_v13, %v5123_v14  ;;  %v3512_v5 = vcombine.low %v5283_v56, %v689_v7  ;;  %v554_v32 = vadd.f32 1e-06, %v538_v18  ;;  %v706_v19 = vld [vmem:[#allocation8 + $0x138] sm:$0xff]  ;;  %v517_v13 = vpop.xlane.xlu0 %516 }
 0x14e   : > { %1663 = vmatprep.subr.bf16.mxu0 %v3505_v53  ;;  %1776 = vmatprep.subr.bf16.mxu1 %v3507_v55  ;;  %v4571_v50 = vpop.eup %4570  ;;  %v3514_v2 = vcombine.low %v686_v12, %v690_v51  ;;  %v3521_v33 = vcombine.high %v693_v22, %v697_v34  ;;  %v3523_v45 = vcombine.high %v694_v36, %v698_v39  ;;  %v555_v53 = vadd.f32 1e-06, %v539_v8  ;;  %v520_v55 = vpop.xlane.xlu1 %519  ;;  %v714_v18 = vld [vmem:[#allocation8 + $0x178] sm:$0xff] }
 0x14f   : > { %1477 = vmatprep.mubr.bf16.mxu0 %v5287_v60  ;;  %1590 = vmatprep.mubr.bf16.mxu1 %v5287_v60  ;;  %v5311_v57 = vpack.c.bf16 %v630_v49, %v628_v47  ;;  %v589_v14 = vmul.f32 %v4569_v23, %v5156_v31  ;;  %v591_v29 = vmul.f32 %v4571_v50, %v5146_v26  ;;  %4576 = vrsqrt.f32 %v554_v32  ;;  %v709_v26 = vld [vmem:[#allocation8 + $0x150] sm:$0xff] }
 0x150   : > { %v627_v56 = vmul.f32 %v5265_v59, %v584_v27  ;;  %v629_v7 = vmul.f32 %v5265_v59, %v586_v28  ;;  %v3520_v12 = vcombine.low %v693_v22, %v697_v34  ;;  %v3522_v51 = vcombine.low %v694_v36, %v698_v39  ;;  %v4573_v16 = vpop.eup %4572 }
 0x151   : > { %1664 = vmatpush1.bf16.msra.mxu0 %v3504_v20  ;;  %1777 = vmatpush1.bf16.msra.mxu1 %v3506_v1  ;;  %v541_v6 = vmul.f32 0.00390625, %v520_v55  ;;  %v3529_v31 = vcombine.high %v701_v52, %v705_v3  ;;  %v3531_v11 = vcombine.high %v702_v4, %v706_v19  ;;  %4578 = vrsqrt.f32 %v555_v53  ;;  %v713_v20 = vld [vmem:[#allocation8 + $0x170] sm:$0xff]  ;;  %v710_v1 = vld [vmem:[#allocation8 + $0x158] sm:$0xff] }
 0x152   : > { %1665 = vmatprep.subr.bf16.mxu0 %v3513_v21  ;;  %1778 = vmatprep.subr.bf16.mxu1 %v3515_v0  ;;  %v540_v15 = vmul.f32 0.00390625, %v517_v13  ;;  %v632_v21 = vmul.f32 %v5262_v54, %v589_v14  ;;  %v634_v0 = vmul.f32 %v5262_v54, %v591_v29  ;;  %v4575_v22 = vpop.eup %4574  ;;  %v5323_v8 = vpack.c.bf16 %v629_v7, %v627_v56  ;;  %v526_v32 = vpop.xlane.xlu1 %525  ;;  %v718_v53 = vld [vmem:[#allocation8 + $0x198] sm:$0xff]  ;;  %v729_v56 = vld [vmem:[#allocation8 + $0x1f0] sm:$0xff] }
 0x153   : > { %v588_v34 = vmul.f32 %v4569_v23, %v5153_v30  ;;  %v590_v36 = vmul.f32 %v4571_v50, %v5143_v25  ;;  %v3528_v39 = vcombine.low %v701_v52, %v705_v3  ;;  %v3530_v47 = vcombine.low %v702_v4, %v706_v19  ;;  %v722_v55 = vld [vmem:[#allocation8 + $0x1b8] sm:$0xff]  ;;  %v523_v23 = vpop.xlane.xlu0 %522 }
 0x154   : > { %1478 = vmatmul.mubr.bf16.gmra.mrb[4].mxu0 %v5306_v17  ;;  %1591 = vmatmul.mubr.bf16.gmra.mrb[4].mxu1 %v5306_v17  ;;  %v557_v49 = vadd.f32 1e-06, %v541_v6  ;;  %v3537_v27 = vcombine.high %v709_v26, %v713_v20  ;;  %v3539_v28 = vcombine.high %v710_v1, %v714_v18  ;;  %v593_v30 = vmul.f32 %v4573_v16, %v5176_v41  ;;  %v726_v7 = vld [vmem:[#allocation8 + $0x1d8] sm:$0xff] }
 0x155   : > { %1666 = vmatpush1.bf16.msra.mxu0 %v3512_v5  ;;  %1779 = vmatpush1.bf16.msra.mxu1 %v3514_v2  ;;  %v717_v5 = vld [vmem:[#allocation8 + $0x190] sm:$0xff]  ;;  %v556_v2 = vadd.f32 1e-06, %v540_v15  ;;  %v595_v25 = vmul.f32 %v4575_v22, %v5173_v40  ;;  %v631_v50 = vmul.f32 %v5265_v59, %v588_v34  ;;  %v633_v52 = vmul.f32 %v5265_v59, %v590_v36 }
 0x156   : > { %1667 = vmatprep.subr.bf16.mxu0 %v3521_v33  ;;  %1780 = vmatprep.subr.bf16.mxu1 %v3523_v45  ;;  %v5327_v33 = vpack.c.bf16 %v634_v0, %v632_v21  ;;  %v721_v45 = vld [vmem:[#allocation8 + $0x1b0] sm:$0xff]  ;;  %v3536_v3 = vcombine.low %v709_v26, %v713_v20  ;;  %v3538_v4 = vcombine.low %v710_v1, %v714_v18  ;;  %4580 = vrsqrt.f32 %v557_v49  ;;  %v734_v49 = vld [vmem:[#allocation8 + $0x218] sm:$0xff] }
 0x157   : > { %1487 = vmatprep.mubr.bf16.mxu0 %v5311_v57  ;;  %1600 = vmatprep.mubr.bf16.mxu1 %v5311_v57  ;;  %v543_v19 = vmul.f32 0.00390625, %v526_v32  ;;  %v3545_v41 = vcombine.high %v717_v5, %v721_v45  ;;  %v3547_v14 = vcombine.high %v718_v53, %v722_v55  ;;  %4582 = vrsqrt.f32 %v556_v2  ;;  %v725_v40 = vld [vmem:[#allocation8 + $0x1d0] sm:$0xff] }
 0x158   : > { %v542_v29 = vmul.f32 0.00390625, %v523_v23  ;;  %v638_v6 = vmul.f32 %v5262_v54, %v595_v25  ;;  %v592_v26 = vmul.f32 %v4573_v16, %v5170_v38  ;;  %v594_v15 = vmul.f32 %v4575_v22, %v5167_v37  ;;  %v733_v34 = vld [vmem:[#allocation8 + $0x210] sm:$0xff] }
 0x159   : > { %1668 = vmatpush1.bf16.msra.mxu0 %v3520_v12  ;;  %1781 = vmatpush1.bf16.msra.mxu1 %v3522_v51  ;;  %v4577_v13 = vpop.eup %4576  ;;  %v730_v12 = vld [vmem:[#allocation8 + $0x1f8] sm:$0xff]  ;;  %v636_v51 = vmul.f32 %v5262_v54, %v593_v30  ;;  %v3544_v20 = vcombine.low %v717_v5, %v721_v45  ;;  %v3546_v1 = vcombine.low %v718_v53, %v722_v55  ;;  %v559_v18 = vadd.f32 1e-06, %v543_v19  ;;  %v745_v45 = vld [vmem:[#allocation8 + $0x270] sm:$0xff] }
 0x15a   : > { %1669 = vmatprep.subr.bf16.mxu0 %v3529_v31  ;;  %1782 = vmatprep.subr.bf16.mxu1 %v3531_v11  ;;  %v5339_v11 = vpack.c.bf16 %v633_v52, %v631_v50  ;;  %v3553_v21 = vcombine.high %v725_v40, %v729_v56  ;;  %v3555_v0 = vcombine.high %v726_v7, %v730_v12  ;;  %v558_v36 = vadd.f32 1e-06, %v542_v29  ;;  %v742_v53 = vld [vmem:[#allocation8 + $0x258] sm:$0xff] }
 0x15b   : > { %v4579_v31 = vpop.eup %4578  ;;  %v597_v38 = vmul.f32 %v4577_v13, %v5190_v62  ;;  %v635_v16 = vmul.f32 %v5265_v59, %v592_v26  ;;  %v637_v22 = vmul.f32 %v5265_v59, %v594_v15  ;;  %v3554_v5 = vcombine.low %v726_v7, %v730_v12  ;;  %v741_v62 = vld [vmem:[#allocation8 + $0x250] sm:$0xff]  ;;  %v746_v55 = vld [vmem:[#allocation8 + $0x278] sm:$0xff] }
 0x15c   : > { %1488 = vmatmul.mubr.bf16.gmra.mrb[8].mxu0 %v5323_v8  ;;  %1601 = vmatmul.mubr.bf16.gmra.mrb[8].mxu1 %v5323_v8  ;;  %v599_v37 = vmul.f32 %v4579_v31, %v5196_v10  ;;  %4584 = vrsqrt.f32 %v559_v18  ;;  %v596_v52 = vmul.f32 %v4577_v13, %v5179_v43  ;;  %v750_v7 = vld [vmem:[#allocation8 + $0x298] sm:$0xff] }
 0x15d   : > { %1670 = vmatpush1.bf16.msra.mxu0 %v3528_v39  ;;  %1783 = vmatpush1.bf16.msra.mxu1 %v3530_v47  ;;  %v5343_v39 = vpack.c.bf16 %v638_v6, %v636_v51  ;;  %v737_v47 = vld [vmem:[#allocation8 + $0x230] sm:$0xff]  ;;  %4586 = vrsqrt.f32 %v558_v36  ;;  %v640_v30 = vmul.f32 %v5262_v54, %v597_v38  ;;  %v5355_v50 = vpack.c.bf16 %v637_v22, %v635_v16  ;;  %v754_v12 = vld [vmem:[#allocation8 + $0x2b8] sm:$0xff] }
 0x15e   : > { %1671 = vmatprep.subr.bf16.mxu0 %v3537_v27  ;;  %1784 = vmatprep.subr.bf16.mxu1 %v3539_v28  ;;  %v738_v27 = vld [vmem:[#allocation8 + $0x238] sm:$0xff]  ;;  %v3552_v28 = vcombine.low %v725_v40, %v729_v56  ;;  %v3561_v2 = vcombine.high %v733_v34, %v737_v47  ;;  %v642_v25 = vmul.f32 %v5262_v54, %v599_v37  ;;  %v749_v40 = vld [vmem:[#allocation8 + $0x290] sm:$0xff] }
 0x15f   : > { %1497 = vmatprep.mubr.bf16.mxu0 %v5327_v33  ;;  %1610 = vmatprep.mubr.bf16.mxu1 %v5327_v33  ;;  %v3563_v32 = vcombine.high %v734_v49, %v738_v27  ;;  %v3562_v19 = vcombine.low %v734_v49, %v738_v27  ;;  %v753_v56 = vld [vmem:[#allocation8 + $0x2b0] sm:$0xff]  ;;  %v3568_v6 = vcombine.low %v741_v62, %v745_v45  ;;  %v762_v18 = vld [vmem:[#allocation8 + $0x2f8] sm:$0xff] }
 0x160   : > { %v4581_v10 = vpop.eup %4580  ;;  %v5359_v29 = vpack.c.bf16 %v642_v25, %v640_v30  ;;  %v3577_v26 = vcombine.high %v749_v40, %v753_v56  ;;  %v3579_v15 = vcombine.high %v750_v7, %v754_v12  ;;  %v3576_v27 = vcombine.low %v749_v40, %v753_v56  ;;  %v765_v22 = vld [vmem:[#allocation8 + $0x310] sm:$0xff]  ;;  %v774_v25 = vld [vmem:[#allocation8 + $0x358] sm:$0xff] }
 0x161   : > { %1672 = vmatpush1.bf16.msra.mxu0 %v3536_v3  ;;  %1785 = vmatpush1.bf16.msra.mxu1 %v3538_v4  ;;  %v4583_v23 = vpop.eup %4582  ;;  %v598_v3 = vmul.f32 %v4579_v31, %v5193_v9  ;;  %v3560_v4 = vcombine.low %v733_v34, %v737_v47  ;;  %v603_v43 = vmul.f32 %v4581_v10, %v5216_v44  ;;  %v761_v44 = vld [vmem:[#allocation8 + $0x2f0] sm:$0xff] }
 0x162   : > { %1673 = vmatprep.subr.bf16.mxu0 %v3545_v41  ;;  %1786 = vmatprep.subr.bf16.mxu1 %v3547_v14  ;;  %v3569_v41 = vcombine.high %v741_v62, %v745_v45  ;;  %v3571_v14 = vcombine.high %v742_v53, %v746_v55  ;;  %v601_v51 = vmul.f32 %v4583_v23, %v5210_v35 }
 0x163   : > { %v639_v9 = vmul.f32 %v5265_v59, %v596_v52  ;;  %v641_v13 = vmul.f32 %v5265_v59, %v598_v3  ;;  %v3570_v31 = vcombine.low %v742_v53, %v746_v55  ;;  %v600_v47 = vmul.f32 %v4583_v23, %v5203_v24  ;;  %v778_v23 = vld [vmem:[#allocation8 + $0x378] sm:$0xff] }
 0x164   : > { %1498 = vmatmul.mubr.bf16.gmra.mrb[12].mxu0 %v5339_v11  ;;  %1611 = vmatmul.mubr.bf16.gmra.mrb[12].mxu1 %v5339_v11  ;;  %v602_v49 = vmul.f32 %v4581_v10, %v5213_v42  ;;  %v3578_v38 = vcombine.low %v750_v7, %v754_v12  ;;  %v3603_v12 = vcombine.high %v774_v25, %v778_v23 }
 0x165   : > { %1674 = vmatpush1.bf16.msra.mxu0 %v3544_v20  ;;  %1787 = vmatpush1.bf16.msra.mxu1 %v3546_v1  ;;  %v757_v20 = vld [vmem:[#allocation8 + $0x2d0] sm:$0xff]  ;;  %v758_v1 = vld [vmem:[#allocation8 + $0x2d8] sm:$0xff]  ;;  %v5371_v36 = vpack.c.bf16 %v641_v13, %v639_v9  ;;  %v643_v42 = vmul.f32 %v5265_v59, %v600_v47 }
 0x166   : > { %1675 = vmatprep.subr.bf16.mxu0 %v3553_v21  ;;  %1788 = vmatprep.subr.bf16.mxu1 %v3555_v0  ;;  %v4585_v35 = vpop.eup %4584  ;;  %v644_v21 = vmul.f32 %v5262_v54, %v601_v51  ;;  %v646_v0 = vmul.f32 %v5262_v54, %v603_v43  ;;  %v3585_v37 = vcombine.high %v757_v20, %v761_v44  ;;  %v781_v51 = vld [vmem:[#allocation8 + $0x390] sm:$0xff]  ;;  %v782_v13 = vld [vmem:[#allocation8 + $0x398] sm:$0xff] }
 0x167   : > { %1507 = vmatprep.mubr.bf16.mxu0 %v5343_v39  ;;  %1620 = vmatprep.mubr.bf16.mxu1 %v5343_v39  ;;  %v4587_v34 = vpop.eup %4586  ;;  %v3587_v16 = vcombine.high %v758_v1, %v762_v18  ;;  %v607_v24 = vmul.f32 %v4585_v35, %v5234_v63  ;;  %v645_v10 = vmul.f32 %v5265_v59, %v602_v49  ;;  %v777_v63 = vld [vmem:[#allocation8 + $0x370] sm:$0xff] }
 0x168   : > { %v605_v62 = vmul.f32 %v4587_v34, %v5228_v58  ;;  %v3584_v45 = vcombine.low %v757_v20, %v761_v44  ;;  %v3586_v53 = vcombine.low %v758_v1, %v762_v18  ;;  %v773_v58 = vld [vmem:[#allocation8 + $0x350] sm:$0xff]  ;;  %v790_v18 = vld [vmem:[#allocation8 + $0x3d8] sm:$0xff] }
 0x169   : > { %1676 = vmatpush1.bf16.msra.mxu0 %v3552_v28  ;;  %1789 = vmatpush1.bf16.msra.mxu1 %v3554_v5  ;;  %v5375_v28 = vpack.c.bf16 %v646_v0, %v644_v21  ;;  %v769_v5 = vld [vmem:[#allocation8 + $0x330] sm:$0xff]  ;;  %v650_v3 = vmul.f32 %v5262_v54, %v607_v24  ;;  %v3601_v7 = vcombine.high %v773_v58, %v777_v63  ;;  %v794_v21 = vld [vmem:[#allocation8 + $0x3f8] sm:$0xff] }
 0x16a   : > { %1677 = vmatprep.subr.bf16.mxu0 %v3561_v2  ;;  %1790 = vmatprep.subr.bf16.mxu1 %v3563_v32  ;;  %v766_v2 = vld [vmem:[#allocation8 + $0x318] sm:$0xff]  ;;  %v3593_v55 = vcombine.high %v765_v22, %v769_v5  ;;  %v648_v52 = vmul.f32 %v5262_v54, %v605_v62  ;;  %v3592_v40 = vcombine.low %v765_v22, %v769_v5  ;;  %v785_v9 = vld [vmem:[#allocation8 + $0x3b0] sm:$0xff] }
 0x16b   : > { %v770_v32 = vld [vmem:[#allocation8 + $0x338] sm:$0xff]  ;;  %v793_v1 = vld [vmem:[#allocation8 + $0x3f0] sm:$0xff]  ;;  %v3619_v47 = vcombine.high %v790_v18, %v794_v21 }
 0x16c   : > { %1508 = vmatmul.mubr.bf16.gmra.mrb[16].mxu0 %v5355_v50  ;;  %1621 = vmatmul.mubr.bf16.gmra.mrb[16].mxu1 %v5355_v50  ;;  %v3595_v30 = vcombine.high %v766_v2, %v770_v32  ;;  %v3594_v56 = vcombine.low %v766_v2, %v770_v32  ;;  %v5391_v43 = vpack.c.bf16 %v650_v3, %v648_v52  ;;  %v786_v54 = vld [vmem:[#allocation8 + $0x3b8] sm:$0xff] }
 0x16d   : > { %1678 = vmatpush1.bf16.msra.mxu0 %v3560_v4  ;;  %1791 = vmatpush1.bf16.msra.mxu1 %v3562_v19  ;;  %v5387_v4 = vpack.c.bf16 %v645_v10, %v643_v42  ;;  %v4588_v19 = vld [vmem:[%s5064_s12 + $0xe0] sm:$0xff]  ;;  %v3611_v20 = vcombine.high %v782_v13, %v786_v54  ;;  %v3610_v0 = vcombine.low %v782_v13, %v786_v54 }
 0x16e   : > { %1679 = vmatprep.subr.bf16.mxu0 %v3569_v41  ;;  %1792 = vmatprep.subr.bf16.mxu1 %v3571_v14  ;;  %v604_v41 = vmul.f32 %v4588_v19, %v4587_v34  ;;  %v606_v14 = vmul.f32 %v4585_v35, %v5231_v61  ;;  %v789_v35 = vld [vmem:[#allocation8 + $0x3d0] sm:$0xff] }
 0x16f   : > { %1517 = vmatprep.mubr.bf16.mxu0 %v5359_v29  ;;  %1630 = vmatprep.mubr.bf16.mxu1 %v5359_v29  ;;  %v3617_v34 = vcombine.high %v789_v35, %v793_v1  ;;  %v3616_v49 = vcombine.low %v789_v35, %v793_v1 }
 0x170   : > { %v647_v61 = vmul.f32 %v5265_v59, %v604_v41 }
 0x171   : > { %1680 = vmatpush1.bf16.msra.mxu0 %v3568_v6  ;;  %1793 = vmatpush1.bf16.msra.mxu1 %v3570_v31  ;;  %v649_v6 = vmul.f32 %v5265_v59, %v606_v14  ;;  %v3600_v31 = vcombine.low %v773_v58, %v777_v63  ;;  %v3608_v59 = vcombine.low %v781_v51, %v785_v9 }
 0x172   : > { %1681 = vmatprep.subr.bf16.mxu0 %v3577_v26  ;;  %1794 = vmatprep.subr.bf16.mxu1 %v3579_v15  ;;  %v3602_v26 = vcombine.low %v774_v25, %v778_v23  ;;  %v3609_v15 = vcombine.high %v781_v51, %v785_v9 }
 0x173   : > { %v665_v44 = vpack.c.bf16 %v649_v6, %v647_v61 }
 0x174   : > { %1518 = vmatmul.mubr.bf16.gmra.mrb[20].mxu0 %v5371_v36  ;;  %1631 = vmatmul.mubr.bf16.gmra.mrb[20].mxu1 %v5371_v36 }
 0x175   : > { %1682 = vmatpush1.bf16.msra.mxu0 %v3576_v27  ;;  %1795 = vmatpush1.bf16.msra.mxu1 %v3578_v38  ;;  %v3618_v27 = vcombine.low %v790_v18, %v794_v21 }
 0x176   : > { %1683 = vmatprep.subr.bf16.mxu0 %v3585_v37  ;;  %1796 = vmatprep.subr.bf16.mxu1 %v3587_v16 }
 0x177   : > { %1527 = vmatprep.mubr.bf16.mxu0 %v5375_v28  ;;  %1640 = vmatprep.mubr.bf16.mxu1 %v5375_v28 }
 0x179   : > { %1684 = vmatpush1.bf16.msra.mxu0 %v3584_v45  ;;  %1797 = vmatpush1.bf16.msra.mxu1 %v3586_v53 }
 0x17a   : > { %1685 = vmatprep.subr.bf16.mxu0 %v3593_v55  ;;  %1798 = vmatprep.subr.bf16.mxu1 %v3595_v30 }
 0x17c   : > { %1528 = vmatmul.mubr.bf16.gmra.mrb[24].mxu0 %v5387_v4  ;;  %1641 = vmatmul.mubr.bf16.gmra.mrb[24].mxu1 %v5387_v4 }
 0x17d   : > { %1686 = vmatpush1.bf16.msra.mxu0 %v3592_v40  ;;  %1799 = vmatpush1.bf16.msra.mxu1 %v3594_v56 }
 0x17e   : > { %1687 = vmatprep.subr.bf16.mxu0 %v3601_v7  ;;  %1800 = vmatprep.subr.bf16.mxu1 %v3603_v12 }
 0x17f   : > { %1537 = vmatprep.mubr.bf16.mxu0 %v5391_v43  ;;  %1650 = vmatprep.mubr.bf16.mxu1 %v5391_v43 }
 0x181   : > { %1688 = vmatpush1.bf16.msra.mxu0 %v3600_v31  ;;  %1801 = vmatpush1.bf16.msra.mxu1 %v3602_v26 }
 0x182   : > { %1689 = vmatprep.subr.bf16.mxu0 %v3609_v15  ;;  %1802 = vmatprep.subr.bf16.mxu1 %v3611_v20 }
 0x184   : > { %1538 = vmatmul.mubr.bf16.gmra.mrb[28].mxu0 %v665_v44  ;;  %1651 = vmatmul.mubr.bf16.gmra.mrb[28].mxu1 %v665_v44 }
 0x185   : > { %1690 = vmatpush1.bf16.msra.mxu0 %v3608_v59  ;;  %1693 = vmatprep.mubr.bf16.mxu0 %v5279_v46 }
 0x186   : > { %1803 = vmatpush1.bf16.msra.mxu1 %v3610_v0  ;;  %1806 = vmatprep.mubr.bf16.mxu1 %v5279_v46 }
 0x187   : > { %1691 = vmatprep.subr.bf16.mxu0 %v3617_v34  ;;  %1804 = vmatprep.subr.bf16.mxu1 %v3619_v47 }
 0x189   : > { %1692 = vmatpush1.bf16.msra.mxu0 %v3616_v49 }
 0x18a   : > { %1805 = vmatpush1.bf16.msra.mxu1 %v3618_v27 }
 0x18c   : > { %1694 = vmatmul.mubr.bf16.vlgmr.msra.gmra.mrb[32].mxu0 %v5281_v48 }
 0x18d   : > { %1807 = vmatmul.mubr.bf16.vlgmr.msra.gmra.mrb[32].mxu1 %v5281_v48  ;;  %1703 = vmatprep.mubr.bf16.mxu0 %v5287_v60 }
 0x18e   : > { %1816 = vmatprep.mubr.bf16.mxu1 %v5287_v60 }
 0x194   : > { %1704 = vmatmul.mubr.bf16.gmra.mrb[36].mxu0 %v5306_v17 }
 0x195   : > { %1817 = vmatmul.mubr.bf16.gmra.mrb[36].mxu1 %v5306_v17  ;;  %1713 = vmatprep.mubr.bf16.mxu0 %v5311_v57 }
 0x196   : > { %1826 = vmatprep.mubr.bf16.mxu1 %v5311_v57 }
 0x19c   : > { %1714 = vmatmul.mubr.bf16.gmra.mrb[40].mxu0 %v5323_v8 }
 0x19d   : > { %1827 = vmatmul.mubr.bf16.gmra.mrb[40].mxu1 %v5323_v8  ;;  %1723 = vmatprep.mubr.bf16.mxu0 %v5327_v33 }
 0x19e   : > { %1836 = vmatprep.mubr.bf16.mxu1 %v5327_v33 }
 0x1a4   : > { %1724 = vmatmul.mubr.bf16.gmra.mrb[44].mxu0 %v5339_v11 }
 0x1a5   : > { %1837 = vmatmul.mubr.bf16.gmra.mrb[44].mxu1 %v5339_v11  ;;  %1733 = vmatprep.mubr.bf16.mxu0 %v5343_v39 }
 0x1a6   : > { %1846 = vmatprep.mubr.bf16.mxu1 %v5343_v39 }
 0x1ac   : > { %1734 = vmatmul.mubr.bf16.gmra.mrb[48].mxu0 %v5355_v50 }
 0x1ad   : > { %1847 = vmatmul.mubr.bf16.gmra.mrb[48].mxu1 %v5355_v50  ;;  %1743 = vmatprep.mubr.bf16.mxu0 %v5359_v29 }
 0x1ae   : > { %1856 = vmatprep.mubr.bf16.mxu1 %v5359_v29 }
 0x1b4   : > { %1744 = vmatmul.mubr.bf16.gmra.mrb[52].mxu0 %v5371_v36 }
 0x1b5   : > { %1857 = vmatmul.mubr.bf16.gmra.mrb[52].mxu1 %v5371_v36  ;;  %1753 = vmatprep.mubr.bf16.mxu0 %v5375_v28 }
 0x1b6   : > { %1866 = vmatprep.mubr.bf16.mxu1 %v5375_v28 }
 0x1bc   : > { %1754 = vmatmul.mubr.bf16.gmra.mrb[56].mxu0 %v5387_v4 }
 0x1bd   : > { %1867 = vmatmul.mubr.bf16.gmra.mrb[56].mxu1 %v5387_v4  ;;  %1763 = vmatprep.mubr.bf16.mxu0 %v5391_v43 }
 0x1be   : > { %1876 = vmatprep.mubr.bf16.mxu1 %v5391_v43 }
 0x1c4   : > { %1764 = vmatmul.mubr.bf16.gmra.mrb[60].mxu0 %v665_v44 }
 0x1c5   : > { %1877 = vmatmul.mubr.bf16.gmra.mrb[60].mxu1 %v665_v44 }
 0x21f   : > { %v5429_v46 = vpop.f32.mrb[0].mxu0  ;;  %v5431_v48 = vpop.f32.mrb[0].mxu1 }
 0x220   : > { %v5433_v60 = vpop.f32.mrb[1].mxu1  ;;  %1967 = vrot.lane.b32.xlu0 %v5429_v46, %s4769_s22  ;;  %v5437_v17 = vpop.f32.mrb[1].mxu0 }
 0x221   : > { %v5439_v57 = vpop.f32.mrb[2].mxu0  ;;  %v5441_v8 = vpop.f32.mrb[2].mxu1 }
 0x222   : > { %v5443_v33 = vpop.f32.mrb[3].mxu1  ;;  %1969 = vrot.lane.b32.xlu1 %v5439_v57, %s4769_s22  ;;  %v5447_v11 = vpop.f32.mrb[3].mxu0 }
 0x224   : > { %2320 = vrot.lane.b32.xlu0 %v5431_v48, %s4769_s22 }
 0x226   : > { %2322 = vrot.lane.b32.xlu1 %v5441_v8, %s4769_s22 }
 0x227   : > { %v5453_v39 = vpop.f32.mrb[4].mxu0  ;;  %v5455_v50 = vpop.f32.mrb[4].mxu1 }
 0x228   : > { %2143 = vrot.lane.b32.xlu0 %v5437_v17, %s4769_s22  ;;  %v5459_v29 = vpop.f32.mrb[5].mxu1  ;;  %v5461_v36 = vpop.f32.mrb[5].mxu0 }
 0x229   : > { %v5463_v38 = vpop.f32.mrb[6].mxu0  ;;  %v5465_v37 = vpop.f32.mrb[6].mxu1 }
 0x22a   : > { %2145 = vrot.lane.b32.xlu1 %v5447_v11, %s4769_s22  ;;  %v5469_v16 = vpop.f32.mrb[7].mxu1  ;;  %v5471_v22 = vpop.f32.mrb[7].mxu0 }
 0x22c   : > { %2497 = vrot.lane.b32.xlu0 %v5433_v60, %s4769_s22 }
 0x22e   : > { %2499 = vrot.lane.b32.xlu1 %v5443_v33, %s4769_s22 }
 0x22f   : > { %v5477_v28 = vpop.f32.mrb[8].mxu0  ;;  %v5479_v5 = vpop.f32.mrb[8].mxu1 }
 0x230   : > { %2324 = vrot.lane.b32.xlu0 %v5455_v50, %s4769_s22  ;;  %v5483_v2 = vpop.f32.mrb[9].mxu1  ;;  %v5485_v32 = vpop.f32.mrb[9].mxu0 }
 0x231   : > { %6472 = vst [vmem:[#allocation31_spill] sm:$0xff] %v5483_v2  ;;  %v5487_v62 = vpop.f32.mrb[10].mxu0  ;;  %v5489_v24 = vpop.f32.mrb[10].mxu1 }
 0x232   : > { %1971 = vrot.lane.b32.xlu1 %v5453_v39, %s4769_s22  ;;  %v5493_v42 = vpop.f32.mrb[11].mxu0  ;;  %v5495_v10 = vpop.f32.mrb[11].mxu1 }
 0x233   : > { %6473 = vst [vmem:[#allocation32_spill] sm:$0xff] %v5493_v42  ;;  %6474 = vst [vmem:[#allocation33_spill] sm:$0xff] %v5495_v10 }
 0x234   : > { %2147 = vrot.lane.b32.xlu0 %v5461_v36, %s4769_s22 }
 0x236   : > { %1973 = vrot.lane.b32.xlu1 %v5463_v38, %s4769_s22 }
 0x237   : > { %v5501_v45 = vpop.f32.mrb[12].mxu0  ;;  %v5503_v53 = vpop.f32.mrb[12].mxu1 }
 0x238   : > { %6475 = vst [vmem:[#allocation34_spill] sm:$0xff] %v5501_v45  ;;  %6476 = vst [vmem:[#allocation35_spill] sm:$0xff] %v5503_v53  ;;  %2501 = vrot.lane.b32.xlu0 %v5459_v29, %s4769_s22  ;;  %v5507_v55 = vpop.f32.mrb[13].mxu1  ;;  %v5509_v30 = vpop.f32.mrb[13].mxu0 }
 0x239   : > { %6477 = vst [vmem:[#allocation36_spill] sm:$0xff] %v5507_v55  ;;  %6478 = vst [vmem:[#allocation37_spill] sm:$0xff] %v5509_v30  ;;  %v5511_v58 = vpop.f32.mrb[14].mxu0  ;;  %v5513_v63 = vpop.f32.mrb[14].mxu1 }
 0x23a   : > { %6479 = vst [vmem:[#allocation38_spill] sm:$0xff] %v5511_v58  ;;  %6480 = vst [vmem:[#allocation39_spill] sm:$0xff] %v5513_v63  ;;  %2326 = vrot.lane.b32.xlu1 %v5465_v37, %s4769_s22  ;;  %v5517_v25 = vpop.f32.mrb[15].mxu0  ;;  %v5519_v23 = vpop.f32.mrb[15].mxu1 }
 0x23b   : > { %6481 = vst [vmem:[#allocation40_spill] sm:$0xff] %v5517_v25  ;;  %6482 = vst [vmem:[#allocation41_spill] sm:$0xff] %v5519_v23 }
 0x23c   : > { %1975 = vrot.lane.b32.xlu0 %v5477_v28, %s4769_s22 }
 0x23e   : > { %2149 = vrot.lane.b32.xlu1 %v5471_v22, %s4769_s22 }
 0x23f   : > { %v5525_v52 = vpop.f32.mrb[16].mxu0  ;;  %v5527_v3 = vpop.f32.mrb[16].mxu1 }
 0x240   : > { %6483 = vst [vmem:[#allocation42_spill] sm:$0xff] %v5525_v52  ;;  %6484 = vst [vmem:[#allocation43_spill] sm:$0xff] %v5527_v3  ;;  %2328 = vrot.lane.b32.xlu0 %v5479_v5, %s4769_s22  ;;  %v5531_v4 = vpop.f32.mrb[17].mxu0  ;;  %v5533_v19 = vpop.f32.mrb[17].mxu1 }
 0x241   : > { %6485 = vst [vmem:[#allocation44_spill] sm:$0xff] %v5531_v4  ;;  %6486 = vst [vmem:[#allocation45_spill] sm:$0xff] %v5533_v19  ;;  %v5535_v41 = vpop.f32.mrb[18].mxu0  ;;  %v5537_v14 = vpop.f32.mrb[18].mxu1 }
 0x242   : > { %6487 = vst [vmem:[#allocation46_spill] sm:$0xff] %v5535_v41  ;;  %6488 = vst [vmem:[#allocation47_spill] sm:$0xff] %v5537_v14  ;;  %2503 = vrot.lane.b32.xlu1 %v5469_v16, %s4769_s22  ;;  %v5541_v40 = vpop.f32.mrb[19].mxu0  ;;  %v5543_v56 = vpop.f32.mrb[19].mxu1 }
 0x243   : > { %6489 = vst [vmem:[#allocation48_spill] sm:$0xff] %v5541_v40  ;;  %6490 = vst [vmem:[#allocation49_spill] sm:$0xff] %v5543_v56 }
 0x244   : > { %2151 = vrot.lane.b32.xlu0 %v5485_v32, %s4769_s22 }
 0x246   : > { %1977 = vrot.lane.b32.xlu1 %v5487_v62, %s4769_s22 }
 0x247   : > { %v5549_v7 = vpop.f32.mrb[20].mxu0  ;;  %v5551_v12 = vpop.f32.mrb[20].mxu1 }
 0x248   : > { %6491 = vst [vmem:[#allocation50_spill] sm:$0xff] %v5549_v7  ;;  %6492 = vst [vmem:[#allocation51_spill] sm:$0xff] %v5551_v12  ;;  %2505 = vrot.lane.b32.xlu0 %v5483_v2, %s4769_s22  ;;  %v5555_v51 = vpop.f32.mrb[21].mxu0  ;;  %v5557_v43 = vpop.f32.mrb[21].mxu1 }
 0x249   : > { %6493 = vst [vmem:[#allocation52_spill] sm:$0xff] %v5555_v51  ;;  %6494 = vst [vmem:[#allocation53_spill] sm:$0xff] %v5557_v43  ;;  %v5559_v9 = vpop.f32.mrb[22].mxu0  ;;  %v5561_v13 = vpop.f32.mrb[22].mxu1 }
 0x24a   : > { %6495 = vst [vmem:[#allocation54_spill] sm:$0xff] %v5559_v9  ;;  %6496 = vst [vmem:[#allocation55_spill] sm:$0xff] %v5561_v13  ;;  %2330 = vrot.lane.b32.xlu1 %v5489_v24, %s4769_s22  ;;  %v5565_v54 = vpop.f32.mrb[23].mxu0  ;;  %v5567_v61 = vpop.f32.mrb[23].mxu1 }
 0x24b   : > { %6497 = vst [vmem:[#allocation56_spill] sm:$0xff] %v5565_v54  ;;  %6498 = vst [vmem:[#allocation57_spill] sm:$0xff] %v5567_v61 }
 0x24c   : > { %1979 = vrot.lane.b32.xlu0 %v5501_v45, %s4769_s22 }
 0x24e   : > { %2153 = vrot.lane.b32.xlu1 %v5493_v42, %s4769_s22 }
 0x24f   : > { %v5573_v6 = vpop.f32.mrb[24].mxu0  ;;  %v5575_v31 = vpop.f32.mrb[24].mxu1 }
 0x250   : > { %6499 = vst [vmem:[#allocation58_spill] sm:$0xff] %v5573_v6  ;;  %6500 = vst [vmem:[#allocation59_spill] sm:$0xff] %v5575_v31  ;;  %2332 = vrot.lane.b32.xlu0 %v5503_v53, %s4769_s22  ;;  %v5579_v26 = vpop.f32.mrb[25].mxu0  ;;  %v5581_v15 = vpop.f32.mrb[25].mxu1 }
 0x251   : > { %6501 = vst [vmem:[#allocation60_spill] sm:$0xff] %v5579_v26  ;;  %6502 = vst [vmem:[#allocation61_spill] sm:$0xff] %v5581_v15  ;;  %v5583_v20 = vpop.f32.mrb[26].mxu0  ;;  %v5585_v35 = vpop.f32.mrb[26].mxu1 }
 0x252   : > { %6503 = vst [vmem:[#allocation62_spill] sm:$0xff] %v5583_v20  ;;  %6504 = vst [vmem:[#allocation63_spill] sm:$0xff] %v5585_v35  ;;  %2507 = vrot.lane.b32.xlu1 %v5495_v10, %s4769_s22  ;;  %v5589_v44 = vpop.f32.mrb[27].mxu0  ;;  %v5591_v1 = vpop.f32.mrb[27].mxu1 }
 0x253   : > { %6505 = vst [vmem:[#allocation64_spill] sm:$0xff] %v5589_v44  ;;  %6506 = vst [vmem:[#allocation65_spill] sm:$0xff] %v5591_v1 }
 0x254   : > { %2155 = vrot.lane.b32.xlu0 %v5509_v30, %s4769_s22 }
 0x256   : > { %1981 = vrot.lane.b32.xlu1 %v5511_v58, %s4769_s22 }
 0x257   : > { %v5597_v18 = vpop.f32.mrb[28].mxu0  ;;  %v5599_v21 = vpop.f32.mrb[28].mxu1 }
 0x258   : > { %6507 = vst [vmem:[#allocation66_spill] sm:$0xff] %v5597_v18  ;;  %6508 = vst [vmem:[#allocation67_spill] sm:$0xff] %v5599_v21  ;;  %2509 = vrot.lane.b32.xlu0 %v5507_v55, %s4769_s22  ;;  %v5603_v59 = vpop.f32.mrb[29].mxu0  ;;  %v5605_v0 = vpop.f32.mrb[29].mxu1 }
 0x259   : > { %6509 = vst [vmem:[#allocation68_spill] sm:$0xff] %v5603_v59  ;;  %6510 = vst [vmem:[#allocation69_spill] sm:$0xff] %v5605_v0  ;;  %v5607_v34 = vpop.f32.mrb[30].mxu0  ;;  %v5609_v47 = vpop.f32.mrb[30].mxu1 }
 0x25a   : > { %6511 = vst [vmem:[#allocation70_spill] sm:$0xff] %v5607_v34  ;;  %2334 = vrot.lane.b32.xlu1 %v5513_v63, %s4769_s22  ;;  %v5613_v49 = vpop.f32.mrb[31].mxu0  ;;  %v5615_v27 = vpop.f32.mrb[31].mxu1 }
 0x25c   : > { %1983 = vrot.lane.b32.xlu0 %v5525_v52, %s4769_s22 }
 0x25e   : > { %2157 = vrot.lane.b32.xlu1 %v5517_v25, %s4769_s22 }
 0x25f   : > { %v5621_v55 = vpop.f32.mrb[32].mxu0 }
 0x260   : > { %v1808_v30 = vpop.f32.mrb[32].mxu1  ;;  %2336 = vrot.lane.b32.xlu0 %v5527_v3, %s4769_s22  ;;  %v5626_v53 = vpop.f32.mrb[33].mxu0 }
 0x261   : > { %v1810_v63 = vpop.f32.mrb[33].mxu1  ;;  %v5628_v58 = vpop.f32.mrb[34].mxu0 }
 0x262   : > { %v1812_v45 = vpop.f32.mrb[34].mxu1  ;;  %2511 = vrot.lane.b32.xlu1 %v5519_v23, %s4769_s22  ;;  %v5632_v52 = vpop.f32.mrb[35].mxu0 }
 0x263   : > { %v4281_v10 = vpack.c.bf16 %v1812_v45, %v1808_v30  ;;  %v1814_v25 = vpop.f32.mrb[35].mxu1 }
 0x264   : > { %v4321_v2 = vpack.c.bf16 %v1814_v25, %v1810_v63  ;;  %2159 = vrot.lane.b32.xlu0 %v5531_v4, %s4769_s22 }
 0x265   : > { %4282 = vst [vmem:[%s5638_s29] sm:$0xff] %v4281_v10  }
 0x266   : > { %4425 = vst [vmem:[%s5638_s29 + $0x40] sm:$0xff] %v4321_v2   ;;  %1985 = vrot.lane.b32.xlu1 %v5535_v41, %s4769_s22 }
 0x267   : > { %v5644_v3 = vpop.f32.mrb[36].mxu0 }
 0x268   : > { %v1818_v45 = vpop.f32.mrb[36].mxu1  ;;  %2513 = vrot.lane.b32.xlu0 %v5533_v19, %s4769_s22  ;;  %v5648_v30 = vpop.f32.mrb[37].mxu0 }
 0x269   : > { %v1820_v63 = vpop.f32.mrb[37].mxu1  ;;  %v5650_v25 = vpop.f32.mrb[38].mxu0 }
 0x26a   : > { %v1822_v4 = vpop.f32.mrb[38].mxu1  ;;  %2338 = vrot.lane.b32.xlu1 %v5537_v14, %s4769_s22  ;;  %v5654_v2 = vpop.f32.mrb[39].mxu0 }
 0x26b   : > { %v4286_v10 = vpack.c.bf16 %v1822_v4, %v1818_v45  ;;  %v1824_v23 = vpop.f32.mrb[39].mxu1 }
 0x26c   : > { %v4326_v41 = vpack.c.bf16 %v1824_v23, %v1820_v63  ;;  %1987 = vrot.lane.b32.xlu0 %v5549_v7, %s4769_s22 }
 0x26d   : > { %4418 = vst [vmem:[%s5638_s29 + $0x8] sm:$0xff] %v4286_v10  }
 0x26e   : > { %4426 = vst [vmem:[%s5638_s29 + $0x48] sm:$0xff] %v4326_v41   ;;  %2161 = vrot.lane.b32.xlu1 %v5541_v40, %s4769_s22 }
 0x26f   : > { %v5662_v19 = vpop.f32.mrb[40].mxu0 }
 0x270   : > { %v1828_v42 = vpop.f32.mrb[40].mxu1  ;;  %2340 = vrot.lane.b32.xlu0 %v5551_v12, %s4769_s22  ;;  %v5666_v14 = vpop.f32.mrb[41].mxu0 }
 0x271   : > { %v1830_v4 = vpop.f32.mrb[41].mxu1  ;;  %v5668_v23 = vpop.f32.mrb[42].mxu0 }
 0x272   : > { %v1832_v45 = vpop.f32.mrb[42].mxu1  ;;  %2515 = vrot.lane.b32.xlu1 %v5543_v56, %s4769_s22  ;;  %v5672_v41 = vpop.f32.mrb[43].mxu0 }
 0x273   : > { %v4291_v63 = vpack.c.bf16 %v1832_v45, %v1828_v42  ;;  %v1834_v10 = vpop.f32.mrb[43].mxu1 }
 0x274   : > { %v4331_v7 = vpack.c.bf16 %v1834_v10, %v1830_v4  ;;  %2163 = vrot.lane.b32.xlu0 %v5555_v51, %s4769_s22 }
 0x275   : > { %4419 = vst [vmem:[%s5638_s29 + $0x10] sm:$0xff] %v4291_v63  }
 0x276   : > { %4427 = vst [vmem:[%s5638_s29 + $0x50] sm:$0xff] %v4331_v7   ;;  %1989 = vrot.lane.b32.xlu1 %v5559_v9, %s4769_s22 }
 0x277   : > { %v5680_v12 = vpop.f32.mrb[44].mxu0 }
 0x278   : > { %v1838_v40 = vpop.f32.mrb[44].mxu1  ;;  %2517 = vrot.lane.b32.xlu0 %v5557_v43, %s4769_s22  ;;  %v5684_v56 = vpop.f32.mrb[45].mxu0 }
 0x279   : > { %v1840_v42 = vpop.f32.mrb[45].mxu1  ;;  %v5686_v4 = vpop.f32.mrb[46].mxu0 }
 0x27a   : > { %v1842_v45 = vpop.f32.mrb[46].mxu1  ;;  %2342 = vrot.lane.b32.xlu1 %v5561_v13, %s4769_s22  ;;  %v5690_v7 = vpop.f32.mrb[47].mxu0 }
 0x27b   : > { %v4296_v63 = vpack.c.bf16 %v1842_v45, %v1838_v40  ;;  %v1844_v10 = vpop.f32.mrb[47].mxu1 }
 0x27c   : > { %v4336_v51 = vpack.c.bf16 %v1844_v10, %v1840_v42  ;;  %1991 = vrot.lane.b32.xlu0 %v5573_v6, %s4769_s22 }
 0x27d   : > { %4420 = vst [vmem:[%s5638_s29 + $0x18] sm:$0xff] %v4296_v63  }
 0x27e   : > { %4428 = vst [vmem:[%s5638_s29 + $0x58] sm:$0xff] %v4336_v51   ;;  %2165 = vrot.lane.b32.xlu1 %v5565_v54, %s4769_s22  ;;  %v3975_v54 = vld [vmem:[%s5074_s18] sm:$0xff]  }
 0x27f   : > { %v5698_v43 = vpop.f32.mrb[48].mxu0 }
 0x280   : > { %6512 = vst [vmem:[#allocation71_spill] sm:$0xff] %v5698_v43  ;;  %v1848_v9 = vpop.f32.mrb[48].mxu1  ;;  %2344 = vrot.lane.b32.xlu0 %v5575_v31, %s4769_s22  ;;  %v5702_v13 = vpop.f32.mrb[49].mxu0 }
 0x281   : > { %6513 = vst [vmem:[#allocation72_spill] sm:$0xff] %v5702_v13  ;;  %v1850_v40 = vpop.f32.mrb[49].mxu1  ;;  %v5704_v42 = vpop.f32.mrb[50].mxu0 }
 0x282   : > { %6514 = vst [vmem:[#allocation73_spill] sm:$0xff] %v5704_v42  ;;  %v1852_v45 = vpop.f32.mrb[50].mxu1  ;;  %2519 = vrot.lane.b32.xlu1 %v5567_v61, %s4769_s22  ;;  %v5708_v51 = vpop.f32.mrb[51].mxu0 }
 0x283   : > { %6515 = vst [vmem:[#allocation74_spill] sm:$0xff] %v5708_v51  ;;  %v4301_v63 = vpack.c.bf16 %v1852_v45, %v1848_v9  ;;  %v1854_v10 = vpop.f32.mrb[51].mxu1  ;;  %v5738_v51 = vunpack.c.l.bf16 %v3975_v54 }
 0x284   : > { %v4341_v6 = vpack.c.bf16 %v1854_v10, %v1850_v40  ;;  %2167 = vrot.lane.b32.xlu0 %v5579_v26, %s4769_s22 }
 0x285   : > { %4421 = vst [vmem:[%s5638_s29 + $0x20] sm:$0xff] %v4301_v63  }
 0x286   : > { %4429 = vst [vmem:[%s5638_s29 + $0x60] sm:$0xff] %v4341_v6   ;;  %1993 = vrot.lane.b32.xlu1 %v5583_v20, %s4769_s22 }
 0x287   : > { %v5716_v31 = vpop.f32.mrb[52].mxu0 }
 0x288   : > { %6516 = vst [vmem:[#allocation75_spill] sm:$0xff] %v5716_v31  ;;  %v1858_v61 = vpop.f32.mrb[52].mxu1  ;;  %2521 = vrot.lane.b32.xlu0 %v5581_v15, %s4769_s22  ;;  %v5720_v9 = vpop.f32.mrb[53].mxu0  ;;  %v4007_v15 = vld [vmem:[%s5080_s24] sm:$0xff]  }
 0x289   : > { %6517 = vst [vmem:[#allocation76_spill] sm:$0xff] %v5720_v9  ;;  %v1860_v40 = vpop.f32.mrb[53].mxu1  ;;  %v5722_v45 = vpop.f32.mrb[54].mxu0 }
 0x28a   : > { %6518 = vst [vmem:[#allocation77_spill] sm:$0xff] %v5722_v45  ;;  %v1862_v63 = vpop.f32.mrb[54].mxu1  ;;  %2346 = vrot.lane.b32.xlu1 %v5585_v35, %s4769_s22  ;;  %v5726_v6 = vpop.f32.mrb[55].mxu0 }
 0x28b   : > { %6519 = vst [vmem:[#allocation78_spill] sm:$0xff] %v5726_v6  ;;  %v4306_v10 = vpack.c.bf16 %v1862_v63, %v1858_v61  ;;  %v1864_v26 = vpop.f32.mrb[55].mxu1 }
 0x28c   : > { %v4346_v20 = vpack.c.bf16 %v1864_v26, %v1860_v40  ;;  %1995 = vrot.lane.b32.xlu0 %v5597_v18, %s4769_s22  ;;  %v5744_v26 = vunpack.c.l.bf16 %v4007_v15  ;;  %v5746_v40 = vunpack.c.h.bf16 %v3975_v54  ;;  %v1951_v54 = vmul.f32 %v5738_v51, %v5429_v46 }
 0x28d   : > { %4422 = vst [vmem:[%s5638_s29 + $0x28] sm:$0xff] %v4306_v10   ;;  %v5750_v10 = vunpack.c.h.bf16 %v4007_v15 }
 0x28e   : > { %4430 = vst [vmem:[%s5638_s29 + $0x68] sm:$0xff] %v4346_v20   ;;  %2169 = vrot.lane.b32.xlu1 %v5589_v44, %s4769_s22  ;;  %v1952_v15 = vmul.f32 %v5746_v40, %v5439_v57  ;;  %v2305_v57 = vmul.f32 %v5746_v40, %v5441_v8 }
 0x28f   : > { %v5736_v45 = vpop.f32.mrb[56].mxu0 }
 0x290   : > { %6520 = vst [vmem:[#allocation79_spill] sm:$0xff] %v5736_v45  ;;  %v1868_v35 = vpop.f32.mrb[56].mxu1  ;;  %2348 = vrot.lane.b32.xlu0 %v5599_v21, %s4769_s22  ;;  %v5742_v61 = vpop.f32.mrb[57].mxu0 }
 0x291   : > { %6521 = vst [vmem:[#allocation80_spill] sm:$0xff] %v5742_v61  ;;  %v1870_v63 = vpop.f32.mrb[57].mxu1  ;;  %v5748_v20 = vpop.f32.mrb[58].mxu0 }
 0x292   : > { %6522 = vst [vmem:[#allocation81_spill] sm:$0xff] %v5748_v20  ;;  %v1872_v18 = vpop.f32.mrb[58].mxu1  ;;  %2523 = vrot.lane.b32.xlu1 %v5591_v1, %s4769_s22  ;;  %v5754_v44 = vpop.f32.mrb[59].mxu0 }
 0x293   : > { %6523 = vst [vmem:[#allocation82_spill] sm:$0xff] %v5754_v44  ;;  %v4311_v21 = vpack.c.bf16 %v1872_v18, %v1868_v35  ;;  %v1874_v6 = vpop.f32.mrb[59].mxu1  ;;  %v1968_v61 = vpop.permute.xlu0 %1967 }
 0x294   : > { %v4351_v45 = vpack.c.bf16 %v1874_v6, %v1870_v63  ;;  %v1999_v9 = vmul.f32 %v5744_v26, %v1968_v61  ;;  %v1970_v42 = vpop.permute.xlu1 %1969  ;;  %2171 = vrot.lane.b32.xlu0 %v5603_v59, %s4769_s22  ;;  %v2304_v61 = vmul.f32 %v5738_v51, %v5431_v48 }
 0x295   : > { %4423 = vst [vmem:[%s5638_s29 + $0x30] sm:$0xff] %v4311_v21   ;;  %v2000_v1 = vmul.f32 %v5750_v10, %v1970_v42 }
 0x296   : > { %4431 = vst [vmem:[%s5638_s29 + $0x70] sm:$0xff] %v4351_v45   ;;  %v2015_v35 = vadd.f32 %v1999_v9, %v1951_v54  ;;  %1997 = vrot.lane.b32.xlu1 %v5607_v34, %s4769_s22 }
 0x297   : > { %v2016_v18 = vadd.f32 %v2000_v1, %v1952_v15  ;;  %v2321_v46 = vpop.permute.xlu0 %2320  ;;  %v5768_v6 = vpop.f32.mrb[60].mxu0 }
 0x298   : > { %6524 = vst [vmem:[#allocation83_spill] sm:$0xff] %v5768_v6  ;;  %v2352_v63 = vmul.f32 %v5744_v26, %v2321_v46  ;;  %v1878_v59 = vpop.f32.mrb[60].mxu1  ;;  %v2323_v44 = vpop.permute.xlu1 %2322  ;;  %2525 = vrot.lane.b32.xlu0 %v5605_v0, %s4769_s22  ;;  %v2031_v21 = vmul.f32 0.088388346, %v2015_v35 }
 0x299   : > { %v2032_v42 = vmul.f32 0.088388346, %v2016_v18  ;;  %v2353_v1 = vmul.f32 %v5750_v10, %v2323_v44  ;;  %v1880_v9 = vpop.f32.mrb[61].mxu1  ;;  %v5778_v45 = vpop.f32.mrb[61].mxu0  ;;  %v2127_v44 = vmul.f32 %v5738_v51, %v5437_v17  ;;  %v2128_v18 = vmul.f32 %v5746_v40, %v5447_v11 }
 0x29a   : > { %6525 = vst [vmem:[#allocation84_spill] sm:$0xff] %v5778_v45  ;;  %v2368_v54 = vadd.f32 %v2352_v63, %v2304_v61  ;;  %v5780_v48 = vpop.f32.mrb[62].mxu0  ;;  %v1882_v15 = vpop.f32.mrb[62].mxu1  ;;  %2350 = vrot.lane.b32.xlu1 %v5609_v47, %s4769_s22 }
 0x29b   : > { %6526 = vst [vmem:[#allocation85_spill] sm:$0xff] %v5780_v48  ;;  %v4041_v46 = vpack.c.bf16 %v2032_v42, %v2031_v21  ;;  %v2369_v0 = vadd.f32 %v2353_v1, %v2305_v57  ;;  %v4316_v34 = vpack.c.bf16 %v1882_v15, %v1878_v59  ;;  %v1884_v8 = vpop.f32.mrb[63].mxu1  ;;  %v5784_v35 = vpop.f32.mrb[63].mxu0  ;;  %v4358_v21 = vld [vmem:[%s5074_s18 + $0x8] sm:$0xff]   ;;  %v2481_v15 = vmul.f32 %v5738_v51, %v5433_v60 }
 0x29c   : > { %6527 = vst [vmem:[#allocation86_spill] sm:$0xff] %v5784_v35  ;;  %v4356_v61 = vpack.c.bf16 %v1884_v8, %v1880_v9  ;;  %v2144_v63 = vpop.permute.xlu0 %2143  ;;  %v2146_v48 = vpop.permute.xlu1 %2145  ;;  %2674 = vrot.lane.b32.xlu0 %v5621_v55, %s4769_s22  ;;  %v2384_v59 = vmul.f32 0.088388346, %v2368_v54 }
 0x29d   : > { %4042 = vst [vmem:[%s5794_s1] sm:$0xff] %v4041_v46   ;;  %v2385_v57 = vmul.f32 0.088388346, %v2369_v0  ;;  %4424 = vst [vmem:[%s5638_s29 + $0x38] sm:$0xff] %v4316_v34   ;;  %v2175_v17 = vmul.f32 %v5744_v26, %v2144_v63  ;;  %v2176_v11 = vmul.f32 %v5750_v10, %v2146_v48  ;;  %v2482_v0 = vmul.f32 %v5746_v40, %v5443_v33  ;;  %v4365_v48 = vld [vmem:[%s5080_s24 + $0x8] sm:$0xff]  }
 0x29e   : > { %4432 = vst [vmem:[%s5638_s29 + $0x78] sm:$0xff] %v4356_v61   ;;  %2173 = vrot.lane.b32.xlu1 %v5613_v49, %s4769_s22 }
 0x29f   : > { %v4121_v42 = vpack.c.bf16 %v2385_v57, %v2384_v59  ;;  %v2191_v1 = vadd.f32 %v2175_v17, %v2127_v44  ;;  %v2192_v9 = vadd.f32 %v2176_v11, %v2128_v18  ;;  %v5814_v18 = vunpack.c.l.bf16 %v4358_v21 }
 0x2a0   : > { %v2498_v54 = vpop.permute.xlu0 %2497  ;;  %v2500_v34 = vpop.permute.xlu1 %2499  ;;  %2834 = vrot.lane.b32.xlu0 %v5626_v53, %s4769_s22  ;;  %v5818_v59 = vunpack.c.l.bf16 %v4365_v48  ;;  %v5820_v57 = vunpack.c.h.bf16 %v4358_v21 }
 0x2a1   : > { %4387 = vst [vmem:[%s5794_s1 + $0x80] sm:$0xff] %v4121_v42   ;;  %v2207_v46 = vmul.f32 0.088388346, %v2191_v1  ;;  %v2208_v8 = vmul.f32 0.088388346, %v2192_v9  ;;  %v2529_v61 = vmul.f32 %v5744_v26, %v2498_v54  ;;  %v2530_v44 = vmul.f32 %v5750_v10, %v2500_v34 }
 0x2a2   : > { %2527 = vrot.lane.b32.xlu1 %v5615_v27, %s4769_s22  ;;  %v5826_v54 = vunpack.c.h.bf16 %v4365_v48  ;;  %v1953_v21 = vmul.f32 %v5814_v18, %v5453_v39  ;;  %v2306_v39 = vmul.f32 %v5814_v18, %v5455_v50 }
 0x2a3   : > { %v4081_v60 = vpack.c.bf16 %v2208_v8, %v2207_v46  ;;  %v2545_v33 = vadd.f32 %v2529_v61, %v2481_v15  ;;  %v2546_v63 = vadd.f32 %v2530_v44, %v2482_v0  ;;  %v1954_v8 = vmul.f32 %v5820_v57, %v5463_v38 }
 0x2a4   : > { %v2325_v17 = vpop.permute.xlu0 %2324  ;;  %v1972_v11 = vpop.permute.xlu1 %1971  ;;  %2678 = vrot.lane.b32.xlu0 %v5644_v3, %s4769_s22 }
 0x2a5   : > { %4379 = vst [vmem:[%s5794_s1 + $0x40] sm:$0xff] %v4081_v60   ;;  %v2561_v42 = vmul.f32 0.088388346, %v2545_v33  ;;  %v2562_v1 = vmul.f32 0.088388346, %v2546_v63  ;;  %v2001_v9 = vmul.f32 %v5818_v59, %v1972_v11  ;;  %v2354_v0 = vmul.f32 %v5818_v59, %v2325_v17 }
 0x2a6   : > { %2676 = vrot.lane.b32.xlu1 %v5628_v58, %s4769_s22  ;;  %v2307_v60 = vmul.f32 %v5820_v57, %v5465_v37  ;;  %v2129_v37 = vmul.f32 %v5814_v18, %v5461_v36 }
 0x2a7   : > { %v4161_v15 = vpack.c.bf16 %v2562_v1, %v2561_v42  ;;  %v2017_v48 = vadd.f32 %v2001_v9, %v1953_v21  ;;  %v2370_v33 = vadd.f32 %v2354_v0, %v2306_v39  ;;  %v4366_v1 = vld [vmem:[%s5080_s24 + $0x10] sm:$0xff]   ;;  %v2130_v0 = vmul.f32 %v5820_v57, %v5471_v22 }
 0x2a8   : > { %v2148_v34 = vpop.permute.xlu0 %2147  ;;  %v1974_v46 = vpop.permute.xlu1 %1973  ;;  %2838 = vrot.lane.b32.xlu0 %v5648_v30, %s4769_s22  ;;  %v4359_v9 = vld [vmem:[%s5074_s18 + $0x10] sm:$0xff]   ;;  %v2483_v22 = vmul.f32 %v5814_v18, %v5459_v29 }
 0x2a9   : > { %4395 = vst [vmem:[%s5794_s1 + $0xc0] sm:$0xff] %v4161_v15   ;;  %v2002_v61 = vmul.f32 %v5826_v54, %v1974_v46  ;;  %v2033_v38 = vmul.f32 0.088388346, %v2017_v48  ;;  %v2177_v11 = vmul.f32 %v5818_v59, %v2148_v34  ;;  %v2386_v46 = vmul.f32 0.088388346, %v2370_v33 }
 0x2aa   : > { %2836 = vrot.lane.b32.xlu1 %v5632_v52, %s4769_s22 }
 0x2ab   : > { %v2018_v44 = vadd.f32 %v2002_v61, %v1954_v8  ;;  %v5857_v8 = vunpack.c.l.bf16 %v4366_v1  ;;  %v2193_v61 = vadd.f32 %v2177_v11, %v2129_v37  ;;  %v5872_v11 = vunpack.c.h.bf16 %v4359_v9 }
 0x2ac   : > { %v2502_v63 = vpop.permute.xlu0 %2501  ;;  %v2327_v17 = vpop.permute.xlu1 %2326  ;;  %2682 = vrot.lane.b32.xlu0 %v5662_v19, %s4769_s22  ;;  %v5877_v37 = vunpack.c.h.bf16 %v4366_v1 }
 0x2ad   : > { %v2034_v42 = vmul.f32 0.088388346, %v2018_v44  ;;  %v2355_v50 = vmul.f32 %v5826_v54, %v2327_v17  ;;  %v2531_v39 = vmul.f32 %v5818_v59, %v2502_v63 }
 0x2ae   : > { %2680 = vrot.lane.b32.xlu1 %v5650_v25, %s4769_s22 }
 0x2af   : > { %v4046_v21 = vpack.c.bf16 %v2034_v42, %v2033_v38  ;;  %v2371_v15 = vadd.f32 %v2355_v50, %v2307_v60  ;;  %v5864_v60 = vunpack.c.l.bf16 %v4359_v9  ;;  %v2484_v38 = vmul.f32 %v5820_v57, %v5469_v16 }
 0x2b0   : > { %v1976_v34 = vpop.permute.xlu0 %1975  ;;  %v2150_v48 = vpop.permute.xlu1 %2149  ;;  %2842 = vrot.lane.b32.xlu0 %v5666_v14, %s4769_s22 }
 0x2b1   : > { %4372 = vst [vmem:[%s5794_s1 + $0x8] sm:$0xff] %v4046_v21   ;;  %v2387_v44 = vmul.f32 0.088388346, %v2371_v15  ;;  %v2178_v36 = vmul.f32 %v5826_v54, %v2150_v48  ;;  %v2003_v63 = vmul.f32 %v5857_v8, %v1976_v34  ;;  %v2209_v21 = vmul.f32 0.088388346, %v2193_v61 }
 0x2b2   : > { %2840 = vrot.lane.b32.xlu1 %v5654_v2, %s4769_s22  ;;  %v2547_v15 = vadd.f32 %v2531_v39, %v2483_v22  ;;  %v1955_v16 = vmul.f32 %v5864_v60, %v5477_v28  ;;  %v1956_v34 = vmul.f32 %v5872_v11, %v5487_v62  ;;  %v2308_v62 = vmul.f32 %v5864_v60, %v5479_v5 }
 0x2b3   : > { %v4126_v33 = vpack.c.bf16 %v2387_v44, %v2386_v46  ;;  %v2194_v17 = vadd.f32 %v2178_v36, %v2130_v0 }
 0x2b4   : > { %v2329_v42 = vpop.permute.xlu0 %2328  ;;  %v2504_v50 = vpop.permute.xlu1 %2503  ;;  %2686 = vrot.lane.b32.xlu0 %v5680_v12, %s4769_s22  ;;  %v2019_v1 = vadd.f32 %v2003_v63, %v1955_v16  ;;  %v2563_v61 = vmul.f32 0.088388346, %v2547_v15 }
 0x2b5   : > { %4388 = vst [vmem:[%s5794_s1 + $0x88] sm:$0xff] %v4126_v33   ;;  %v2210_v29 = vmul.f32 0.088388346, %v2194_v17  ;;  %v2532_v0 = vmul.f32 %v5826_v54, %v2504_v50  ;;  %v2356_v39 = vmul.f32 %v5857_v8, %v2329_v42  ;;  %v2309_v17 = vmul.f32 %v5872_v11, %v5489_v24 }
 0x2b6   : > { %2684 = vrot.lane.b32.xlu1 %v5668_v23, %s4769_s22  ;;  %v2131_v24 = vmul.f32 %v5864_v60, %v5485_v32 }
 0x2b7   : > { %v4086_v9 = vpack.c.bf16 %v2210_v29, %v2209_v21  ;;  %v2548_v46 = vadd.f32 %v2532_v0, %v2484_v38  ;;  %v2035_v38 = vmul.f32 0.088388346, %v2019_v1  ;;  %v2372_v42 = vadd.f32 %v2356_v39, %v2308_v62  ;;  %v4367_v29 = vld [vmem:[%s5080_s24 + $0x18] sm:$0xff]   ;;  %v6529_v62 = vld [vmem:[#allocation31_spill] sm:$0xff] }
 0x2b8   : > { %v2152_v48 = vpop.permute.xlu0 %2151  ;;  %v1978_v44 = vpop.permute.xlu1 %1977  ;;  %2846 = vrot.lane.b32.xlu0 %v5684_v56, %s4769_s22 }
 0x2b9   : > { %4380 = vst [vmem:[%s5794_s1 + $0x48] sm:$0xff] %v4086_v9   ;;  %v2564_v28 = vmul.f32 0.088388346, %v2548_v46  ;;  %v2004_v36 = vmul.f32 %v5877_v37, %v1978_v44  ;;  %v2179_v21 = vmul.f32 %v5857_v8, %v2152_v48  ;;  %v6528_v9 = vld [vmem:[#allocation32_spill] sm:$0xff]  ;;  %v5912_v48 = vunpack.c.l.bf16 %v4367_v29 }
 0x2ba   : > { %2844 = vrot.lane.b32.xlu1 %v5672_v41, %s4769_s22  ;;  %v2132_v46 = vmul.f32 %v5872_v11, %v6528_v9  ;;  %v2388_v39 = vmul.f32 0.088388346, %v2372_v42 }
 0x2bb   : > { %v4166_v22 = vpack.c.bf16 %v2564_v28, %v2563_v61  ;;  %v2020_v33 = vadd.f32 %v2004_v36, %v1956_v34  ;;  %v4360_v34 = vld [vmem:[%s5074_s18 + $0x18] sm:$0xff]   ;;  %v2195_v28 = vadd.f32 %v2179_v21, %v2131_v24  ;;  %v5930_v24 = vunpack.c.h.bf16 %v4367_v29 }
 0x2bc   : > { %v2506_v63 = vpop.permute.xlu0 %2505  ;;  %v2331_v50 = vpop.permute.xlu1 %2330  ;;  %2690 = vrot.lane.b32.xlu0 %v5698_v43, %s4769_s22  ;;  %v5926_v42 = vunpack.c.h.bf16 %v4360_v34 }
 0x2bd   : > { %4396 = vst [vmem:[%s5794_s1 + $0xc8] sm:$0xff] %v4166_v22   ;;  %v2036_v15 = vmul.f32 0.088388346, %v2020_v33  ;;  %v2357_v5 = vmul.f32 %v5877_v37, %v2331_v50  ;;  %v2533_v1 = vmul.f32 %v5857_v8, %v2506_v63  ;;  %v2485_v22 = vmul.f32 %v5864_v60, %v6529_v62  ;;  %v6530_v63 = vld [vmem:[#allocation33_spill] sm:$0xff] }
 0x2be   : > { %2688 = vrot.lane.b32.xlu1 %v5686_v4, %s4769_s22  ;;  %v5922_v33 = vunpack.c.l.bf16 %v4360_v34  ;;  %v2486_v50 = vmul.f32 %v5872_v11, %v6530_v63  ;;  %v6532_v34 = vld [vmem:[#allocation34_spill] sm:$0xff] }
 0x2bf   : > { %v4051_v0 = vpack.c.bf16 %v2036_v15, %v2035_v38  ;;  %v2373_v16 = vadd.f32 %v2357_v5, %v2309_v17  ;;  %v2549_v21 = vadd.f32 %v2533_v1, %v2485_v22 }
 0x2c0   : > { %v1980_v44 = vpop.permute.xlu0 %1979  ;;  %v2154_v61 = vpop.permute.xlu1 %2153  ;;  %2850 = vrot.lane.b32.xlu0 %v5702_v13, %s4769_s22  ;;  %v1957_v1 = vmul.f32 %v5922_v33, %v6532_v34  ;;  %v6537_v34 = vld [vmem:[#allocation39_spill] sm:$0xff]  ;;  %v6546_v13 = vld [vmem:[#allocation41_spill] sm:$0xff] }
 0x2c1   : > { %4373 = vst [vmem:[%s5794_s1 + $0x10] sm:$0xff] %v4051_v0   ;;  %v2389_v32 = vmul.f32 0.088388346, %v2373_v16  ;;  %v2180_v36 = vmul.f32 %v5877_v37, %v2154_v61  ;;  %v2211_v0 = vmul.f32 0.088388346, %v2195_v28  ;;  %v2005_v16 = vmul.f32 %v5912_v48, %v1980_v44  ;;  %v6531_v61 = vld [vmem:[#allocation73_spill] sm:$0xff] }
 0x2c2   : > { %2848 = vrot.lane.b32.xlu1 %v5690_v7, %s4769_s22  ;;  %v2565_v62 = vmul.f32 0.088388346, %v2549_v21 }
 0x2c3   : > { %v4131_v17 = vpack.c.bf16 %v2389_v32, %v2388_v39  ;;  %v2196_v38 = vadd.f32 %v2180_v36, %v2132_v46  ;;  %v6533_v36 = vld [vmem:[#allocation38_spill] sm:$0xff]  ;;  %v2021_v44 = vadd.f32 %v2005_v16, %v1957_v1 }
 0x2c4   : > { %v2333_v15 = vpop.permute.xlu0 %2332  ;;  %v2508_v5 = vpop.permute.xlu1 %2507  ;;  %2694 = vrot.lane.b32.xlu0 %v5716_v31, %s4769_s22  ;;  %v1958_v29 = vmul.f32 %v5926_v42, %v6533_v36  ;;  %v2311_v36 = vmul.f32 %v5926_v42, %v6537_v34  ;;  %v6541_v31 = vld [vmem:[#allocation40_spill] sm:$0xff] }
 0x2c5   : > { %4389 = vst [vmem:[%s5794_s1 + $0x90] sm:$0xff] %v4131_v17   ;;  %v2212_v9 = vmul.f32 0.088388346, %v2196_v38  ;;  %v2534_v46 = vmul.f32 %v5877_v37, %v2508_v5  ;;  %v6534_v17 = vld [vmem:[#allocation76_spill] sm:$0xff]  ;;  %v2358_v38 = vmul.f32 %v5912_v48, %v2333_v15 }
 0x2c6   : > { %2692 = vrot.lane.b32.xlu1 %v6531_v61, %s4769_s22 }
 0x2c7   : > { %v4091_v39 = vpack.c.bf16 %v2212_v9, %v2211_v0  ;;  %v2550_v32 = vadd.f32 %v2534_v46, %v2486_v50  ;;  %v6535_v50 = vld [vmem:[#allocation74_spill] sm:$0xff]  ;;  %v6536_v0 = vld [vmem:[#allocation35_spill] sm:$0xff] }
 0x2c8   : > { %v2156_v22 = vpop.permute.xlu0 %2155  ;;  %v1982_v28 = vpop.permute.xlu1 %1981  ;;  %2854 = vrot.lane.b32.xlu0 %v6534_v17, %s4769_s22  ;;  %v2310_v21 = vmul.f32 %v5922_v33, %v6536_v0 }
 0x2c9   : > { %4381 = vst [vmem:[%s5794_s1 + $0x50] sm:$0xff] %v4091_v39   ;;  %v2566_v63 = vmul.f32 0.088388346, %v2550_v32  ;;  %v2006_v5 = vmul.f32 %v5930_v24, %v1982_v28  ;;  %v2181_v16 = vmul.f32 %v5912_v48, %v2156_v22  ;;  %v6538_v39 = vld [vmem:[#allocation79_spill] sm:$0xff]  ;;  %v2037_v32 = vmul.f32 0.088388346, %v2021_v44 }
 0x2ca   : > { %2852 = vrot.lane.b32.xlu1 %v6535_v50, %s4769_s22  ;;  %v2374_v28 = vadd.f32 %v2358_v38, %v2310_v21  ;;  %v2134_v50 = vmul.f32 %v5926_v42, %v6541_v31  ;;  %v6544_v31 = vld [vmem:[#allocation36_spill] sm:$0xff] }
 0x2cb   : > { %v4171_v9 = vpack.c.bf16 %v2566_v63, %v2565_v62  ;;  %v2022_v46 = vadd.f32 %v2006_v5, %v1958_v29  ;;  %v4368_v62 = vld [vmem:[%s5080_s24 + $0x20] sm:$0xff]   ;;  %v6539_v29 = vld [vmem:[#allocation37_spill] sm:$0xff] }
 0x2cc   : > { %v2510_v1 = vpop.permute.xlu0 %2509  ;;  %v2335_v15 = vpop.permute.xlu1 %2334  ;;  %2698 = vrot.lane.b32.xlu0 %v6538_v39, %s4769_s22  ;;  %v2133_v63 = vmul.f32 %v5922_v33, %v6539_v29  ;;  %v6540_v5 = vld [vmem:[#allocation77_spill] sm:$0xff]  ;;  %v4361_v39 = vld [vmem:[%s5074_s18 + $0x20] sm:$0xff]   ;;  %v5965_v38 = vunpack.c.l.bf16 %v4368_v62 }
 0x2cd   : > { %4397 = vst [vmem:[%s5794_s1 + $0xd0] sm:$0xff] %v4171_v9   ;;  %v2038_v17 = vmul.f32 0.088388346, %v2022_v46  ;;  %v2359_v0 = vmul.f32 %v5930_v24, %v2335_v15  ;;  %v6542_v46 = vld [vmem:[#allocation80_spill] sm:$0xff]  ;;  %v2390_v15 = vmul.f32 0.088388346, %v2374_v28  ;;  %v2535_v29 = vmul.f32 %v5912_v48, %v2510_v1 }
 0x2ce   : > { %2696 = vrot.lane.b32.xlu1 %v6540_v5, %s4769_s22  ;;  %v2197_v44 = vadd.f32 %v2181_v16, %v2133_v63  ;;  %v2487_v16 = vmul.f32 %v5922_v33, %v6544_v31  ;;  %v2488_v28 = vmul.f32 %v5926_v42, %v6546_v13  ;;  %v6549_v13 = vld [vmem:[#allocation42_spill] sm:$0xff] }
 0x2cf   : > { %v4056_v22 = vpack.c.bf16 %v2038_v17, %v2037_v32  ;;  %v2375_v34 = vadd.f32 %v2359_v0, %v2311_v36  ;;  %v6543_v36 = vld [vmem:[#allocation78_spill] sm:$0xff]  ;;  %v5976_v32 = vunpack.c.l.bf16 %v4361_v39 }
 0x2d0   : > { %v1984_v21 = vpop.permute.xlu0 %1983  ;;  %v2158_v9 = vpop.permute.xlu1 %2157  ;;  %2858 = vrot.lane.b32.xlu0 %v6542_v46, %s4769_s22  ;;  %v2213_v1 = vmul.f32 0.088388346, %v2197_v44 }
 0x2d1   : > { %4374 = vst [vmem:[%s5794_s1 + $0x18] sm:$0xff] %v4056_v22   ;;  %v2391_v5 = vmul.f32 0.088388346, %v2375_v34  ;;  %v2182_v17 = vmul.f32 %v5930_v24, %v2158_v9  ;;  %6545 = vst [vmem:[#allocation32_spill] sm:$0xff] %v5976_v32  ;;  %v5980_v22 = vunpack.c.h.bf16 %v4361_v39  ;;  %v5984_v9 = vunpack.c.h.bf16 %v4368_v62 }
 0x2d2   : > { %2856 = vrot.lane.b32.xlu1 %v6543_v36, %s4769_s22  ;;  %v2551_v36 = vadd.f32 %v2535_v29, %v2487_v16  ;;  %v2007_v31 = vmul.f32 %v5965_v38, %v1984_v21  ;;  %v1959_v39 = vmul.f32 %v5976_v32, %v6549_v13 }
 0x2d3   : > { %v4136_v0 = vpack.c.bf16 %v2391_v5, %v2390_v15  ;;  %v2198_v63 = vadd.f32 %v2182_v17, %v2134_v50  ;;  %6547 = vst [vmem:[#allocation31_spill] sm:$0xff] %v5980_v22  ;;  %6548 = vst [vmem:[#allocation33_spill] sm:$0xff] %v5984_v9  ;;  %v6550_v17 = vld [vmem:[#allocation46_spill] sm:$0xff] }
 0x2d4   : > { %v2337_v46 = vpop.permute.xlu0 %2336  ;;  %v2512_v34 = vpop.permute.xlu1 %2511  ;;  %2702 = vrot.lane.b32.xlu0 %v5768_v6, %s4769_s22  ;;  %v1960_v62 = vmul.f32 %v5980_v22, %v6550_v17  ;;  %v2567_v21 = vmul.f32 0.088388346, %v2551_v36  ;;  %v6553_v17 = vld [vmem:[#allocation47_spill] sm:$0xff] }
 0x2d5   : > { %4390 = vst [vmem:[%s5794_s1 + $0x98] sm:$0xff] %v4136_v0   ;;  %v2214_v5 = vmul.f32 0.088388346, %v2198_v63  ;;  %v2536_v50 = vmul.f32 %v5930_v24, %v2512_v34  ;;  %v2360_v29 = vmul.f32 %v5965_v38, %v2337_v46  ;;  %v2023_v63 = vadd.f32 %v2007_v31, %v1959_v39 }
 0x2d6   : > { %2700 = vrot.lane.b32.xlu1 %v5748_v20, %s4769_s22  ;;  %v2313_v6 = vmul.f32 %v5980_v22, %v6553_v17  ;;  %v6554_v20 = vld [vmem:[#allocation85_spill] sm:$0xff] }
 0x2d7   : > { %v4096_v44 = vpack.c.bf16 %v2214_v5, %v2213_v1  ;;  %v2552_v15 = vadd.f32 %v2536_v50, %v2488_v28  ;;  %v6551_v1 = vld [vmem:[#allocation43_spill] sm:$0xff]  ;;  %v6552_v5 = vld [vmem:[#allocation82_spill] sm:$0xff]  ;;  %v2039_v39 = vmul.f32 0.088388346, %v2023_v63 }
 0x2d8   : > { %v2160_v16 = vpop.permute.xlu0 %2159  ;;  %v1986_v0 = vpop.permute.xlu1 %1985  ;;  %2862 = vrot.lane.b32.xlu0 %v5778_v45, %s4769_s22  ;;  %v2312_v28 = vmul.f32 %v5976_v32, %v6551_v1  ;;  %v4369_v1 = vld [vmem:[%s5080_s24 + $0x28] sm:$0xff]  }
 0x2d9   : > { %4382 = vst [vmem:[%s5794_s1 + $0x58] sm:$0xff] %v4096_v44   ;;  %v2568_v34 = vmul.f32 0.088388346, %v2552_v15  ;;  %v2008_v13 = vmul.f32 %v5984_v9, %v1986_v0  ;;  %v2183_v44 = vmul.f32 %v5965_v38, %v2160_v16  ;;  %v6017_v17 = vunpack.c.l.bf16 %v4369_v1 }
 0x2da   : > { %2860 = vrot.lane.b32.xlu1 %v6552_v5, %s4769_s22  ;;  %v2376_v45 = vadd.f32 %v2360_v29, %v2312_v28  ;;  %v6556_v28 = vld [vmem:[#allocation48_spill] sm:$0xff] }
 0x2db   : > { %v4176_v46 = vpack.c.bf16 %v2568_v34, %v2567_v21  ;;  %v2024_v50 = vadd.f32 %v2008_v13, %v1960_v62  ;;  %v6555_v21 = vld [vmem:[#allocation44_spill] sm:$0xff]  ;;  %v2136_v63 = vmul.f32 %v5980_v22, %v6556_v28  ;;  %6557 = vst [vmem:[#allocation34_spill] sm:$0xff] %v6017_v17  ;;  %v6033_v28 = vunpack.c.h.bf16 %v4369_v1 }
 0x2dc   : > { %v2514_v36 = vpop.permute.xlu0 %2513  ;;  %v2339_v31 = vpop.permute.xlu1 %2338  ;;  %v2135_v62 = vmul.f32 %v5976_v32, %v6555_v21  ;;  %v4362_v34 = vld [vmem:[%s5074_s18 + $0x28] sm:$0xff]  }
 0x2dd   : > { %4398 = vst [vmem:[%s5794_s1 + $0xd8] sm:$0xff] %v4176_v46   ;;  %v2040_v15 = vmul.f32 0.088388346, %v2024_v50  ;;  %v2361_v0 = vmul.f32 %v5984_v9, %v2339_v31  ;;  %v2392_v46 = vmul.f32 0.088388346, %v2376_v45  ;;  %v2537_v31 = vmul.f32 %v5965_v38, %v2514_v36  ;;  %6562 = vst [vmem:[#allocation39_spill] sm:$0xff] %v6033_v28 }
 0x2de   : > { %2704 = vrot.lane.b32.xlu1 %v6554_v20, %s4769_s22  ;;  %v2199_v5 = vadd.f32 %v2183_v44, %v2135_v62  ;;  %v6022_v21 = vunpack.c.l.bf16 %v4362_v34  ;;  %v6030_v62 = vunpack.c.h.bf16 %v4362_v34  ;;  %v6564_v34 = vld [vmem:[#allocation54_spill] sm:$0xff] }
 0x2df   : > { %v4061_v13 = vpack.c.bf16 %v2040_v15, %v2039_v39  ;;  %v2377_v29 = vadd.f32 %v2361_v0, %v2313_v6  ;;  %v6559_v6 = vld [vmem:[#allocation45_spill] sm:$0xff] }
 0x2e0   : > { %v1988_v16 = vpop.permute.xlu0 %1987  ;;  %v2162_v50 = vpop.permute.xlu1 %2161  ;;  %6558 = vst [vmem:[#allocation38_spill] sm:$0xff] %v6022_v21  ;;  %v2489_v45 = vmul.f32 %v5976_v32, %v6559_v6  ;;  %v6560_v0 = vld [vmem:[#allocation49_spill] sm:$0xff]  ;;  %6561 = vst [vmem:[#allocation35_spill] sm:$0xff] %v6030_v62 }
 0x2e1   : > { %4375 = vst [vmem:[%s5794_s1 + $0x20] sm:$0xff] %v4061_v13   ;;  %v2393_v20 = vmul.f32 0.088388346, %v2377_v29  ;;  %v2184_v61 = vmul.f32 %v5984_v9, %v2162_v50  ;;  %v2490_v44 = vmul.f32 %v5980_v22, %v6560_v0  ;;  %v2009_v36 = vmul.f32 %v6017_v17, %v1988_v16 }
 0x2e2   : > { %2864 = vrot.lane.b32.xlu1 %v5784_v35, %s4769_s22  ;;  %v2215_v50 = vmul.f32 0.088388346, %v2199_v5  ;;  %v2553_v43 = vadd.f32 %v2537_v31, %v2489_v45  ;;  %v1962_v0 = vmul.f32 %v6030_v62, %v6564_v34 }
 0x2e3   : > { %v4141_v39 = vpack.c.bf16 %v2393_v20, %v2392_v46  ;;  %v2200_v15 = vadd.f32 %v2184_v61, %v2136_v63  ;;  %v6563_v20 = vld [vmem:[#allocation50_spill] sm:$0xff] }
 0x2e4   : > { %v2341_v13 = vpop.permute.xlu0 %2340  ;;  %v2516_v29 = vpop.permute.xlu1 %2515  ;;  %v1961_v61 = vmul.f32 %v6022_v21, %v6563_v20  ;;  %v2569_v1 = vmul.f32 0.088388346, %v2553_v43 }
 0x2e5   : > { %4391 = vst [vmem:[%s5794_s1 + $0xa0] sm:$0xff] %v4141_v39   ;;  %v2216_v35 = vmul.f32 0.088388346, %v2200_v15  ;;  %v2538_v6 = vmul.f32 %v5984_v9, %v2516_v29  ;;  %v2362_v5 = vmul.f32 %v6017_v17, %v2341_v13  ;;  %v6565_v39 = vld [vmem:[#allocation51_spill] sm:$0xff] }
 0x2e6   : > { %v2025_v16 = vadd.f32 %v2009_v36, %v1961_v61  ;;  %v2314_v15 = vmul.f32 %v6022_v21, %v6565_v39  ;;  %v6566_v29 = vld [vmem:[#allocation55_spill] sm:$0xff] }
 0x2e7   : > { %v4101_v63 = vpack.c.bf16 %v2216_v35, %v2215_v50  ;;  %v2554_v46 = vadd.f32 %v2538_v6, %v2490_v44  ;;  %v2315_v36 = vmul.f32 %v6030_v62, %v6566_v29 }
 0x2e8   : > { %v2164_v22 = vpop.permute.xlu0 %2163  ;;  %v1990_v32 = vpop.permute.xlu1 %1989  ;;  %v2041_v50 = vmul.f32 0.088388346, %v2025_v16  ;;  %v2378_v43 = vadd.f32 %v2362_v5, %v2314_v15  ;;  %v4363_v16 = vld [vmem:[%s5074_s18 + $0x30] sm:$0xff]  }
 0x2e9   : > { %4383 = vst [vmem:[%s5794_s1 + $0x60] sm:$0xff] %v4101_v63   ;;  %v2570_v31 = vmul.f32 0.088388346, %v2554_v46  ;;  %v2010_v45 = vmul.f32 %v6033_v28, %v1990_v32  ;;  %v2185_v13 = vmul.f32 %v6017_v17, %v2164_v22  ;;  %v4370_v63 = vld [vmem:[%s5080_s24 + $0x30] sm:$0xff]   ;;  %v6567_v46 = vld [vmem:[#allocation52_spill] sm:$0xff] }
 0x2ea   : > { %v2137_v34 = vmul.f32 %v6022_v21, %v6567_v46  ;;  %v6058_v5 = vunpack.c.l.bf16 %v4370_v63  ;;  %v2394_v22 = vmul.f32 0.088388346, %v2378_v43  ;;  %v6569_v46 = vld [vmem:[#allocation53_spill] sm:$0xff] }
 0x2eb   : > { %v4181_v35 = vpack.c.bf16 %v2570_v31, %v2569_v1  ;;  %v2026_v44 = vadd.f32 %v2010_v45, %v1962_v0  ;;  %v6568_v31 = vld [vmem:[#allocation56_spill] sm:$0xff] }
 0x2ec   : > { %v2518_v6 = vpop.permute.xlu0 %2517  ;;  %v2343_v20 = vpop.permute.xlu1 %2342  ;;  %v2138_v45 = vmul.f32 %v6030_v62, %v6568_v31  ;;  %v6571_v31 = vld [vmem:[#allocation57_spill] sm:$0xff] }
 0x2ed   : > { %4399 = vst [vmem:[%s5794_s1 + $0xe0] sm:$0xff] %v4181_v35   ;;  %v2042_v61 = vmul.f32 0.088388346, %v2026_v44  ;;  %v2363_v32 = vmul.f32 %v6033_v28, %v2343_v20  ;;  %v2539_v39 = vmul.f32 %v6017_v17, %v2518_v6  ;;  %v2201_v44 = vadd.f32 %v2185_v13, %v2137_v34 }
 0x2ee   : > { %v2492_v6 = vmul.f32 %v6030_v62, %v6571_v31  ;;  %v6068_v17 = vunpack.c.h.bf16 %v4363_v16  ;;  %v6070_v34 = vunpack.c.h.bf16 %v4370_v63 }
 0x2ef   : > { %v4066_v1 = vpack.c.bf16 %v2042_v61, %v2041_v50  ;;  %v2379_v0 = vadd.f32 %v2363_v32, %v2315_v36  ;;  %v2491_v36 = vmul.f32 %v6022_v21, %v6569_v46  ;;  %v6064_v50 = vunpack.c.l.bf16 %v4363_v16  ;;  %v6574_v16 = vld [vmem:[#allocation62_spill] sm:$0xff] }
 0x2f0   : > { %v1992_v15 = vpop.permute.xlu0 %1991  ;;  %v2166_v35 = vpop.permute.xlu1 %2165  ;;  %6572 = vst [vmem:[#allocation40_spill] sm:$0xff] %v6068_v17 }
 0x2f1   : > { %4376 = vst [vmem:[%s5794_s1 + $0x28] sm:$0xff] %v4066_v1   ;;  %v2395_v29 = vmul.f32 0.088388346, %v2379_v0  ;;  %v2186_v20 = vmul.f32 %v6033_v28, %v2166_v35  ;;  %6570 = vst [vmem:[#allocation37_spill] sm:$0xff] %v6064_v50  ;;  %v2555_v9 = vadd.f32 %v2539_v39, %v2491_v36  ;;  %v2217_v1 = vmul.f32 0.088388346, %v2201_v44 }
 0x2f2   : > { %v2011_v0 = vmul.f32 %v6058_v5, %v1992_v15  ;;  %v1964_v39 = vmul.f32 %v6068_v17, %v6574_v16  ;;  %v4371_v16 = vld [vmem:[%s5080_s24 + $0x38] sm:$0xff]  }
 0x2f3   : > { %v4146_v61 = vpack.c.bf16 %v2395_v29, %v2394_v22  ;;  %v2202_v32 = vadd.f32 %v2186_v20, %v2138_v45  ;;  %v6573_v22 = vld [vmem:[#allocation58_spill] sm:$0xff]  ;;  %v2571_v36 = vmul.f32 0.088388346, %v2555_v9 }
 0x2f4   : > { %v2345_v43 = vpop.permute.xlu0 %2344  ;;  %v2520_v13 = vpop.permute.xlu1 %2519  ;;  %v1963_v45 = vmul.f32 %v6064_v50, %v6573_v22 }
 0x2f5   : > { %4392 = vst [vmem:[%s5794_s1 + $0xa8] sm:$0xff] %v4146_v61   ;;  %v2218_v35 = vmul.f32 0.088388346, %v2202_v32  ;;  %v2540_v46 = vmul.f32 %v6033_v28, %v2520_v13  ;;  %v2364_v15 = vmul.f32 %v6058_v5, %v2345_v43  ;;  %v6575_v32 = vld [vmem:[#allocation59_spill] sm:$0xff]  ;;  %v6095_v28 = vunpack.c.l.bf16 %v4371_v16 }
 0x2f6   : > { %v2027_v62 = vadd.f32 %v2011_v0, %v1963_v45  ;;  %v2316_v13 = vmul.f32 %v6064_v50, %v6575_v32 }
 0x2f7   : > { %v4106_v29 = vpack.c.bf16 %v2218_v35, %v2217_v1  ;;  %v2556_v20 = vadd.f32 %v2540_v46, %v2492_v6  ;;  %v6576_v35 = vld [vmem:[#allocation63_spill] sm:$0xff] }
 0x2f8   : > { %v2168_v31 = vpop.permute.xlu0 %2167  ;;  %v1994_v63 = vpop.permute.xlu1 %1993  ;;  %v2317_v9 = vmul.f32 %v6068_v17, %v6576_v35  ;;  %v2043_v45 = vmul.f32 0.088388346, %v2027_v62  ;;  %v4364_v35 = vld [vmem:[%s5074_s18 + $0x38] sm:$0xff]  }
 0x2f9   : > { %4384 = vst [vmem:[%s5794_s1 + $0x68] sm:$0xff] %v4106_v29   ;;  %v2572_v44 = vmul.f32 0.088388346, %v2556_v20  ;;  %v2012_v61 = vmul.f32 %v6070_v34, %v1994_v63  ;;  %v2187_v46 = vmul.f32 %v6058_v5, %v2168_v31  ;;  %v2380_v29 = vadd.f32 %v2364_v15, %v2316_v13  ;;  %v6577_v63 = vld [vmem:[#allocation60_spill] sm:$0xff] }
 0x2fb   : > { %v4186_v1 = vpack.c.bf16 %v2572_v44, %v2571_v36  ;;  %v2028_v6 = vadd.f32 %v2012_v61, %v1964_v39  ;;  %v2139_v36 = vmul.f32 %v6064_v50, %v6577_v63  ;;  %v6578_v61 = vld [vmem:[#allocation64_spill] sm:$0xff]  ;;  %v2396_v15 = vmul.f32 0.088388346, %v2380_v29 }
 0x2fc   : > { %v2522_v22 = vpop.permute.xlu0 %2521  ;;  %v2347_v0 = vpop.permute.xlu1 %2346  ;;  %v2140_v32 = vmul.f32 %v6068_v17, %v6578_v61 }
 0x2fd   : > { %4400 = vst [vmem:[%s5794_s1 + $0xe8] sm:$0xff] %v4186_v1   ;;  %v2044_v43 = vmul.f32 0.088388346, %v2028_v6  ;;  %v2365_v20 = vmul.f32 %v6070_v34, %v2347_v0  ;;  %v2203_v31 = vadd.f32 %v2187_v46, %v2139_v36  ;;  %v2541_v13 = vmul.f32 %v6058_v5, %v2522_v22  ;;  %v6579_v0 = vld [vmem:[#allocation61_spill] sm:$0xff] }
 0x2fe   : > { %v6580_v46 = vld [vmem:[#allocation65_spill] sm:$0xff]  ;;  %v6106_v36 = vunpack.c.h.bf16 %v4364_v35  ;;  %v6108_v22 = vunpack.c.h.bf16 %v4371_v16 }
 0x2ff   : > { %v4071_v44 = vpack.c.bf16 %v2044_v43, %v2043_v45  ;;  %v2381_v39 = vadd.f32 %v2365_v20, %v2317_v9  ;;  %v2493_v9 = vmul.f32 %v6064_v50, %v6579_v0  ;;  %v6102_v45 = vunpack.c.l.bf16 %v4364_v35  ;;  %v6582_v35 = vld [vmem:[#allocation70_spill] sm:$0xff] }
 0x300   : > { %v1996_v62 = vpop.permute.xlu0 %1995  ;;  %v2170_v21 = vpop.permute.xlu1 %2169  ;;  %v2494_v63 = vmul.f32 %v6068_v17, %v6580_v46  ;;  %v2219_v29 = vmul.f32 0.088388346, %v2203_v31  ;;  %v1966_v31 = vmul.f32 %v6106_v36, %v6582_v35 }
 0x301   : > { %4377 = vst [vmem:[%s5794_s1 + $0x30] sm:$0xff] %v4071_v44   ;;  %v2397_v1 = vmul.f32 0.088388346, %v2381_v39  ;;  %v2188_v6 = vmul.f32 %v6070_v34, %v2170_v21  ;;  %v2557_v39 = vadd.f32 %v2541_v13, %v2493_v9  ;;  %v2013_v21 = vmul.f32 %v6095_v28, %v1996_v62 }
 0x303   : > { %v4151_v43 = vpack.c.bf16 %v2397_v1, %v2396_v15  ;;  %v2204_v20 = vadd.f32 %v2188_v6, %v2140_v32  ;;  %v6581_v15 = vld [vmem:[#allocation66_spill] sm:$0xff]  ;;  %v2573_v13 = vmul.f32 0.088388346, %v2557_v39 }
 0x304   : > { %v2349_v61 = vpop.permute.xlu0 %2348  ;;  %v2524_v44 = vpop.permute.xlu1 %2523  ;;  %v1965_v32 = vmul.f32 %v6102_v45, %v6581_v15 }
 0x305   : > { %4393 = vst [vmem:[%s5794_s1 + $0xb0] sm:$0xff] %v4151_v43   ;;  %v2220_v0 = vmul.f32 0.088388346, %v2204_v20  ;;  %v2542_v50 = vmul.f32 %v6070_v34, %v2524_v44  ;;  %v2366_v46 = vmul.f32 %v6095_v28, %v2349_v61  ;;  %v6583_v20 = vld [vmem:[#allocation67_spill] sm:$0xff] }
 0x306   : > { %v2029_v9 = vadd.f32 %v2013_v21, %v1965_v32  ;;  %v2318_v44 = vmul.f32 %v6102_v45, %v6583_v20 }
 0x307   : > { %v4111_v1 = vpack.c.bf16 %v2220_v0, %v2219_v29  ;;  %v2558_v6 = vadd.f32 %v2542_v50, %v2494_v63  ;;  %v2319_v50 = vmul.f32 %v6106_v36, %v5609_v47 }
 0x308   : > { %v2172_v16 = vpop.permute.xlu0 %2171  ;;  %v1998_v17 = vpop.permute.xlu1 %1997  ;;  %v2382_v63 = vadd.f32 %v2366_v46, %v2318_v44  ;;  %v2045_v35 = vmul.f32 0.088388346, %v2029_v9  ;;  %v6585_v44 = vld [vmem:[#allocation69_spill] sm:$0xff] }
 0x309   : > { %4385 = vst [vmem:[%s5794_s1 + $0x70] sm:$0xff] %v4111_v1   ;;  %v2574_v62 = vmul.f32 0.088388346, %v2558_v6  ;;  %v2014_v43 = vmul.f32 %v6108_v22, %v1998_v17  ;;  %v2189_v39 = vmul.f32 %v6095_v28, %v2172_v16  ;;  %v6584_v17 = vld [vmem:[#allocation68_spill] sm:$0xff] }
 0x30a   : > { %v2141_v1 = vmul.f32 %v6102_v45, %v6584_v17  ;;  %v2398_v47 = vmul.f32 0.088388346, %v2382_v63 }
 0x30b   : > { %v4191_v15 = vpack.c.bf16 %v2574_v62, %v2573_v13  ;;  %v2030_v29 = vadd.f32 %v2014_v43, %v1966_v31  ;;  %v2142_v31 = vmul.f32 %v6106_v36, %v5613_v49 }
 0x30c   : > { %v2526_v61 = vpop.permute.xlu0 %2525  ;;  %v2351_v0 = vpop.permute.xlu1 %2350  ;;  %v2205_v43 = vadd.f32 %v2189_v39, %v2141_v1 }
 0x30d   : > { %4401 = vst [vmem:[%s5794_s1 + $0xf0] sm:$0xff] %v4191_v15   ;;  %v2046_v21 = vmul.f32 0.088388346, %v2030_v29  ;;  %v2367_v32 = vmul.f32 %v6108_v22, %v2351_v0  ;;  %v2543_v9 = vmul.f32 %v6095_v28, %v2526_v61  ;;  %v2495_v15 = vmul.f32 %v6102_v45, %v6585_v44 }
 0x30f   : > { %v4076_v6 = vpack.c.bf16 %v2046_v21, %v2045_v35  ;;  %v2383_v13 = vadd.f32 %v2367_v32, %v2319_v50  ;;  %v2496_v50 = vmul.f32 %v6106_v36, %v5615_v27  ;;  %v2221_v35 = vmul.f32 0.088388346, %v2205_v43 }
 0x310   : > { %v2675_v46 = vpop.permute.xlu0 %2674  ;;  %v2174_v62 = vpop.permute.xlu1 %2173  ;;  %v2559_v21 = vadd.f32 %v2543_v9, %v2495_v15  ;;  %v2659_v27 = vmul.f32 %v5746_v40, %v5628_v58 }
 0x311   : > { %4378 = vst [vmem:[%s5794_s1 + $0x38] sm:$0xff] %v4076_v6   ;;  %v2399_v16 = vmul.f32 0.088388346, %v2383_v13  ;;  %v2190_v20 = vmul.f32 %v6108_v22, %v2174_v62  ;;  %v2706_v32 = vmul.f32 %v5744_v26, %v2675_v46  ;;  %v2658_v6 = vmul.f32 %v5738_v51, %v5621_v55 }
 0x312   : > { %v2818_v55 = vmul.f32 %v5738_v51, %v5626_v53  ;;  %v2660_v53 = vmul.f32 %v5814_v18, %v5644_v3  ;;  %v2821_v3 = vmul.f32 %v5820_v57, %v5654_v2 }
 0x313   : > { %v4156_v29 = vpack.c.bf16 %v2399_v16, %v2398_v47  ;;  %v2206_v0 = vadd.f32 %v2190_v20, %v2142_v31  ;;  %v2575_v47 = vmul.f32 0.088388346, %v2559_v21  ;;  %v2722_v9 = vadd.f32 %v2706_v32, %v2658_v6 }
 0x314   : > { %v2835_v49 = vpop.permute.xlu0 %2834  ;;  %v2528_v63 = vpop.permute.xlu1 %2527 }
 0x315   : > { %4394 = vst [vmem:[%s5794_s1 + $0xb8] sm:$0xff] %v4156_v29   ;;  %v2222_v39 = vmul.f32 0.088388346, %v2206_v0  ;;  %v2544_v61 = vmul.f32 %v6108_v22, %v2528_v63  ;;  %v2866_v46 = vmul.f32 %v5744_v26, %v2835_v49  ;;  %v2819_v29 = vmul.f32 %v5746_v40, %v5632_v52 }
 0x316   : > { %v2661_v52 = vmul.f32 %v5820_v57, %v5650_v25 }
 0x317   : > { %v4116_v17 = vpack.c.bf16 %v2222_v39, %v2221_v35  ;;  %v2560_v1 = vadd.f32 %v2544_v61, %v2496_v50  ;;  %v2882_v50 = vadd.f32 %v2866_v46, %v2818_v55  ;;  %v2822_v46 = vmul.f32 %v5864_v60, %v5666_v14 }
 0x318   : > { %v2679_v13 = vpop.permute.xlu0 %2678  ;;  %v2677_v31 = vpop.permute.xlu1 %2676  ;;  %v2665_v14 = vmul.f32 %v5926_v42, %v5686_v4 }
 0x319   : > { %4386 = vst [vmem:[%s5794_s1 + $0x78] sm:$0xff] %v4116_v17   ;;  %v2576_v62 = vmul.f32 0.088388346, %v2560_v1  ;;  %v2707_v43 = vmul.f32 %v5750_v10, %v2677_v31  ;;  %v2708_v63 = vmul.f32 %v5818_v59, %v2679_v13  ;;  %v2820_v17 = vmul.f32 %v5814_v18, %v5648_v30 }
 0x31a   : > { %v2663_v30 = vmul.f32 %v5872_v11, %v5668_v23 }
 0x31b   : > { %v4196_v16 = vpack.c.bf16 %v2576_v62, %v2575_v47  ;;  %v2723_v20 = vadd.f32 %v2707_v43, %v2659_v27  ;;  %v2662_v47 = vmul.f32 %v5864_v60, %v5662_v19  ;;  %v2823_v19 = vmul.f32 %v5872_v11, %v5672_v41 }
 0x31c   : > { %v2839_v44 = vpop.permute.xlu0 %2838  ;;  %v2837_v15 = vpop.permute.xlu1 %2836 }
 0x31d   : > { %4402 = vst [vmem:[%s5794_s1 + $0xf8] sm:$0xff] %v4196_v16   ;;  %v4201_v58 = vpack.c.bf16 %v2723_v20, %v2722_v9  ;;  %v2867_v0 = vmul.f32 %v5750_v10, %v2837_v15  ;;  %v2724_v10 = vadd.f32 %v2708_v63, %v2660_v53  ;;  %v2868_v21 = vmul.f32 %v5818_v59, %v2839_v44 }
 0x31e   : > { %v2824_v63 = vmul.f32 %v5922_v33, %v5684_v56 }
 0x31f   : > { %4202 = vst [vmem:[%s6157_s23] sm:$0xff] %v4201_v58   ;;  %v2883_v26 = vadd.f32 %v2867_v0, %v2819_v29  ;;  %v2884_v6 = vadd.f32 %v2868_v21, %v2820_v17  ;;  %v2664_v29 = vmul.f32 %v5922_v33, %v5680_v12  ;;  %v2825_v12 = vmul.f32 %v5926_v42, %v5690_v7  ;;  %v6588_v21 = vld [vmem:[#allocation73_spill] sm:$0xff] }
 0x320   : > { %v2683_v49 = vpop.permute.xlu0 %2682  ;;  %v2681_v35 = vpop.permute.xlu1 %2680 }
 0x321   : > { %v4241_v51 = vpack.c.bf16 %v2883_v26, %v2882_v50  ;;  %v2709_v40 = vmul.f32 %v5826_v54, %v2681_v35  ;;  %v2710_v13 = vmul.f32 %v5857_v8, %v2683_v49 }
 0x323   : > { %4410 = vst [vmem:[%s6157_s23 + $0x40] sm:$0xff] %v4241_v51   ;;  %v2725_v39 = vadd.f32 %v2709_v40, %v2661_v52  ;;  %v2726_v57 = vadd.f32 %v2710_v13, %v2662_v47  ;;  %v6586_v51 = vld [vmem:[#allocation71_spill] sm:$0xff]  ;;  %v6587_v40 = vld [vmem:[#allocation32_spill] sm:$0xff]  ;;  %v6593_v47 = vld [vmem:[#allocation34_spill] sm:$0xff] }
 0x324   : > { %v2843_v61 = vpop.permute.xlu0 %2842  ;;  %v2841_v32 = vpop.permute.xlu1 %2840 }
 0x325   : > { %v4206_v1 = vpack.c.bf16 %v2725_v39, %v2724_v10  ;;  %v2869_v25 = vmul.f32 %v5826_v54, %v2841_v32  ;;  %v2870_v54 = vmul.f32 %v5857_v8, %v2843_v61  ;;  %v2666_v10 = vmul.f32 %v6587_v40, %v6586_v51  ;;  %v6589_v39 = vld [vmem:[#allocation31_spill] sm:$0xff]  ;;  %v6590_v61 = vld [vmem:[#allocation33_spill] sm:$0xff] }
 0x326   : > { %v2667_v56 = vmul.f32 %v6589_v39, %v6588_v21 }
 0x327   : > { %4403 = vst [vmem:[%s6157_s23 + $0x8] sm:$0xff] %v4206_v1   ;;  %v2885_v31 = vadd.f32 %v2869_v25, %v2821_v3  ;;  %v2886_v20 = vadd.f32 %v2870_v54, %v2822_v46  ;;  %v6591_v1 = vld [vmem:[#allocation72_spill] sm:$0xff]  ;;  %v6595_v54 = vld [vmem:[#allocation38_spill] sm:$0xff] }
 0x328   : > { %v2687_v59 = vpop.permute.xlu0 %2686  ;;  %v2685_v27 = vpop.permute.xlu1 %2684  ;;  %v2826_v25 = vmul.f32 %v6587_v40, %v6591_v1 }
 0x329   : > { %v4246_v18 = vpack.c.bf16 %v2885_v31, %v2884_v6  ;;  %v2711_v2 = vmul.f32 %v5877_v37, %v2685_v27  ;;  %v2712_v44 = vmul.f32 %v5912_v48, %v2687_v59  ;;  %v6592_v6 = vld [vmem:[#allocation74_spill] sm:$0xff] }
 0x32a   : > { %v2827_v13 = vmul.f32 %v6589_v39, %v6592_v6 }
 0x32b   : > { %4411 = vst [vmem:[%s6157_s23 + $0x48] sm:$0xff] %v4246_v18   ;;  %v2727_v62 = vadd.f32 %v2711_v2, %v2663_v30  ;;  %v2728_v11 = vadd.f32 %v2712_v44, %v2664_v29  ;;  %v6599_v29 = vld [vmem:[#allocation76_spill] sm:$0xff] }
 0x32c   : > { %v2847_v43 = vpop.permute.xlu0 %2846  ;;  %v2845_v9 = vpop.permute.xlu1 %2844 }
 0x32d   : > { %v4211_v16 = vpack.c.bf16 %v2727_v62, %v2726_v57  ;;  %v2871_v23 = vmul.f32 %v5877_v37, %v2845_v9  ;;  %v2872_v37 = vmul.f32 %v5912_v48, %v2847_v43  ;;  %v6594_v57 = vld [vmem:[#allocation75_spill] sm:$0xff]  ;;  %v6596_v43 = vld [vmem:[#allocation77_spill] sm:$0xff] }
 0x32e   : > { %v2668_v62 = vmul.f32 %v6595_v54, %v6594_v57  ;;  %v6597_v9 = vld [vmem:[#allocation35_spill] sm:$0xff]  ;;  %v6610_v57 = vld [vmem:[#allocation86_spill] sm:$0xff] }
 0x32f   : > { %4404 = vst [vmem:[%s6157_s23 + $0x10] sm:$0xff] %v4211_v16   ;;  %v2887_v15 = vadd.f32 %v2871_v23, %v2823_v19  ;;  %v2888_v49 = vadd.f32 %v2872_v37, %v2824_v63  ;;  %v2669_v46 = vmul.f32 %v6597_v9, %v6596_v43  ;;  %v6598_v16 = vld [vmem:[#allocation39_spill] sm:$0xff] }
 0x330   : > { %v2691_v8 = vpop.permute.xlu0 %2690  ;;  %v2689_v55 = vpop.permute.xlu1 %2688 }
 0x331   : > { %v4251_v60 = vpack.c.bf16 %v2887_v15, %v2886_v20  ;;  %v2713_v41 = vmul.f32 %v5930_v24, %v2689_v55  ;;  %v2714_v35 = vmul.f32 %v5965_v38, %v2691_v8 }
 0x333   : > { %4412 = vst [vmem:[%s6157_s23 + $0x50] sm:$0xff] %v4251_v60   ;;  %v2729_v58 = vadd.f32 %v2713_v41, %v2665_v14  ;;  %v2730_v42 = vadd.f32 %v2714_v35, %v2666_v10  ;;  %v2828_v14 = vmul.f32 %v6595_v54, %v6599_v29  ;;  %v6600_v60 = vld [vmem:[#allocation78_spill] sm:$0xff]  ;;  %v6604_v35 = vld [vmem:[#allocation40_spill] sm:$0xff]  ;;  %v2833_v54 = vmul.f32 %v6106_v36, %v6610_v57 }
 0x334   : > { %v2851_v0 = vpop.permute.xlu0 %2850  ;;  %v2849_v50 = vpop.permute.xlu1 %2848  ;;  %v2829_v41 = vmul.f32 %v6597_v9, %v6600_v60 }
 0x335   : > { %v4216_v26 = vpack.c.bf16 %v2729_v58, %v2728_v11  ;;  %v2873_v4 = vmul.f32 %v5930_v24, %v2849_v50  ;;  %v2874_v24 = vmul.f32 %v5965_v38, %v2851_v0 }
 0x337   : > { %4405 = vst [vmem:[%s6157_s23 + $0x18] sm:$0xff] %v4216_v26   ;;  %v2889_v53 = vadd.f32 %v2873_v4, %v2825_v12  ;;  %v2890_v27 = vadd.f32 %v2874_v24, %v2826_v25  ;;  %v6601_v12 = vld [vmem:[#allocation79_spill] sm:$0xff]  ;;  %v6602_v26 = vld [vmem:[#allocation37_spill] sm:$0xff] }
 0x338   : > { %v2695_v48 = vpop.permute.xlu0 %2694  ;;  %v2693_v52 = vpop.permute.xlu1 %2692  ;;  %v2670_v4 = vmul.f32 %v6602_v26, %v6601_v12  ;;  %v6607_v25 = vld [vmem:[#allocation83_spill] sm:$0xff] }
 0x339   : > { %v4256_v33 = vpack.c.bf16 %v2889_v53, %v2888_v49  ;;  %v2715_v7 = vmul.f32 %v6590_v61, %v2693_v52  ;;  %v2716_v30 = vmul.f32 %v6593_v47, %v2695_v48  ;;  %v6603_v49 = vld [vmem:[#allocation81_spill] sm:$0xff]  ;;  %v2672_v6 = vmul.f32 %v6102_v45, %v6607_v25 }
 0x33a   : > { %v2671_v53 = vmul.f32 %v6604_v35, %v6603_v49 }
 0x33b   : > { %4413 = vst [vmem:[%s6157_s23 + $0x58] sm:$0xff] %v4256_v33   ;;  %v2731_v32 = vadd.f32 %v2715_v7, %v2667_v56  ;;  %v2732_v20 = vadd.f32 %v2716_v30, %v2668_v62  ;;  %v6605_v56 = vld [vmem:[#allocation80_spill] sm:$0xff] }
 0x33c   : > { %v2855_v17 = vpop.permute.xlu0 %2854  ;;  %v2853_v3 = vpop.permute.xlu1 %2852  ;;  %v2830_v33 = vmul.f32 %v6602_v26, %v6605_v56 }
 0x33d   : > { %v4221_v31 = vpack.c.bf16 %v2731_v32, %v2730_v42  ;;  %v2875_v59 = vmul.f32 %v6590_v61, %v2853_v3  ;;  %v2876_v44 = vmul.f32 %v6593_v47, %v2855_v17  ;;  %v6606_v61 = vld [vmem:[#allocation82_spill] sm:$0xff] }
 0x33e   : > { %v2831_v7 = vmul.f32 %v6604_v35, %v6606_v61 }
 0x33f   : > { %4406 = vst [vmem:[%s6157_s23 + $0x20] sm:$0xff] %v4221_v31   ;;  %v2891_v18 = vadd.f32 %v2875_v59, %v2827_v13  ;;  %v2892_v58 = vadd.f32 %v2876_v44, %v2828_v14  ;;  %v6608_v13 = vld [vmem:[#allocation85_spill] sm:$0xff] }
 0x340   : > { %v2699_v38 = vpop.permute.xlu0 %2698  ;;  %v2697_v2 = vpop.permute.xlu1 %2696  ;;  %v2673_v31 = vmul.f32 %v6106_v36, %v6608_v13 }
 0x341   : > { %v4261_v19 = vpack.c.bf16 %v2891_v18, %v2890_v27  ;;  %v2717_v23 = vmul.f32 %v6598_v16, %v2697_v2  ;;  %v2718_v0 = vmul.f32 %v6058_v5, %v2699_v38  ;;  %v6609_v38 = vld [vmem:[#allocation84_spill] sm:$0xff] }
 0x342   : > { %v2832_v2 = vmul.f32 %v6102_v45, %v6609_v38 }
 0x343   : > { %4414 = vst [vmem:[%s6157_s23 + $0x60] sm:$0xff] %v4261_v19   ;;  %v2733_v15 = vadd.f32 %v2717_v23, %v2669_v46  ;;  %v2734_v40 = vadd.f32 %v2718_v0, %v2670_v4 }
 0x344   : > { %v2859_v8 = vpop.permute.xlu0 %2858  ;;  %v2857_v55 = vpop.permute.xlu1 %2856 }
 0x345   : > { %v4226_v11 = vpack.c.bf16 %v2733_v15, %v2732_v20  ;;  %v2877_v37 = vmul.f32 %v6598_v16, %v2857_v55  ;;  %v2878_v10 = vmul.f32 %v6058_v5, %v2859_v8 }
 0x347   : > { %4407 = vst [vmem:[%s6157_s23 + $0x28] sm:$0xff] %v4226_v11   ;;  %v2893_v50 = vadd.f32 %v2877_v37, %v2829_v41  ;;  %v2894_v32 = vadd.f32 %v2878_v10, %v2830_v33 }
 0x348   : > { %v2701_v63 = vpop.permute.xlu1 %2700  ;;  %v2703_v51 = vpop.permute.xlu0 %2702 }
 0x349   : > { %v4266_v48 = vpack.c.bf16 %v2893_v50, %v2892_v58  ;;  %v2719_v52 = vmul.f32 %v6070_v34, %v2701_v63  ;;  %v2720_v17 = vmul.f32 %v6095_v28, %v2703_v51 }
 0x34b   : > { %4415 = vst [vmem:[%s6157_s23 + $0x68] sm:$0xff] %v4266_v48   ;;  %v2735_v21 = vadd.f32 %v2719_v52, %v2671_v53 }
 0x34c   : > { %v2861_v39 = vpop.permute.xlu1 %2860  ;;  %v2863_v1 = vpop.permute.xlu0 %2862 }
 0x34d   : > { %v4231_v42 = vpack.c.bf16 %v2735_v21, %v2734_v40  ;;  %v2879_v24 = vmul.f32 %v6070_v34, %v2861_v39  ;;  %v2736_v34 = vadd.f32 %v2720_v17, %v2672_v6  ;;  %v2880_v47 = vmul.f32 %v6095_v28, %v2863_v1 }
 0x34f   : > { %4408 = vst [vmem:[%s6157_s23 + $0x30] sm:$0xff] %v4231_v42   ;;  %v2895_v3 = vadd.f32 %v2879_v24, %v2831_v7  ;;  %v2896_v9 = vadd.f32 %v2880_v47, %v2832_v2 }
 0x350   : > { %v2705_v5 = vpop.permute.xlu1 %2704 }
 0x351   : > { %v4271_v59 = vpack.c.bf16 %v2895_v3, %v2894_v32  ;;  %v2721_v27 = vmul.f32 %v6108_v22, %v2705_v5 }
 0x353   : > { %4416 = vst [vmem:[%s6157_s23 + $0x70] sm:$0xff] %v4271_v59   ;;  %v2737_v30 = vadd.f32 %v2721_v27, %v2673_v31 }
 0x354   : > { %v2865_v18 = vpop.permute.xlu1 %2864 }
 0x355   : > { %v4236_v62 = vpack.c.bf16 %v2737_v30, %v2736_v34  ;;  %v2881_v43 = vmul.f32 %v6108_v22, %v2865_v18 }
 0x357   : > { %4409 = vst [vmem:[%s6157_s23 + $0x38] sm:$0xff] %v4236_v62   ;;  %v2897_v46 = vadd.f32 %v2881_v43, %v2833_v54 }
 0x359   : > { %v4276_v19 = vpack.c.bf16 %v2897_v46, %v2896_v9 }
 0x35b   : > { %4417 = vst [vmem:[%s6157_s23 + $0x78] sm:$0xff] %v4276_v19  }
 0x35c   : > { %s6264_s8 = sshll.u32 %s4934_s17, 10  ;;  %s3180_s9 = sshll.u32 %s5794_s1, 4  ;;  %s3181_s9 = int_to_ptr.vmem [resolvable:$true] %s3180_s9 }
 0x35d   : > { %s3163_s30 = scalar_lea.hbm %s6350_s5, %s6264_s8  ;;  %s4770_s21 = smov 1024  }
 0x35e   : > { %p6611_p4 = scmp.ne.s32.totalorder %s6459_s13, 0  ;;  %s4771_s7 = smov 2048  }
 0x35f   : > { %s4772_s6 = smov 16   ;;  %s4773_s12 = smov 64  }
 0x360   : > { %4443 = sst [smem:[#allocation15]] (%p6611_p4), %s4770_s21  ;;  %s4774_s17 = smov 4  }
 0x361   : > { %4444 = sst [smem:[#allocation15 + $0x1]] (%p6611_p4), %s4771_s7  ;;  %s4775_s19 = smov [#allocation14]  }
 0x362   : > { %4445 = sst [smem:[#allocation15 + $0x2]] (%p6611_p4), %s4772_s6  ;;  %s4776_s14 = smov 0  }
 0x363   : > { %4446 = sst [smem:[#allocation15 + $0x3]] (%p6611_p4), %s4773_s12 }
 0x364   : > { %4447 = sst [smem:[#allocation15 + $0x4]] (%p6611_p4), %s4773_s12 }
 0x365   : > { %4448 = sst [smem:[#allocation15 + $0x5]] (%p6611_p4), %s4774_s17 }
 0x366   : > { %4449 = dma.general (%p6611_p4), %s3181_s9, 4096, %s3163_s30, %s3141_s26, %s4775_s19, [#allocation15], %s4776_s14, 0  }
 0x367   : > { %s6612_s24 = sld [smem:[#allocation88_spill]]  ;;  %s3225_s27 = sshll.u32 %s6157_s23, 4  ;;  %s3226_s27 = int_to_ptr.vmem [resolvable:$true] %s3225_s27 }
 0x368   : > { %s4777_s22 = smov 1024   ;;  %s4778_s10 = smov 2048  }
 0x369   : > { %4450 = sst [smem:[#allocation17]] (%p6611_p4), %s4777_s22  ;;  %s4779_s1 = smov 16  }
 0x36a   : > { %4451 = sst [smem:[#allocation17 + $0x1]] (%p6611_p4), %s4778_s10  ;;  %s4780_s26 = smov 64  }
 0x36b   : > { %4452 = sst [smem:[#allocation17 + $0x2]] (%p6611_p4), %s4779_s1  ;;  %s4781_s9 = smov 4  }
 0x36c   : > { %4453 = sst [smem:[#allocation17 + $0x3]] (%p6611_p4), %s4780_s26  ;;  %s4782_s16 = smov [#allocation16]  }
 0x36d   : > { %s3208_s11 = scalar_lea.hbm %s6612_s24, %s6264_s8  ;;  %4454 = sst [smem:[#allocation17 + $0x4]] (%p6611_p4), %s4780_s26 }
 0x36e   : > { %4455 = sst [smem:[#allocation17 + $0x5]] (%p6611_p4), %s4781_s9  ;;  %s4783_s23 = smov 0  }
 0x36f   : > { %4456 = dma.general (%p6611_p4), %s3226_s27, 2048, %s3208_s11, %s6261_s28, %s4782_s16, [#allocation17], %s4783_s23, 0  }
 0x370   : > { %s6613_s21 = sld [smem:[#allocation89_spill]]  ;;  %s3270_s6 = sshll.u32 %s5638_s29, 4  ;;  %s3271_s6 = int_to_ptr.vmem [resolvable:$true] %s3270_s6 }
 0x371   : > { %s4784_s12 = smov 1024   ;;  %s4785_s17 = smov 2048  }
 0x372   : > { %4457 = sst [smem:[#allocation19]] (%p6611_p4), %s4784_s12  ;;  %s4786_s19 = smov 16  }
 0x373   : > { %4458 = sst [smem:[#allocation19 + $0x1]] (%p6611_p4), %s4785_s17  ;;  %s4787_s14 = smov 64  }
 0x374   : > { %4459 = sst [smem:[#allocation19 + $0x2]] (%p6611_p4), %s4786_s19  ;;  %s4788_s15 = smov 4  }
 0x375   : > { %4460 = sst [smem:[#allocation19 + $0x3]] (%p6611_p4), %s4787_s14  ;;  %s4790_s29 = smov 0  }
 0x376   : > { %s3253_s7 = scalar_lea.hbm %s6613_s21, %s6264_s8  ;;  %4461 = sst [smem:[#allocation19 + $0x4]] (%p6611_p4), %s4787_s14 }
 0x377   : > { %4462 = sst [smem:[#allocation19 + $0x5]] (%p6611_p4), %s4788_s15  ;;  %s4789_s8 = smov [#allocation18]  }
 0x378   : > { %4463 = dma.general (%p6611_p4), %s3271_s6, 2048, %s3253_s7, %s6261_s28, %s4789_s8, [#allocation19], %s4790_s29, 0  }
 0x379 PF: > { %s6614_s18 = sld [smem:[#allocation25_spill]]  ;;  %s6615_s24 = sld [smem:[#allocation30_spill]] }
 0x37a   : > { %s6616_s11 = sld [smem:[#allocation27_spill]] }
 0x37f   : > { %s3298_s27 = sand.u32 1, %s6614_s18   ;;  %p6617_p9 = scmp.ne.s32.totalorder %s6615_s24, 0 }
 0x380   : > { %p6618_p12 = scmp.ge.s32.totalorder %s6616_s11, 2  ;;  %s3299_s22 = scalar_lea.sflag [#allocation4], %s3298_s27 }
 0x382   : > { %p4482_p3 = pnand %p6618_p12, %p6617_p9 }
 0x384   : > { %4736 = dma.done.wait (!%p4482_p3), %s3299_s22, 4096  }
 0x385   : > { %4738 = vsyncadd (!%p4482_p3), %s3299_s22, 4294963200  ;;  %s6619_s10 = sadd.s32 4294967294, %s6616_s11  }
 0x386   : > { %s3307_s1 = sand.u32 1, %s6619_s10  }
 0x387   : > { %s3308_s26 = scalar_lea.sflag [#allocation12], %s3307_s1 }
 0x388   : > { %4740 = dma.done.wait (!%p4482_p3), %s3308_s26, 4096  }
 0x389   : > { %4742 = vsyncadd (!%p4482_p3), %s3308_s26, 4294963200  ;;  %s6620_s27 = sld [smem:[#allocation28_spill]]  ;;  %s6621_s13 = sld [smem:[#allocation26_spill]] }
 0x38a   : > { %s6622_s26 = sld [smem:[#allocation29_spill]]  ;;  %s6623_s24 = smov %s4749_s25 }
 0x38f   : > { %p28_p8 = scmp.ge.s32.totalorder %s6620_s27, 4   ;;  %s6624_s25 = smov %s6621_s13 }
 0x391   :  { %30 = sbr.rel (!%p28_p8) target bundleno = 14 (0xe), region = 165 }
 0x398   :  { %3322 = vsyncpa [#allocation3], 1 }
 0x399   :  { %3324 = vsyncpa [#allocation3 + $0x1], 1 }
 0x39a   :  { %3325 = vsyncpa [#allocation6], 1 }
 0x39b   :  { %3327 = vsyncpa [#allocation6 + $0x1], 1 }
 0x39c   :  { %3328 = vsyncpa [#allocation9], 1 }
 0x39d   :  { %3329 = vsyncpa [#allocation4], 1 }
 0x39e   :  { %3331 = vsyncpa [#allocation4 + $0x1], 1 }
 0x39f   :  { %3332 = vsyncpa [#allocation12], 1 }
 0x3a0   :  { %3334 = vsyncpa [#allocation12 + $0x1], 1 }

</bundles_post_ra>
